<compile_context>
chip_gen: v7x
topology: tpu7x:2x2x1
jax: 0.10.0
libtpu: 0.0.40
codegen_flags: <defaults>
</compile_context>

<pallas_src>
import functools
import math

import jax
import jax.numpy as jnp
from jax.experimental import pallas as pl
from jax.experimental.pallas import tpu as pltpu


# ---------------------------------------------------------------------------
# Kernel
# ---------------------------------------------------------------------------
def _resblock_kernel(x_ref, cb1_ref, cb2_ref, w1_ref, w2_ref, *rest,
                     nb, has_skip):
    if has_skip:
        (wskip_ref, bskip_ref, o_ref,
         padx_ref, pada_ref, col1_ref, col2_ref, a2_ref) = rest
    else:
        o_ref, padx_ref, pada_ref, col1_ref, col2_ref, a2_ref = rest

    _, hp2, wp2, cin = padx_ref.shape
    H, W = hp2 - 2, wp2 - 2
    cout = pada_ref.shape[3]
    ho, wo = H // 2, W // 2
    inv_sqrt2 = 1.0 / math.sqrt(2.0)

    # Zero the padded scratch buffers.  Only the 1-pixel border actually has to be zero (the
    # interior is fully overwritten below), but the batch grid axis is "parallel": under
    # megacore partitioning a core may never execute program_id==0, so a zero-once-at-step-0
    # init would leave that core's scratch border uninitialized.  Re-zeroing every step keeps
    # the kernel correct on multi-TensorCore parts and costs ~100 vector stores per step.
    # TODO(synk): zero only the thin border strips (or pre-pad along W) to shave those stores.
    padx_ref[...] = jnp.zeros_like(padx_ref)
    pada_ref[...] = jnp.zeros_like(pada_ref)

    # Stage the input image block into the padded (f32) scratch interior.
    padx_ref[:, 1:H + 1, 1:W + 1, :] = x_ref[...]

    def conv3x3(src_ref, col_ref, w_ref, cb_ref, c_src):
        """3x3 'same' conv: im2col into [nb*H*W, 9*c] bf16, ONE MXU matmul, f32 accumulation."""
        for dy in range(3):
            for dx in range(3):
                t = dy * 3 + dx
                tap = src_ref[:, dy:dy + H, dx:dx + W, :]            # [nb, H, W, c] f32
                col_ref[:, t * c_src:(t + 1) * c_src] = (
                    tap.reshape(nb * H * W, c_src).astype(jnp.bfloat16))
        out = jnp.dot(col_ref[...], w_ref[...],
                      preferred_element_type=jnp.float32)            # [nb*H*W, cout]
        # Precomputed coord-channel conv + FusedLeakyReLU bias (f32, broadcast over batch).
        out = out.reshape(nb, H * W, cout) + cb_ref[...][None]
        return jnp.where(out >= 0.0, out, 0.2 * out)                 # leaky_relu(., 0.2), scale=1

    # CoordConvLayer 1 and 2.
    a1 = conv3x3(padx_ref, col1_ref, w1_ref, cb1_ref, cin)           # [nb, H*W, cout] f32
    pada_ref[:, 1:H + 1, 1:W + 1, :] = a1.reshape(nb, H, W, cout)
    a2 = conv3x3(pada_ref, col2_ref, w2_ref, cb2_ref, cout)          # [nb, H*W, cout] f32
    a2_ref[...] = a2.reshape(nb, H, W, cout)

    def avg_pool2(src_ref, c):
        """2x2 average pool: stride-2 sublane loads along W, free outer-dim split along H."""
        ev = src_ref[:, :, pl.ds(0, wo, stride=2), :]                # even columns
        od = src_ref[:, :, pl.ds(1, wo, stride=2), :]                # odd columns
        rows = (ev + od).reshape(nb, ho, 2, wo, c)                   # split H (outer dim, free)
        return (rows[:, :, 0] + rows[:, :, 1]) * 0.25                # [nb, ho, wo, c] f32

    out_pool = avg_pool2(a2_ref, cout)
    x_down = avg_pool2(x_ref, cin)

    if has_skip:                                                      # 1x1 VolumeRenderDiscConv2d
        skip = jnp.dot(x_down.reshape(nb * ho * wo, cin).astype(jnp.bfloat16),
                       wskip_ref[...], preferred_element_type=jnp.float32)
        skip = (skip + bskip_ref[...]).reshape(nb, ho, wo, cout)
    else:
        skip = x_down                                                 # cin == cout

    # TODO(synk): for production Cout < 128, present a lane-dense flattened output slab instead
    #             of this [.., ho, wo, cout] store (masked vst with only `cout` lanes live).
    o_ref[...] = ((out_pool + skip) * inv_sqrt2).astype(o_ref.dtype)


# ---------------------------------------------------------------------------
# Trace-time constants (tiny)
# ---------------------------------------------------------------------------
def _make_coords(H, W):
    """AddCoords channels in [yy, xx] order (matches torch.cat([x, yy, xx]))."""
    yy = jnp.broadcast_to(
        (jnp.arange(H, dtype=jnp.float32)[:, None] / (H - 1)) * 2.0 - 1.0, (H, W))
    xx = jnp.broadcast_to(
        (jnp.arange(W, dtype=jnp.float32)[None, :] / (W - 1)) * 2.0 - 1.0, (H, W))
    return jnp.stack([yy, xx], axis=-1)                               # [H, W, 2]


def _coord_bias(wc, b, H, W):
    """conv3x3(coords, wc, 'SAME') + b  ->  constant [H*W, Cout] f32 map (input-independent)."""
    cb = jax.lax.conv_general_dilated(
        _make_coords(H, W)[None], wc, (1, 1), "SAME",
        dimension_numbers=("NHWC", "HWIO", "NHWC"))
    cout = wc.shape[-1]
    return (cb[0].reshape(H * W, cout) + b[None, :]).astype(jnp.float32)


# ---------------------------------------------------------------------------
# Wrapper
# ---------------------------------------------------------------------------
def volume_render_resblock(x, params, *, batch_block=None):
    """x: [N, H, W, Cin] f32 (NHWC). Returns [N, H//2, W//2, Cout] f32."""
    N, H, W, cin = x.shape
    cout = params["w1x"].shape[-1]
    # W multiple of 16 keeps every in-kernel [.., H, W, C] <-> [.., H*W, C] retile and the
    # pooled-row merge lane/sublane clean; H even for the 2x2 pool.
    assert H % 2 == 0 and W % 16 == 0 and H > 1 and W > 1
    ho, wo = H // 2, W // 2
    has_skip = "wskip" in params

    nb = batch_block or 1
    assert N % nb == 0
    grid = (N // nb,)

    # Trace-time prep (all tiny): coord-channel contribution folded with the activation bias,
    # conv weights flattened to the im2col layout and cast to bf16 (MXU-native).
    cb1 = _coord_bias(params["w1c"], params["b1"], H, W)             # [H*W, cout] f32
    cb2 = _coord_bias(params["w2c"], params["b2"], H, W)
    w1 = params["w1x"].reshape(9 * cin, cout).astype(jnp.bfloat16)   # [9*cin, cout]
    w2 = params["w2x"].reshape(9 * cout, cout).astype(jnp.bfloat16)

    inputs = [x, cb1, cb2, w1, w2]
    in_specs = [
        pl.BlockSpec((nb, H, W, cin), lambda n: (n, 0, 0, 0)),       # x (streamed per step)
        pl.BlockSpec((H * W, cout), lambda n: (0, 0)),               # coord+bias map, conv1
        pl.BlockSpec((H * W, cout), lambda n: (0, 0)),               # coord+bias map, conv2
        pl.BlockSpec((9 * cin, cout), lambda n: (0, 0)),             # conv1 weight (bf16)
        pl.BlockSpec((9 * cout, cout), lambda n: (0, 0)),            # conv2 weight (bf16)
    ]
    if has_skip:
        inputs += [params["wskip"].astype(jnp.bfloat16),
                   params["bskip"].reshape(1, cout)]
        in_specs += [
            pl.BlockSpec((cin, cout), lambda n: (0, 0)),             # 1x1 skip conv weight
            pl.BlockSpec((1, cout), lambda n: (0, 0)),               # skip conv bias (f32)
        ]

    kernel = functools.partial(_resblock_kernel, nb=nb, has_skip=has_skip)

    return pl.pallas_call(
        kernel,
        out_shape=jax.ShapeDtypeStruct((N, ho, wo, cout), x.dtype),
        grid=grid,
        in_specs=in_specs,
        out_specs=pl.BlockSpec((nb, ho, wo, cout), lambda n: (n, 0, 0, 0)),
        scratch_shapes=[
            pltpu.VMEM((nb, H + 2, W + 2, cin), jnp.float32),        # zero-padded input
            pltpu.VMEM((nb, H + 2, W + 2, cout), jnp.float32),       # zero-padded conv1 act
            pltpu.VMEM((nb * H * W, 9 * cin), jnp.bfloat16),         # im2col buffer, conv1
            pltpu.VMEM((nb * H * W, 9 * cout), jnp.bfloat16),        # im2col buffer, conv2
            pltpu.VMEM((nb, H, W, cout), jnp.float32),               # conv2 act (f32 pooling)
        ],
        compiler_params=pltpu.CompilerParams(
            dimension_semantics=("parallel",),
            vmem_limit_bytes=32 * 1024 * 1024,                       # headroom for larger nb/H
        ),
    )(*inputs)


# ---------------------------------------------------------------------------
# Params (kernel-native layout; f32 master copies, cast to bf16 at trace time)
# ---------------------------------------------------------------------------
def init_resblock_params(key, in_channel, out_channel):
    ks = jax.random.split(key, 8)

    def w(k, shape, fan_in):
        return jax.random.normal(k, shape, jnp.float32) / math.sqrt(fan_in)

    fan1 = (in_channel + 2) * 9
    fan2 = (out_channel + 2) * 9
    params = {
        "w1x": w(ks[0], (3, 3, in_channel, out_channel), fan1),
        "w1c": w(ks[1], (3, 3, 2, out_channel), fan1),
        "b1": jax.random.uniform(ks[2], (out_channel,), jnp.float32, -1.0, 1.0)
              * math.sqrt(1.0 / fan1),
        "w2x": w(ks[3], (3, 3, out_channel, out_channel), fan2),
        "w2c": w(ks[4], (3, 3, 2, out_channel), fan2),
        "b2": jax.random.uniform(ks[5], (out_channel,), jnp.float32, -1.0, 1.0)
              * math.sqrt(1.0 / fan2),
    }
    if in_channel != out_channel:
        params["wskip"] = w(ks[6], (in_channel, out_channel), in_channel)
        params["bskip"] = jax.random.uniform(ks[7], (out_channel,), jnp.float32,
                                             -1.0, 1.0) * math.sqrt(1.0 / in_channel)
    return params


# ---------------------------------------------------------------------------
# Pure-JAX reference (mirrors the PyTorch forward; matmuls use the same bf16
# operands / f32 accumulation as the kernel so the comparison isolates kernel bugs
# rather than bf16 quantization)
# ---------------------------------------------------------------------------
def _avg_pool2(t):
    N, H, W, C = t.shape
    return t.reshape(N, H // 2, 2, W // 2, 2, C).mean(axis=(2, 4))


def volume_render_resblock_ref(x, params):
    N, H, W, cin = x.shape
    coords = _make_coords(H, W)[None]                                 # [1, H, W, 2] f32

    def coordconv_lrelu(inp, wx, wc, b):
        img = jax.lax.conv_general_dilated(
            inp.astype(jnp.bfloat16), wx.astype(jnp.bfloat16), (1, 1), "SAME",
            dimension_numbers=("NHWC", "HWIO", "NHWC"),
            preferred_element_type=jnp.float32)
        crd = jax.lax.conv_general_dilated(
            coords, wc, (1, 1), "SAME",
            dimension_numbers=("NHWC", "HWIO", "NHWC"))               # f32 coord path
        out = img + crd + b.reshape(1, 1, 1, -1)
        return jnp.where(out >= 0.0, out, 0.2 * out)                  # FusedLeakyReLU, scale=1

    a1 = coordconv_lrelu(x, params["w1x"], params["w1c"], params["b1"])
    a2 = coordconv_lrelu(a1, params["w2x"], params["w2c"], params["b2"])
    out = _avg_pool2(a2)
    down = _avg_pool2(x)
    if "wskip" in params:
        skip = jnp.einsum("nhwc,cd->nhwd",
                          down.astype(jnp.bfloat16),
                          params["wskip"].astype(jnp.bfloat16),
                          preferred_element_type=jnp.float32) \
               + params["bskip"].reshape(1, 1, 1, -1)
    else:
        skip = down
    return (out + skip) / math.sqrt(2.0)


# ---------------------------------------------------------------------------
if __name__ == "__main__":
    key = jax.random.PRNGKey(0)
    N, H, W = 2, 16, 16

    # Case 1: cin != cout (1x1 skip conv), one image per grid step (batch-parallel grid of 2).
    # Case 2: cin == cout (identity skip), both images folded into the matmul M dim (grid of 1).
    configs = [((4, 8), 1), ((8, 8), 2)]
    for (cin, cout), nb in configs:
        key, kx, kp = jax.random.split(key, 3)
        x = jax.random.normal(kx, (N, H, W, cin), jnp.float32)
        params = init_resblock_params(kp, cin, cout)

        out = volume_render_resblock(x, params, batch_block=nb)
        jax.block_until_ready(out)

        ref = volume_render_resblock_ref(x, params)
        assert out.shape == (N, H // 2, W // 2, cout), out.shape
        max_err = jnp.max(jnp.abs(out - ref))
        assert jnp.allclose(out, ref, atol=2e-3, rtol=2e-3), (
            f"mismatch for (cin={cin}, cout={cout}, nb={nb}): max abs err {max_err}")

    print("KERNEL_OK")
</pallas_src>

<mosaic_0001>
module attributes {stable_mosaic.version = 11 : i64} {
  func.func @_resblock_kernel(%arg0: i32, %arg1: memref<1x16x16x4xf32, #tpu.memory_space<vmem>>, %arg2: memref<256x8xf32, #tpu.memory_space<vmem>>, %arg3: memref<256x8xf32, #tpu.memory_space<vmem>>, %arg4: memref<36x8xbf16, #tpu.memory_space<vmem>>, %arg5: memref<72x8xbf16, #tpu.memory_space<vmem>>, %arg6: memref<4x8xbf16, #tpu.memory_space<vmem>>, %arg7: memref<1x8xf32, #tpu.memory_space<vmem>>, %arg8: memref<1x8x8x8xf32, #tpu.memory_space<vmem>>, %arg9: memref<1x18x18x4xf32, #tpu.memory_space<vmem>>, %arg10: memref<1x18x18x8xf32, #tpu.memory_space<vmem>>, %arg11: memref<256x36xbf16, #tpu.memory_space<vmem>>, %arg12: memref<256x72xbf16, #tpu.memory_space<vmem>>, %arg13: memref<1x16x16x8xf32, #tpu.memory_space<vmem>>) attributes {dimension_semantics = [#tpu.dimension_semantics<parallel>], iteration_bounds = array<i64: 2>, scalar_prefetch = 0 : i64, scratch_operands = 5 : i64, tpu.core_type = #tpu.core_type<tc>, window_params = [{transform_indices = @transform_0, window_bounds = array<i64: 1, 16, 16, 4>}, {pipeline_mode = #tpu.pipeline_mode<synchronous>, transform_indices = @transform_1, window_bounds = array<i64: 256, 8>}, {pipeline_mode = #tpu.pipeline_mode<synchronous>, transform_indices = @transform_2, window_bounds = array<i64: 256, 8>}, {pipeline_mode = #tpu.pipeline_mode<synchronous>, transform_indices = @transform_3, window_bounds = array<i64: 36, 8>}, {pipeline_mode = #tpu.pipeline_mode<synchronous>, transform_indices = @transform_4, window_bounds = array<i64: 72, 8>}, {pipeline_mode = #tpu.pipeline_mode<synchronous>, transform_indices = @transform_5, window_bounds = array<i64: 4, 8>}, {pipeline_mode = #tpu.pipeline_mode<synchronous>, transform_indices = @transform_6, window_bounds = array<i64: 1, 8>}, {transform_indices = @transform_7, window_bounds = array<i64: 1, 8, 8, 8>}]} {
    %cst = arith.constant 0.000000e+00 : f32
    %0 = vector.broadcast %cst : f32 to vector<1x18x18x4xf32>
    %c0 = arith.constant 0 : index
    %c0_0 = arith.constant 0 : index
    %c0_1 = arith.constant 0 : index
    %c0_2 = arith.constant 0 : index
    %1 = vector.load %arg9[%c0, %c0_0, %c0_1, %c0_2] : memref<1x18x18x4xf32, #tpu.memory_space<vmem>>, vector<1x18x18x4xf32>
    tpu.vector_store %arg9[%c0, %c0_0, %c0_1, %c0_2], %0 {strides = array<i32>} : memref<1x18x18x4xf32, #tpu.memory_space<vmem>>, vector<1x18x18x4xf32>,
    %cst_3 = arith.constant 0.000000e+00 : f32
    %2 = vector.broadcast %cst_3 : f32 to vector<1x18x18x8xf32>
    %c0_4 = arith.constant 0 : index
    %c0_5 = arith.constant 0 : index
    %c0_6 = arith.constant 0 : index
    %c0_7 = arith.constant 0 : index
    %3 = vector.load %arg10[%c0_4, %c0_5, %c0_6, %c0_7] : memref<1x18x18x8xf32, #tpu.memory_space<vmem>>, vector<1x18x18x8xf32>
    tpu.vector_store %arg10[%c0_4, %c0_5, %c0_6, %c0_7], %2 {strides = array<i32>} : memref<1x18x18x8xf32, #tpu.memory_space<vmem>>, vector<1x18x18x8xf32>,
    %c0_8 = arith.constant 0 : index
    %c0_9 = arith.constant 0 : index
    %c0_10 = arith.constant 0 : index
    %c0_11 = arith.constant 0 : index
    %4 = vector.load %arg1[%c0_8, %c0_9, %c0_10, %c0_11] : memref<1x16x16x4xf32, #tpu.memory_space<vmem>>, vector<1x16x16x4xf32>
    %c0_12 = arith.constant 0 : index
    %c1 = arith.constant 1 : index
    %c1_13 = arith.constant 1 : index
    %c0_14 = arith.constant 0 : index
    %5 = vector.load %arg9[%c0_12, %c1, %c1_13, %c0_14] : memref<1x18x18x4xf32, #tpu.memory_space<vmem>>, vector<1x16x16x4xf32>
    tpu.vector_store %arg9[%c0_12, %c1, %c1_13, %c0_14], %4 {strides = array<i32>} : memref<1x18x18x4xf32, #tpu.memory_space<vmem>>, vector<1x16x16x4xf32>,
    %c0_15 = arith.constant 0 : index
    %c0_16 = arith.constant 0 : index
    %c0_17 = arith.constant 0 : index
    %c0_18 = arith.constant 0 : index
    %6 = vector.load %arg9[%c0_15, %c0_16, %c0_17, %c0_18] : memref<1x18x18x4xf32, #tpu.memory_space<vmem>>, vector<1x16x16x4xf32>
    %7 = vector.shape_cast %6 : vector<1x16x16x4xf32> to vector<256x4xf32>
    %8 = arith.truncf %7 : vector<256x4xf32> to vector<256x4xbf16>
    %c0_19 = arith.constant 0 : index
    %c0_20 = arith.constant 0 : index
    %9 = vector.load %arg11[%c0_19, %c0_20] : memref<256x36xbf16, #tpu.memory_space<vmem>>, vector<256x4xbf16>
    tpu.vector_store %arg11[%c0_19, %c0_20], %8 {strides = array<i32>} : memref<256x36xbf16, #tpu.memory_space<vmem>>, vector<256x4xbf16>,
    %c0_21 = arith.constant 0 : index
    %c0_22 = arith.constant 0 : index
    %c1_23 = arith.constant 1 : index
    %c0_24 = arith.constant 0 : index
    %10 = vector.load %arg9[%c0_21, %c0_22, %c1_23, %c0_24] : memref<1x18x18x4xf32, #tpu.memory_space<vmem>>, vector<1x16x16x4xf32>
    %11 = vector.shape_cast %10 : vector<1x16x16x4xf32> to vector<256x4xf32>
    %12 = arith.truncf %11 : vector<256x4xf32> to vector<256x4xbf16>
    %c0_25 = arith.constant 0 : index
    %c4 = arith.constant 4 : index
    %13 = vector.load %arg11[%c0_25, %c4] : memref<256x36xbf16, #tpu.memory_space<vmem>>, vector<256x4xbf16>
    tpu.vector_store %arg11[%c0_25, %c4], %12 {strides = array<i32>} : memref<256x36xbf16, #tpu.memory_space<vmem>>, vector<256x4xbf16>,
    %c0_26 = arith.constant 0 : index
    %c0_27 = arith.constant 0 : index
    %c2 = arith.constant 2 : index
    %c0_28 = arith.constant 0 : index
    %14 = vector.load %arg9[%c0_26, %c0_27, %c2, %c0_28] : memref<1x18x18x4xf32, #tpu.memory_space<vmem>>, vector<1x16x16x4xf32>
    %15 = vector.shape_cast %14 : vector<1x16x16x4xf32> to vector<256x4xf32>
    %16 = arith.truncf %15 : vector<256x4xf32> to vector<256x4xbf16>
    %c0_29 = arith.constant 0 : index
    %c8 = arith.constant 8 : index
    %17 = vector.load %arg11[%c0_29, %c8] : memref<256x36xbf16, #tpu.memory_space<vmem>>, vector<256x4xbf16>
    tpu.vector_store %arg11[%c0_29, %c8], %16 {strides = array<i32>} : memref<256x36xbf16, #tpu.memory_space<vmem>>, vector<256x4xbf16>,
    %c0_30 = arith.constant 0 : index
    %c1_31 = arith.constant 1 : index
    %c0_32 = arith.constant 0 : index
    %c0_33 = arith.constant 0 : index
    %18 = vector.load %arg9[%c0_30, %c1_31, %c0_32, %c0_33] : memref<1x18x18x4xf32, #tpu.memory_space<vmem>>, vector<1x16x16x4xf32>
    %19 = vector.shape_cast %18 : vector<1x16x16x4xf32> to vector<256x4xf32>
    %20 = arith.truncf %19 : vector<256x4xf32> to vector<256x4xbf16>
    %c0_34 = arith.constant 0 : index
    %c12 = arith.constant 12 : index
    %21 = vector.load %arg11[%c0_34, %c12] : memref<256x36xbf16, #tpu.memory_space<vmem>>, vector<256x4xbf16>
    tpu.vector_store %arg11[%c0_34, %c12], %20 {strides = array<i32>} : memref<256x36xbf16, #tpu.memory_space<vmem>>, vector<256x4xbf16>,
    %c0_35 = arith.constant 0 : index
    %c1_36 = arith.constant 1 : index
    %c1_37 = arith.constant 1 : index
    %c0_38 = arith.constant 0 : index
    %22 = vector.load %arg9[%c0_35, %c1_36, %c1_37, %c0_38] : memref<1x18x18x4xf32, #tpu.memory_space<vmem>>, vector<1x16x16x4xf32>
    %23 = vector.shape_cast %22 : vector<1x16x16x4xf32> to vector<256x4xf32>
    %24 = arith.truncf %23 : vector<256x4xf32> to vector<256x4xbf16>
    %c0_39 = arith.constant 0 : index
    %c16 = arith.constant 16 : index
    %25 = vector.load %arg11[%c0_39, %c16] : memref<256x36xbf16, #tpu.memory_space<vmem>>, vector<256x4xbf16>
    tpu.vector_store %arg11[%c0_39, %c16], %24 {strides = array<i32>} : memref<256x36xbf16, #tpu.memory_space<vmem>>, vector<256x4xbf16>,
    %c0_40 = arith.constant 0 : index
    %c1_41 = arith.constant 1 : index
    %c2_42 = arith.constant 2 : index
    %c0_43 = arith.constant 0 : index
    %26 = vector.load %arg9[%c0_40, %c1_41, %c2_42, %c0_43] : memref<1x18x18x4xf32, #tpu.memory_space<vmem>>, vector<1x16x16x4xf32>
    %27 = vector.shape_cast %26 : vector<1x16x16x4xf32> to vector<256x4xf32>
    %28 = arith.truncf %27 : vector<256x4xf32> to vector<256x4xbf16>
    %c0_44 = arith.constant 0 : index
    %c20 = arith.constant 20 : index
    %29 = vector.load %arg11[%c0_44, %c20] : memref<256x36xbf16, #tpu.memory_space<vmem>>, vector<256x4xbf16>
    tpu.vector_store %arg11[%c0_44, %c20], %28 {strides = array<i32>} : memref<256x36xbf16, #tpu.memory_space<vmem>>, vector<256x4xbf16>,
    %c0_45 = arith.constant 0 : index
    %c2_46 = arith.constant 2 : index
    %c0_47 = arith.constant 0 : index
    %c0_48 = arith.constant 0 : index
    %30 = vector.load %arg9[%c0_45, %c2_46, %c0_47, %c0_48] : memref<1x18x18x4xf32, #tpu.memory_space<vmem>>, vector<1x16x16x4xf32>
    %31 = vector.shape_cast %30 : vector<1x16x16x4xf32> to vector<256x4xf32>
    %32 = arith.truncf %31 : vector<256x4xf32> to vector<256x4xbf16>
    %c0_49 = arith.constant 0 : index
    %c24 = arith.constant 24 : index
    %33 = vector.load %arg11[%c0_49, %c24] : memref<256x36xbf16, #tpu.memory_space<vmem>>, vector<256x4xbf16>
    tpu.vector_store %arg11[%c0_49, %c24], %32 {strides = array<i32>} : memref<256x36xbf16, #tpu.memory_space<vmem>>, vector<256x4xbf16>,
    %c0_50 = arith.constant 0 : index
    %c2_51 = arith.constant 2 : index
    %c1_52 = arith.constant 1 : index
    %c0_53 = arith.constant 0 : index
    %34 = vector.load %arg9[%c0_50, %c2_51, %c1_52, %c0_53] : memref<1x18x18x4xf32, #tpu.memory_space<vmem>>, vector<1x16x16x4xf32>
    %35 = vector.shape_cast %34 : vector<1x16x16x4xf32> to vector<256x4xf32>
    %36 = arith.truncf %35 : vector<256x4xf32> to vector<256x4xbf16>
    %c0_54 = arith.constant 0 : index
    %c28 = arith.constant 28 : index
    %37 = vector.load %arg11[%c0_54, %c28] : memref<256x36xbf16, #tpu.memory_space<vmem>>, vector<256x4xbf16>
    tpu.vector_store %arg11[%c0_54, %c28], %36 {strides = array<i32>} : memref<256x36xbf16, #tpu.memory_space<vmem>>, vector<256x4xbf16>,
    %c0_55 = arith.constant 0 : index
    %c2_56 = arith.constant 2 : index
    %c2_57 = arith.constant 2 : index
    %c0_58 = arith.constant 0 : index
    %38 = vector.load %arg9[%c0_55, %c2_56, %c2_57, %c0_58] : memref<1x18x18x4xf32, #tpu.memory_space<vmem>>, vector<1x16x16x4xf32>
    %39 = vector.shape_cast %38 : vector<1x16x16x4xf32> to vector<256x4xf32>
    %40 = arith.truncf %39 : vector<256x4xf32> to vector<256x4xbf16>
    %c0_59 = arith.constant 0 : index
    %c32 = arith.constant 32 : index
    %41 = vector.load %arg11[%c0_59, %c32] : memref<256x36xbf16, #tpu.memory_space<vmem>>, vector<256x4xbf16>
    tpu.vector_store %arg11[%c0_59, %c32], %40 {strides = array<i32>} : memref<256x36xbf16, #tpu.memory_space<vmem>>, vector<256x4xbf16>,
    %c0_60 = arith.constant 0 : index
    %c0_61 = arith.constant 0 : index
    %42 = vector.load %arg11[%c0_60, %c0_61] : memref<256x36xbf16, #tpu.memory_space<vmem>>, vector<256x36xbf16>
    %c0_62 = arith.constant 0 : index
    %c0_63 = arith.constant 0 : index
    %43 = vector.load %arg4[%c0_62, %c0_63] : memref<36x8xbf16, #tpu.memory_space<vmem>>, vector<36x8xbf16>
    %cst_64 = arith.constant dense<0.000000e+00> : vector<256x8xf32>
    %44 = tpu.matmul %42, %43, %cst_64 {dimension_numbers = #tpu.dot_dimension_numbers<[1], [0], [0], [1], [0, 0, 1, 1], [], []>} : vector<256x36xbf16>, vector<36x8xbf16>, vector<256x8xf32> -> vector<256x8xf32>
    %45 = vector.shape_cast %44 : vector<256x8xf32> to vector<1x256x8xf32>
    %c0_65 = arith.constant 0 : index
    %c0_66 = arith.constant 0 : index
    %46 = vector.load %arg2[%c0_65, %c0_66] : memref<256x8xf32, #tpu.memory_space<vmem>>, vector<256x8xf32>
    %47 = vector.shape_cast %46 : vector<256x8xf32> to vector<1x256x8xf32>
    %48 = arith.addf %45, %47 : vector<1x256x8xf32>
    %cst_67 = arith.constant 0.000000e+00 : f32
    %49 = vector.broadcast %cst_67 : f32 to vector<1x256x8xf32>
    %50 = arith.cmpf oge, %48, %49 : vector<1x256x8xf32>
    %cst_68 = arith.constant 2.000000e-01 : f32
    %51 = vector.broadcast %cst_68 : f32 to vector<1x256x8xf32>
    %52 = arith.mulf %51, %48 : vector<1x256x8xf32>
    %53 = arith.select %50, %48, %52 : vector<1x256x8xi1>, vector<1x256x8xf32>
    %54 = vector.shape_cast %53 : vector<1x256x8xf32> to vector<1x16x16x8xf32>
    %c0_69 = arith.constant 0 : index
    %c1_70 = arith.constant 1 : index
    %c1_71 = arith.constant 1 : index
    %c0_72 = arith.constant 0 : index
    %55 = vector.load %arg10[%c0_69, %c1_70, %c1_71, %c0_72] : memref<1x18x18x8xf32, #tpu.memory_space<vmem>>, vector<1x16x16x8xf32>
    tpu.vector_store %arg10[%c0_69, %c1_70, %c1_71, %c0_72], %54 {strides = array<i32>} : memref<1x18x18x8xf32, #tpu.memory_space<vmem>>, vector<1x16x16x8xf32>,
    %c0_73 = arith.constant 0 : index
    %c0_74 = arith.constant 0 : index
    %c0_75 = arith.constant 0 : index
    %c0_76 = arith.constant 0 : index
    %56 = vector.load %arg10[%c0_73, %c0_74, %c0_75, %c0_76] : memref<1x18x18x8xf32, #tpu.memory_space<vmem>>, vector<1x16x16x8xf32>
    %57 = vector.shape_cast %56 : vector<1x16x16x8xf32> to vector<256x8xf32>
    %58 = arith.truncf %57 : vector<256x8xf32> to vector<256x8xbf16>
    %c0_77 = arith.constant 0 : index
    %c0_78 = arith.constant 0 : index
    %59 = vector.load %arg12[%c0_77, %c0_78] : memref<256x72xbf16, #tpu.memory_space<vmem>>, vector<256x8xbf16>
    tpu.vector_store %arg12[%c0_77, %c0_78], %58 {strides = array<i32>} : memref<256x72xbf16, #tpu.memory_space<vmem>>, vector<256x8xbf16>,
    %c0_79 = arith.constant 0 : index
    %c0_80 = arith.constant 0 : index
    %c1_81 = arith.constant 1 : index
    %c0_82 = arith.constant 0 : index
    %60 = vector.load %arg10[%c0_79, %c0_80, %c1_81, %c0_82] : memref<1x18x18x8xf32, #tpu.memory_space<vmem>>, vector<1x16x16x8xf32>
    %61 = vector.shape_cast %60 : vector<1x16x16x8xf32> to vector<256x8xf32>
    %62 = arith.truncf %61 : vector<256x8xf32> to vector<256x8xbf16>
    %c0_83 = arith.constant 0 : index
    %c8_84 = arith.constant 8 : index
    %63 = vector.load %arg12[%c0_83, %c8_84] : memref<256x72xbf16, #tpu.memory_space<vmem>>, vector<256x8xbf16>
    tpu.vector_store %arg12[%c0_83, %c8_84], %62 {strides = array<i32>} : memref<256x72xbf16, #tpu.memory_space<vmem>>, vector<256x8xbf16>,
    %c0_85 = arith.constant 0 : index
    %c0_86 = arith.constant 0 : index
    %c2_87 = arith.constant 2 : index
    %c0_88 = arith.constant 0 : index
    %64 = vector.load %arg10[%c0_85, %c0_86, %c2_87, %c0_88] : memref<1x18x18x8xf32, #tpu.memory_space<vmem>>, vector<1x16x16x8xf32>
    %65 = vector.shape_cast %64 : vector<1x16x16x8xf32> to vector<256x8xf32>
    %66 = arith.truncf %65 : vector<256x8xf32> to vector<256x8xbf16>
    %c0_89 = arith.constant 0 : index
    %c16_90 = arith.constant 16 : index
    %67 = vector.load %arg12[%c0_89, %c16_90] : memref<256x72xbf16, #tpu.memory_space<vmem>>, vector<256x8xbf16>
    tpu.vector_store %arg12[%c0_89, %c16_90], %66 {strides = array<i32>} : memref<256x72xbf16, #tpu.memory_space<vmem>>, vector<256x8xbf16>,
    %c0_91 = arith.constant 0 : index
    %c1_92 = arith.constant 1 : index
    %c0_93 = arith.constant 0 : index
    %c0_94 = arith.constant 0 : index
    %68 = vector.load %arg10[%c0_91, %c1_92, %c0_93, %c0_94] : memref<1x18x18x8xf32, #tpu.memory_space<vmem>>, vector<1x16x16x8xf32>
    %69 = vector.shape_cast %68 : vector<1x16x16x8xf32> to vector<256x8xf32>
    %70 = arith.truncf %69 : vector<256x8xf32> to vector<256x8xbf16>
    %c0_95 = arith.constant 0 : index
    %c24_96 = arith.constant 24 : index
    %71 = vector.load %arg12[%c0_95, %c24_96] : memref<256x72xbf16, #tpu.memory_space<vmem>>, vector<256x8xbf16>
    tpu.vector_store %arg12[%c0_95, %c24_96], %70 {strides = array<i32>} : memref<256x72xbf16, #tpu.memory_space<vmem>>, vector<256x8xbf16>,
    %c0_97 = arith.constant 0 : index
    %c1_98 = arith.constant 1 : index
    %c1_99 = arith.constant 1 : index
    %c0_100 = arith.constant 0 : index
    %72 = vector.load %arg10[%c0_97, %c1_98, %c1_99, %c0_100] : memref<1x18x18x8xf32, #tpu.memory_space<vmem>>, vector<1x16x16x8xf32>
    %73 = vector.shape_cast %72 : vector<1x16x16x8xf32> to vector<256x8xf32>
    %74 = arith.truncf %73 : vector<256x8xf32> to vector<256x8xbf16>
    %c0_101 = arith.constant 0 : index
    %c32_102 = arith.constant 32 : index
    %75 = vector.load %arg12[%c0_101, %c32_102] : memref<256x72xbf16, #tpu.memory_space<vmem>>, vector<256x8xbf16>
    tpu.vector_store %arg12[%c0_101, %c32_102], %74 {strides = array<i32>} : memref<256x72xbf16, #tpu.memory_space<vmem>>, vector<256x8xbf16>,
    %c0_103 = arith.constant 0 : index
    %c1_104 = arith.constant 1 : index
    %c2_105 = arith.constant 2 : index
    %c0_106 = arith.constant 0 : index
    %76 = vector.load %arg10[%c0_103, %c1_104, %c2_105, %c0_106] : memref<1x18x18x8xf32, #tpu.memory_space<vmem>>, vector<1x16x16x8xf32>
    %77 = vector.shape_cast %76 : vector<1x16x16x8xf32> to vector<256x8xf32>
    %78 = arith.truncf %77 : vector<256x8xf32> to vector<256x8xbf16>
    %c0_107 = arith.constant 0 : index
    %c40 = arith.constant 40 : index
    %79 = vector.load %arg12[%c0_107, %c40] : memref<256x72xbf16, #tpu.memory_space<vmem>>, vector<256x8xbf16>
    tpu.vector_store %arg12[%c0_107, %c40], %78 {strides = array<i32>} : memref<256x72xbf16, #tpu.memory_space<vmem>>, vector<256x8xbf16>,
    %c0_108 = arith.constant 0 : index
    %c2_109 = arith.constant 2 : index
    %c0_110 = arith.constant 0 : index
    %c0_111 = arith.constant 0 : index
    %80 = vector.load %arg10[%c0_108, %c2_109, %c0_110, %c0_111] : memref<1x18x18x8xf32, #tpu.memory_space<vmem>>, vector<1x16x16x8xf32>
    %81 = vector.shape_cast %80 : vector<1x16x16x8xf32> to vector<256x8xf32>
    %82 = arith.truncf %81 : vector<256x8xf32> to vector<256x8xbf16>
    %c0_112 = arith.constant 0 : index
    %c48 = arith.constant 48 : index
    %83 = vector.load %arg12[%c0_112, %c48] : memref<256x72xbf16, #tpu.memory_space<vmem>>, vector<256x8xbf16>
    tpu.vector_store %arg12[%c0_112, %c48], %82 {strides = array<i32>} : memref<256x72xbf16, #tpu.memory_space<vmem>>, vector<256x8xbf16>,
    %c0_113 = arith.constant 0 : index
    %c2_114 = arith.constant 2 : index
    %c1_115 = arith.constant 1 : index
    %c0_116 = arith.constant 0 : index
    %84 = vector.load %arg10[%c0_113, %c2_114, %c1_115, %c0_116] : memref<1x18x18x8xf32, #tpu.memory_space<vmem>>, vector<1x16x16x8xf32>
    %85 = vector.shape_cast %84 : vector<1x16x16x8xf32> to vector<256x8xf32>
    %86 = arith.truncf %85 : vector<256x8xf32> to vector<256x8xbf16>
    %c0_117 = arith.constant 0 : index
    %c56 = arith.constant 56 : index
    %87 = vector.load %arg12[%c0_117, %c56] : memref<256x72xbf16, #tpu.memory_space<vmem>>, vector<256x8xbf16>
    tpu.vector_store %arg12[%c0_117, %c56], %86 {strides = array<i32>} : memref<256x72xbf16, #tpu.memory_space<vmem>>, vector<256x8xbf16>,
    %c0_118 = arith.constant 0 : index
    %c2_119 = arith.constant 2 : index
    %c2_120 = arith.constant 2 : index
    %c0_121 = arith.constant 0 : index
    %88 = vector.load %arg10[%c0_118, %c2_119, %c2_120, %c0_121] : memref<1x18x18x8xf32, #tpu.memory_space<vmem>>, vector<1x16x16x8xf32>
    %89 = vector.shape_cast %88 : vector<1x16x16x8xf32> to vector<256x8xf32>
    %90 = arith.truncf %89 : vector<256x8xf32> to vector<256x8xbf16>
    %c0_122 = arith.constant 0 : index
    %c64 = arith.constant 64 : index
    %91 = vector.load %arg12[%c0_122, %c64] : memref<256x72xbf16, #tpu.memory_space<vmem>>, vector<256x8xbf16>
    tpu.vector_store %arg12[%c0_122, %c64], %90 {strides = array<i32>} : memref<256x72xbf16, #tpu.memory_space<vmem>>, vector<256x8xbf16>,
    %c0_123 = arith.constant 0 : index
    %c0_124 = arith.constant 0 : index
    %92 = vector.load %arg12[%c0_123, %c0_124] : memref<256x72xbf16, #tpu.memory_space<vmem>>, vector<256x72xbf16>
    %c0_125 = arith.constant 0 : index
    %c0_126 = arith.constant 0 : index
    %93 = vector.load %arg5[%c0_125, %c0_126] : memref<72x8xbf16, #tpu.memory_space<vmem>>, vector<72x8xbf16>
    %cst_127 = arith.constant dense<0.000000e+00> : vector<256x8xf32>
    %94 = tpu.matmul %92, %93, %cst_127 {dimension_numbers = #tpu.dot_dimension_numbers<[1], [0], [0], [1], [0, 0, 1, 1], [], []>} : vector<256x72xbf16>, vector<72x8xbf16>, vector<256x8xf32> -> vector<256x8xf32>
    %95 = vector.shape_cast %94 : vector<256x8xf32> to vector<1x256x8xf32>
    %c0_128 = arith.constant 0 : index
    %c0_129 = arith.constant 0 : index
    %96 = vector.load %arg3[%c0_128, %c0_129] : memref<256x8xf32, #tpu.memory_space<vmem>>, vector<256x8xf32>
    %97 = vector.shape_cast %96 : vector<256x8xf32> to vector<1x256x8xf32>
    %98 = arith.addf %95, %97 : vector<1x256x8xf32>
    %cst_130 = arith.constant 0.000000e+00 : f32
    %99 = vector.broadcast %cst_130 : f32 to vector<1x256x8xf32>
    %100 = arith.cmpf oge, %98, %99 : vector<1x256x8xf32>
    %cst_131 = arith.constant 2.000000e-01 : f32
    %101 = vector.broadcast %cst_131 : f32 to vector<1x256x8xf32>
    %102 = arith.mulf %101, %98 : vector<1x256x8xf32>
    %103 = arith.select %100, %98, %102 : vector<1x256x8xi1>, vector<1x256x8xf32>
    %104 = vector.shape_cast %103 : vector<1x256x8xf32> to vector<1x16x16x8xf32>
    %c0_132 = arith.constant 0 : index
    %c0_133 = arith.constant 0 : index
    %c0_134 = arith.constant 0 : index
    %c0_135 = arith.constant 0 : index
    %105 = vector.load %arg13[%c0_132, %c0_133, %c0_134, %c0_135] : memref<1x16x16x8xf32, #tpu.memory_space<vmem>>, vector<1x16x16x8xf32>
    tpu.vector_store %arg13[%c0_132, %c0_133, %c0_134, %c0_135], %104 {strides = array<i32>} : memref<1x16x16x8xf32, #tpu.memory_space<vmem>>, vector<1x16x16x8xf32>,
    %c0_136 = arith.constant 0 : index
    %c0_137 = arith.constant 0 : index
    %c0_138 = arith.constant 0 : index
    %c0_139 = arith.constant 0 : index
    %106 = tpu.strided_load %arg13[%c0_136, %c0_137, %c0_138, %c0_139] {strides = array<i32: 1, 1, 2, 1>} : memref<1x16x16x8xf32, #tpu.memory_space<vmem>>, vector<1x16x8x8xf32>
    %c0_140 = arith.constant 0 : index
    %c0_141 = arith.constant 0 : index
    %c1_142 = arith.constant 1 : index
    %c0_143 = arith.constant 0 : index
    %107 = tpu.strided_load %arg13[%c0_140, %c0_141, %c1_142, %c0_143] {strides = array<i32: 1, 1, 2, 1>} : memref<1x16x16x8xf32, #tpu.memory_space<vmem>>, vector<1x16x8x8xf32>
    %108 = arith.addf %106, %107 : vector<1x16x8x8xf32>
    %109 = vector.shape_cast %108 : vector<1x16x8x8xf32> to vector<1x8x2x8x8xf32>
    %110 = vector.extract_strided_slice %109 {offsets = [0, 0, 0, 0, 0], sizes = [1, 8, 1, 8, 8], strides = [1, 1, 1, 1, 1]} : vector<1x8x2x8x8xf32> to vector<1x8x1x8x8xf32>
    %111 = vector.shape_cast %110 : vector<1x8x1x8x8xf32> to vector<1x8x8x8xf32>
    %112 = vector.extract_strided_slice %109 {offsets = [0, 0, 1, 0, 0], sizes = [1, 8, 1, 8, 8], strides = [1, 1, 1, 1, 1]} : vector<1x8x2x8x8xf32> to vector<1x8x1x8x8xf32>
    %113 = vector.shape_cast %112 : vector<1x8x1x8x8xf32> to vector<1x8x8x8xf32>
    %114 = arith.addf %111, %113 : vector<1x8x8x8xf32>
    %cst_144 = arith.constant 2.500000e-01 : f32
    %115 = vector.broadcast %cst_144 : f32 to vector<1x8x8x8xf32>
    %116 = arith.mulf %114, %115 : vector<1x8x8x8xf32>
    %c0_145 = arith.constant 0 : index
    %c0_146 = arith.constant 0 : index
    %c0_147 = arith.constant 0 : index
    %c0_148 = arith.constant 0 : index
    %117 = tpu.strided_load %arg1[%c0_145, %c0_146, %c0_147, %c0_148] {strides = array<i32: 1, 1, 2, 1>} : memref<1x16x16x4xf32, #tpu.memory_space<vmem>>, vector<1x16x8x4xf32>
    %c0_149 = arith.constant 0 : index
    %c0_150 = arith.constant 0 : index
    %c1_151 = arith.constant 1 : index
    %c0_152 = arith.constant 0 : index
    %118 = tpu.strided_load %arg1[%c0_149, %c0_150, %c1_151, %c0_152] {strides = array<i32: 1, 1, 2, 1>} : memref<1x16x16x4xf32, #tpu.memory_space<vmem>>, vector<1x16x8x4xf32>
    %119 = arith.addf %117, %118 : vector<1x16x8x4xf32>
    %120 = vector.shape_cast %119 : vector<1x16x8x4xf32> to vector<1x8x2x8x4xf32>
    %121 = vector.extract_strided_slice %120 {offsets = [0, 0, 0, 0, 0], sizes = [1, 8, 1, 8, 4], strides = [1, 1, 1, 1, 1]} : vector<1x8x2x8x4xf32> to vector<1x8x1x8x4xf32>
    %122 = vector.shape_cast %121 : vector<1x8x1x8x4xf32> to vector<1x8x8x4xf32>
    %123 = vector.extract_strided_slice %120 {offsets = [0, 0, 1, 0, 0], sizes = [1, 8, 1, 8, 4], strides = [1, 1, 1, 1, 1]} : vector<1x8x2x8x4xf32> to vector<1x8x1x8x4xf32>
    %124 = vector.shape_cast %123 : vector<1x8x1x8x4xf32> to vector<1x8x8x4xf32>
    %125 = arith.addf %122, %124 : vector<1x8x8x4xf32>
    %cst_153 = arith.constant 2.500000e-01 : f32
    %126 = vector.broadcast %cst_153 : f32 to vector<1x8x8x4xf32>
    %127 = arith.mulf %125, %126 : vector<1x8x8x4xf32>
    %128 = vector.shape_cast %127 : vector<1x8x8x4xf32> to vector<64x4xf32>
    %129 = arith.truncf %128 : vector<64x4xf32> to vector<64x4xbf16>
    %c0_154 = arith.constant 0 : index
    %c0_155 = arith.constant 0 : index
    %130 = vector.load %arg6[%c0_154, %c0_155] : memref<4x8xbf16, #tpu.memory_space<vmem>>, vector<4x8xbf16>
    %cst_156 = arith.constant dense<0.000000e+00> : vector<64x8xf32>
    %131 = tpu.matmul %129, %130, %cst_156 {dimension_numbers = #tpu.dot_dimension_numbers<[1], [0], [0], [1], [0, 0, 1, 1], [], []>} : vector<64x4xbf16>, vector<4x8xbf16>, vector<64x8xf32> -> vector<64x8xf32>
    %c0_157 = arith.constant 0 : index
    %c0_158 = arith.constant 0 : index
    %132 = vector.load %arg7[%c0_157, %c0_158] : memref<1x8xf32, #tpu.memory_space<vmem>>, vector<1x8xf32>
    %133 = vector.broadcast %132 : vector<1x8xf32> to vector<64x8xf32>
    %134 = arith.addf %131, %133 : vector<64x8xf32>
    %135 = vector.shape_cast %134 : vector<64x8xf32> to vector<1x8x8x8xf32>
    %136 = arith.addf %116, %135 : vector<1x8x8x8xf32>
    %cst_159 = arith.constant 0.707106769 : f32
    %137 = vector.broadcast %cst_159 : f32 to vector<1x8x8x8xf32>
    %138 = arith.mulf %136, %137 : vector<1x8x8x8xf32>
    %c0_160 = arith.constant 0 : index
    %c0_161 = arith.constant 0 : index
    %c0_162 = arith.constant 0 : index
    %c0_163 = arith.constant 0 : index
    %139 = vector.load %arg8[%c0_160, %c0_161, %c0_162, %c0_163] : memref<1x8x8x8xf32, #tpu.memory_space<vmem>>, vector<1x8x8x8xf32>
    tpu.vector_store %arg8[%c0_160, %c0_161, %c0_162, %c0_163], %138 {strides = array<i32>} : memref<1x8x8x8xf32, #tpu.memory_space<vmem>>, vector<1x8x8x8xf32>,
    return
  }
  func.func @transform_0(%arg0: i32) -> (i32, i32, i32, i32) {
    %c0_i32 = arith.constant 0 : i32
    %c0_i32_0 = arith.constant 0 : i32
    %c0_i32_1 = arith.constant 0 : i32
    %c0_i32_2 = arith.constant 0 : i32
    return %arg0, %c0_i32, %c0_i32_0, %c0_i32_1 : i32, i32, i32, i32
  }
  func.func @transform_1(%arg0: i32) -> (i32, i32) {
    %c0_i32 = arith.constant 0 : i32
    %c0_i32_0 = arith.constant 0 : i32
    %c0_i32_1 = arith.constant 0 : i32
    return %c0_i32, %c0_i32_0 : i32, i32
  }
  func.func @transform_2(%arg0: i32) -> (i32, i32) {
    %c0_i32 = arith.constant 0 : i32
    %c0_i32_0 = arith.constant 0 : i32
    %c0_i32_1 = arith.constant 0 : i32
    return %c0_i32, %c0_i32_0 : i32, i32
  }
  func.func @transform_3(%arg0: i32) -> (i32, i32) {
    %c0_i32 = arith.constant 0 : i32
    %c0_i32_0 = arith.constant 0 : i32
    %c0_i32_1 = arith.constant 0 : i32
    return %c0_i32, %c0_i32_0 : i32, i32
  }
  func.func @transform_4(%arg0: i32) -> (i32, i32) {
    %c0_i32 = arith.constant 0 : i32
    %c0_i32_0 = arith.constant 0 : i32
    %c0_i32_1 = arith.constant 0 : i32
    return %c0_i32, %c0_i32_0 : i32, i32
  }
  func.func @transform_5(%arg0: i32) -> (i32, i32) {
    %c0_i32 = arith.constant 0 : i32
    %c0_i32_0 = arith.constant 0 : i32
    %c0_i32_1 = arith.constant 0 : i32
    return %c0_i32, %c0_i32_0 : i32, i32
  }
  func.func @transform_6(%arg0: i32) -> (i32, i32) {
    %c0_i32 = arith.constant 0 : i32
    %c0_i32_0 = arith.constant 0 : i32
    %c0_i32_1 = arith.constant 0 : i32
    return %c0_i32, %c0_i32_0 : i32, i32
  }
  func.func @transform_7(%arg0: i32) -> (i32, i32, i32, i32) {
    %c0_i32 = arith.constant 0 : i32
    %c0_i32_0 = arith.constant 0 : i32
    %c0_i32_1 = arith.constant 0 : i32
    %c0_i32_2 = arith.constant 0 : i32
    return %arg0, %c0_i32, %c0_i32_0, %c0_i32_1 : i32, i32, i32, i32
  }
}

</mosaic_0001>

<bundles_post_ra>
// kernel: tpu_custom_call.1
= control target key start
LH: loop header
LB: loop body
LE: loop exit
PB: predicated region body
PF: predicated region fallthrough
CT: control target
= control target key end

     0   :  { %s5866_s0 = inlined_call_operand.vmem [shape: f32[2,16,16,4], index: 0, kind: input, shape index: {}]   ;;  %s5867_s1 = inlined_call_operand.vmem [shape: f32[256,8], index: 1, kind: input, shape index: {}]   ;;  %s5868_s2 = inlined_call_operand.vmem [shape: f32[256,8], index: 2, kind: input, shape index: {}]   ;;  %s5869_s3 = inlined_call_operand.vmem [shape: bf16[36,8], index: 3, kind: input, shape index: {}]   ;;  %s5870_s4 = inlined_call_operand.vmem [shape: bf16[72,8], index: 4, kind: input, shape index: {}]   ;;  %s5871_s5 = inlined_call_operand.vmem [shape: bf16[4,8], index: 5, kind: input, shape index: {}]   ;;  %s5872_s6 = inlined_call_operand.vmem [shape: f32[1,8], index: 6, kind: input, shape index: {}]   ;;  %s5873_s7 = inlined_call_operand.hbm [shape: f32[2,8,8,8], index: 7, kind: output, shape index: {}]  }
   0x1   :  { %5890 = sst [smem:[#allocation10_spill]] %s5866_s0 }
   0x2   :  { %5891 = sst [smem:[#allocation11_spill]] %s5869_s3 }
   0x3   :  { %5892 = sst [smem:[#allocation12_spill]] %s5870_s4 }
   0x4   :  { %12 = vsyncpa [#allocation8], 0 }
   0x5   :  { %14 = vsyncpa [#allocation8 + $0x1], 0  ;;  %s4340_s24 = smov 0   ;;  %s4342_s25 = smov 0  }
   0x6   :  { %s4344_s26 = smov 0   ;;  %s4346_s27 = smov 0  }
   0x7 LB: > { %s4361_s28 = sadd.s32 4294967295, %s4283_s27   ;;  %s3932_s29 = sadd.s32 4294967294, %s4283_s27   ;;  %s4283_s27 = sphi %s4346_s27, %s5909_s27   ;;  %s4279_s26 = sphi %s4344_s26, %s5908_s26   ;;  %s4275_s25 = sphi %s4342_s25, %s5907_s25   ;;  %s4271_s24 = sphi %s4340_s24, %s5906_s24  }
   0x8   : > { %s4365_s30 = sadd.s32 1, %s4283_s27   ;;  %s179_s8 = sadd.s32 1, %s4279_s26 }
   0x9   : > { %s176_s9 = ssub.s32 %s4283_s27, %s4365_s30  ;;  %p189_p0 = scmp.ne.s32.totalorder %s4279_s26, %s4275_s25 }
   0xa   : > { %p177_p1 = scmp.eq.s32.totalorder %s176_s9, 0  ;;  %p190_p2 = scmp.eq.s32.totalorder %s4361_s28, 1 }
   0xb   : > { %p195_p3 = scmp.ne.s32.totalorder %s4275_s25, %s4271_s24  ;;  %p196_p4 = scmp.eq.s32.totalorder %s3932_s29, 1 }
   0xc   : > { %s4376_s10 = scalar_select %p177_p1, %s4279_s26, %s179_s8  }
   0xd   : > { %p4378_p5 = por %p190_p2, %p189_p0  ;;  %p4382_p6 = por %p196_p4, %p195_p3 }
   0xe   : > { %p3935_p7 = scmp.ge.s32.totalorder %s4283_s27, 1  ;;  %p240_p8 = scmp.lt.s32.totalorder %s4283_s27, 3 }
  0x10   : > { %p241_p9 = pnand %p3935_p7, %p240_p8 }
  0x11   : > { %vm278_vm0 = vcmask (!%p241_p9), 31744   ;;  %vm281_vm1 = vcmask (!%p241_p9), 25600   ;;  %v4285_v0 = vmov (!%p241_p9), 0.0   ;;  %p272_p10 = scmp.lt.s32.totalorder (!%p241_p9), %s4361_s28, 1  ;;  %s5895_s0 = sld [smem:[#allocation10_spill]] (!%p241_p9)  ;;  %vm1637_vm2 = vcmask (!%p241_p9), 1041408  }
  0x12   : > { %244 = sbr.rel (%p241_p9) target bundleno = 1079 (0x437), region = 48  ;;  %279 = vst.msk [vmem:[#allocation2] sm:$0xff] (!%p241_p9), %vm278_vm0, %v4285_v0  ;;  %280 = vst.msk [vmem:[#allocation2 + $0x8] sm:$0xff] (!%p241_p9), %vm278_vm0, %v4285_v0  ;;  %s4286_s18 = smov (!%p241_p9), 4   ;;  %vm631_vm3 = vcmask (!%p241_p9), 64544   ;;  %vm760_vm4 = vcmask (!%p241_p9), 97344  }
  0x13   : > { %282 = vst.msk [vmem:[#allocation2 + $0x10] sm:$0x3] (!%p241_p9), %vm281_vm1, %v4285_v0  ;;  %285 = vst.msk [vmem:[#allocation2 + $0x28] sm:$0x3] (!%p241_p9), %vm281_vm1, %v4285_v0  ;;  %s5888_s19 = smov (!%p241_p9), 8   ;;  %s4288_s20 = smov (!%p241_p9), 12  }
  0x14   : > { %283 = vst.msk [vmem:[#allocation2 + $0x18] sm:$0xff] (!%p241_p9), %vm278_vm0, %v4285_v0  ;;  %284 = vst.msk [vmem:[#allocation2 + $0x20] sm:$0xff] (!%p241_p9), %vm278_vm0, %v4285_v0  ;;  %s5884_s21 = smov (!%p241_p9), 16   ;;  %s4290_s22 = smov (!%p241_p9), 20   ;;  %vm889_vm5 = vcmask (!%p241_p9), 130144   ;;  %vm1018_vm6 = vcmask (!%p241_p9), 162944  }
  0x15   : > { %286 = vst.msk [vmem:[#allocation2 + $0x30] sm:$0xff] (!%p241_p9), %vm278_vm0, %v4285_v0  ;;  %287 = vst.msk [vmem:[#allocation2 + $0x38] sm:$0xff] (!%p241_p9), %vm278_vm0, %v4285_v0  ;;  %s5896_s3 = sld [smem:[#allocation11_spill]] (!%p241_p9)  ;;  %s5886_s8 = smov (!%p241_p9), 24   ;;  %vm1147_vm7 = vcmask (!%p241_p9), 195744   ;;  %vm1277_vm8 = vcmask (!%p241_p9), 228544  }
  0x16   : > { %288 = vst.msk [vmem:[#allocation2 + $0x40] sm:$0x3] (!%p241_p9), %vm281_vm1, %v4285_v0  ;;  %291 = vst.msk [vmem:[#allocation2 + $0x58] sm:$0x3] (!%p241_p9), %vm281_vm1, %v4285_v0  ;;  %s4292_s16 = smov (!%p241_p9), 28   ;;  %s5880_s23 = smov (!%p241_p9), 32  }
  0x17   : > { %289 = vst.msk [vmem:[#allocation2 + $0x48] sm:$0xff] (!%p241_p9), %vm278_vm0, %v4285_v0  ;;  %290 = vst.msk [vmem:[#allocation2 + $0x50] sm:$0xff] (!%p241_p9), %vm278_vm0, %v4285_v0  ;;  %vm1406_vm9 = vcmask (!%p241_p9), 261344   ;;  %vm1535_vm10 = vcmask (!%p241_p9), 294144   ;;  %vm1588_vm11 = vcmask (!%p241_p9), 293888   ;;  %vm334_vm12 = vcmask (!%p241_p9), 64512  }
  0x18   : > { %292 = vst.msk [vmem:[#allocation2 + $0x60] sm:$0xff] (!%p241_p9), %vm278_vm0, %v4285_v0  ;;  %293 = vst.msk [vmem:[#allocation2 + $0x68] sm:$0xff] (!%p241_p9), %vm278_vm0, %v4285_v0  ;;  %vm337_vm13 = vcmask (!%p241_p9), 58368   ;;  %vm2171_vm14 = vcmask (!%p241_p9), 130112   ;;  %s5897_s4 = sld [smem:[#allocation12_spill]] (!%p241_p9)  ;;  %s5898_s9 = smov (!%p241_p9), 48  }
  0x19   : > { %294 = vst.msk [vmem:[#allocation2 + $0x70] sm:$0x3] %vm281_vm1, %v4285_v0  ;;  %297 = vst.msk [vmem:[#allocation2 + $0x88] sm:$0x3] %vm281_vm1, %v4285_v0  ;;  %s273_s13 = scalar_select %p272_p10, %s4361_s28, 1  ;;  %v519_v4 = vld [vmem:[#allocation2 + $0x1] sm:$0xff] }
  0x1a   : > { %295 = vst.msk [vmem:[#allocation2 + $0x78] sm:$0xff] %vm278_vm0, %v4285_v0  ;;  %296 = vst.msk [vmem:[#allocation2 + $0x80] sm:$0xff] %vm278_vm0, %v4285_v0  ;;  %v520_v5 = vld [vmem:[#allocation2 + $0x9] sm:$0xff]  ;;  %v455_v24 = vld [vmem:[#allocation2] sm:$0xff]  ;;  %s5899_s15 = smov 56  }
  0x1b   : > { %298 = vst.msk [vmem:[#allocation2 + $0x90] sm:$0xff] %vm278_vm0, %v4285_v0  ;;  %299 = vst.msk [vmem:[#allocation2 + $0x98] sm:$0xff] %vm278_vm0, %v4285_v0  ;;  %s4020_s14 = sshll.u32 %s273_s13, 8  ;;  %v648_v6 = vld [vmem:[#allocation2 + $0x2] sm:$0xff]  ;;  %v551_v7 = vpack.c.bf16 %v520_v5, %v519_v4  ;;  %v649_v8 = vld [vmem:[#allocation2 + $0xa] sm:$0xff]  ;;  %s4021_s13 = sshll.u32 %s4361_s28, 10 }
  0x1c   : > { %300 = vst.msk [vmem:[#allocation2 + $0xa0] sm:$0x3] %vm281_vm1, %v4285_v0  ;;  %303 = vst.msk [vmem:[#allocation2 + $0xb8] sm:$0x3] %vm281_vm1, %v4285_v0  ;;  %s4501_s17 = scalar_lea.vmem %s5895_s0, %s4020_s14  ;;  %v680_v11 = vpack.c.bf16 %v649_v8, %v648_v6  ;;  %v456_v23 = vld [vmem:[#allocation2 + $0x8] sm:$0xff]  ;;  %v4213_v8 = vld [vmem:[%s5896_s3] sm:$0xff]  }
  0x1d   : > { %301 = vst.msk [vmem:[#allocation2 + $0xa8] sm:$0xff] %vm278_vm0, %v4285_v0  ;;  %302 = vst.msk [vmem:[#allocation2 + $0xb0] sm:$0xff] %vm278_vm0, %v4285_v0  ;;  %v390_v1 = vld [vmem:[%s4501_s17] sm:$0xff]  ;;  %v391_v2 = vld [vmem:[%s4501_s17 + $0x8] sm:$0xff]  ;;  %583 = vrot.lane.b32.xlu0 %v551_v7, %s4286_s18  ;;  %v487_v30 = vpack.c.bf16 %v456_v23, %v455_v24  ;;  %4067 = vmatprep.subr.bf16.mxu0 %v4213_v8  ;;  %s4298_s28 = smov [#allocation7]  }
  0x1e   : > { %304 = vst.msk [vmem:[#allocation2 + $0xc0] sm:$0xff] %vm278_vm0, %v4285_v0  ;;  %305 = vst.msk [vmem:[#allocation2 + $0xc8] sm:$0xff] %vm278_vm0, %v4285_v0  ;;  %v392_v3 = vld [vmem:[%s4501_s17 + $0x10] sm:$0xff]  ;;  %v393_v9 = vld [vmem:[%s4501_s17 + $0x18] sm:$0xff]  ;;  %712 = vrot.lane.b32.xlu1 %v680_v11, %s5888_s19  ;;  %4068 = vmatpush3.bf16.msra.mxu0 %v4213_v8 }
  0x1f   : > { %306 = vst.msk [vmem:[#allocation2 + $0xd0] sm:$0x3] %vm281_vm1, %v4285_v0  ;;  %309 = vst.msk [vmem:[#allocation2 + $0xe8] sm:$0x3] %vm281_vm1, %v4285_v0  ;;  %v394_v10 = vld [vmem:[%s4501_s17 + $0x20] sm:$0xff]  ;;  %v395_v12 = vld [vmem:[%s4501_s17 + $0x28] sm:$0xff] }
  0x20   : > { %307 = vst.msk [vmem:[#allocation2 + $0xd8] sm:$0xff] %vm278_vm0, %v4285_v0  ;;  %308 = vst.msk [vmem:[#allocation2 + $0xe0] sm:$0xff] %vm278_vm0, %v4285_v0  ;;  %v396_v13 = vld [vmem:[%s4501_s17 + $0x30] sm:$0xff]  ;;  %v397_v14 = vld [vmem:[%s4501_s17 + $0x38] sm:$0xff] }
  0x21   : > { %310 = vst.msk [vmem:[#allocation2 + $0xf0] sm:$0xff] %vm278_vm0, %v4285_v0  ;;  %311 = vst.msk [vmem:[#allocation2 + $0xf8] sm:$0xff] %vm278_vm0, %v4285_v0  ;;  %v398_v15 = vld [vmem:[%s4501_s17 + $0x40] sm:$0xff]  ;;  %v399_v16 = vld [vmem:[%s4501_s17 + $0x48] sm:$0xff] }
  0x22   : > { %312 = vst.msk [vmem:[#allocation2 + $0x100] sm:$0x3] %vm281_vm1, %v4285_v0  ;;  %315 = vst.msk [vmem:[#allocation2 + $0x118] sm:$0x3] %vm281_vm1, %v4285_v0  ;;  %v400_v17 = vld [vmem:[%s4501_s17 + $0x50] sm:$0xff]  ;;  %v401_v18 = vld [vmem:[%s4501_s17 + $0x58] sm:$0xff] }
  0x23   : > { %313 = vst.msk [vmem:[#allocation2 + $0x108] sm:$0xff] %vm278_vm0, %v4285_v0  ;;  %314 = vst.msk [vmem:[#allocation2 + $0x110] sm:$0xff] %vm278_vm0, %v4285_v0  ;;  %v402_v19 = vld [vmem:[%s4501_s17 + $0x60] sm:$0xff]  ;;  %v403_v20 = vld [vmem:[%s4501_s17 + $0x68] sm:$0xff] }
  0x24   : > { %316 = vst.msk [vmem:[#allocation2 + $0x120] sm:$0xff] %vm278_vm0, %v4285_v0  ;;  %317 = vst.msk [vmem:[#allocation2 + $0x128] sm:$0xff] %vm278_vm0, %v4285_v0  ;;  %v404_v21 = vld [vmem:[%s4501_s17 + $0x70] sm:$0xff]  ;;  %v405_v22 = vld [vmem:[%s4501_s17 + $0x78] sm:$0xff] }
  0x25   : > { %318 = vst.msk [vmem:[#allocation2 + $0x130] sm:$0x3] %vm281_vm1, %v4285_v0  ;;  %321 = vst.msk [vmem:[#allocation2 + $0x148] sm:$0x3] %vm281_vm1, %v4285_v0  ;;  %v406_v25 = vld [vmem:[%s4501_s17 + $0x80] sm:$0xff]  ;;  %v407_v26 = vld [vmem:[%s4501_s17 + $0x88] sm:$0xff] }
  0x26   : > { %319 = vst.msk [vmem:[#allocation2 + $0x138] sm:$0xff] %vm278_vm0, %v4285_v0  ;;  %320 = vst.msk [vmem:[#allocation2 + $0x140] sm:$0xff] %vm278_vm0, %v4285_v0  ;;  %v408_v6 = vld [vmem:[%s4501_s17 + $0x90] sm:$0xff]  ;;  %v409_v7 = vld [vmem:[%s4501_s17 + $0x98] sm:$0xff] }
  0x27   : > { %322 = vst.msk [vmem:[#allocation2 + $0x150] sm:$0xff] %vm278_vm0, %v4285_v0  ;;  %323 = vst.msk [vmem:[#allocation2 + $0x158] sm:$0xff] %vm278_vm0, %v4285_v0  ;;  %v411_v11 = vld [vmem:[%s4501_s17 + $0xa8] sm:$0xff]  ;;  %v412_v24 = vld [vmem:[%s4501_s17 + $0xb0] sm:$0xff] }
  0x28   : > { %324 = vst.msk [vmem:[#allocation2 + $0x160] sm:$0x3] %vm281_vm1, %v4285_v0  ;;  %327 = vst.msk [vmem:[#allocation2 + $0x178] sm:$0x3] %vm281_vm1, %v4285_v0 }
  0x29   : > { %325 = vst.msk [vmem:[#allocation2 + $0x168] sm:$0xff] %vm278_vm0, %v4285_v0  ;;  %326 = vst.msk [vmem:[#allocation2 + $0x170] sm:$0xff] %vm278_vm0, %v4285_v0 }
  0x2a   : > { %328 = vst.msk [vmem:[#allocation2 + $0x180] sm:$0xff] %vm278_vm0, %v4285_v0  ;;  %329 = vst.msk [vmem:[#allocation2 + $0x188] sm:$0xff] %vm278_vm0, %v4285_v0 }
  0x2b   : > { %330 = vst.msk [vmem:[#allocation2 + $0x190] sm:$0x3] %vm281_vm1, %v4285_v0  ;;  %333 = vst.msk [vmem:[#allocation2 + $0x1a8] sm:$0x3] %vm281_vm1, %v4285_v0 }
  0x2c   : > { %331 = vst.msk [vmem:[#allocation2 + $0x198] sm:$0xff] %vm278_vm0, %v4285_v0  ;;  %332 = vst.msk [vmem:[#allocation2 + $0x1a0] sm:$0xff] %vm278_vm0, %v4285_v0 }
  0x2d   : > { %423 = vst.msk [vmem:[#allocation2 + $0x19] sm:$0xff] %vm278_vm0, %v390_v1  ;;  %424 = vst.msk [vmem:[#allocation2 + $0x21] sm:$0xff] %vm278_vm0, %v391_v2 }
  0x2e   : > { %425 = vst.msk [vmem:[#allocation2 + $0x31] sm:$0xff] %vm278_vm0, %v392_v3  ;;  %426 = vst.msk [vmem:[#allocation2 + $0x39] sm:$0xff] %vm278_vm0, %v393_v9  ;;  %v4214_v9 = vld [vmem:[%s5896_s3 + $0x8] sm:$0xff]  }
  0x2f   : > { %427 = vst.msk [vmem:[#allocation2 + $0x49] sm:$0xff] %vm278_vm0, %v394_v10  ;;  %428 = vst.msk [vmem:[#allocation2 + $0x51] sm:$0xff] %vm278_vm0, %v395_v12  ;;  %v410_v10 = vld [vmem:[%s4501_s17 + $0xa0] sm:$0xff]  ;;  %4069 = vmatprep.subr.bf16.mxu0 %v4214_v9 }
  0x30   : > { %429 = vst.msk [vmem:[#allocation2 + $0x61] sm:$0xff] %vm278_vm0, %v396_v13  ;;  %430 = vst.msk [vmem:[#allocation2 + $0x69] sm:$0xff] %vm278_vm0, %v397_v14  ;;  %v4215_v13 = vld [vmem:[%s5896_s3 + $0x10] ss:$0 sps:$4 sm:$0x33]   ;;  %4070 = vmatpush3.bf16.msra.mxu0 %v4214_v9  ;;  %v421_v9 = vld [vmem:[%s4501_s17 + $0xf8] sm:$0xff] }
  0x31   : > { %431 = vst.msk [vmem:[#allocation2 + $0x79] sm:$0xff] %vm278_vm0, %v398_v15  ;;  %432 = vst.msk [vmem:[#allocation2 + $0x81] sm:$0xff] %vm278_vm0, %v399_v16  ;;  %4157 = vmatprep.subr.msk.bf16.mxu0 %vm1637_vm2, %v4215_v13  ;;  %s269_s3 = sand.u32 1, %s4275_s25  }
  0x32   : > { %433 = vst.msk [vmem:[#allocation2 + $0x91] sm:$0xff] %vm278_vm0, %v400_v17  ;;  %434 = vst.msk [vmem:[#allocation2 + $0x99] sm:$0xff] %vm278_vm0, %v401_v18  ;;  %v1639_v18 = vsel %vm1637_vm2, %v4215_v13, 0 }
  0x33   : > { %435 = vst.msk [vmem:[#allocation2 + $0xa9] sm:$0xff] %vm278_vm0, %v402_v19  ;;  %436 = vst.msk [vmem:[#allocation2 + $0xb1] sm:$0xff] %vm278_vm0, %v403_v20 }
  0x34   : > { %437 = vst.msk [vmem:[#allocation2 + $0xc1] sm:$0xff] %vm278_vm0, %v404_v21  ;;  %438 = vst.msk [vmem:[#allocation2 + $0xc9] sm:$0xff] %vm278_vm0, %v405_v22  ;;  %v521_v27 = vld [vmem:[#allocation2 + $0x19] sm:$0xff]  ;;  %v522_v28 = vld [vmem:[#allocation2 + $0x21] sm:$0xff]  ;;  %4072 = vmatpush3.bf16.msra.mxu0 %v1639_v18 }
  0x35   : > { %v650_v29 = vld [vmem:[#allocation2 + $0x1a] sm:$0xff]  ;;  %439 = vst.msk [vmem:[#allocation2 + $0xd9] sm:$0xff] %vm278_vm0, %v406_v25  ;;  %440 = vst.msk [vmem:[#allocation2 + $0xe1] sm:$0xff] %vm278_vm0, %v407_v26  ;;  %v552_v31 = vpack.c.bf16 %v522_v28, %v521_v27  ;;  %v651_v32 = vld [vmem:[#allocation2 + $0x22] sm:$0xff] }
  0x36   : > { %v777_v33 = vld [vmem:[#allocation2 + $0x18] sm:$0xff]  ;;  %v778_v34 = vld [vmem:[#allocation2 + $0x20] sm:$0xff]  ;;  %v681_v35 = vpack.c.bf16 %v651_v32, %v650_v29  ;;  %v779_v37 = vld [vmem:[#allocation2 + $0x30] sm:$0xff]  ;;  %503 = vst.msk [vmem:[#allocation4] sm:$0xff] %vm278_vm0, %v487_v30 }
  0x37   : > { %v809_v36 = vpack.c.bf16 %v778_v34, %v777_v33  ;;  %v780_v38 = vld [vmem:[#allocation2 + $0x38] sm:$0xff]  ;;  %585 = vrot.lane.b32.xlu0 %v552_v31, %s4286_s18  ;;  %v1167_v40 = vld [vmem:[#allocation2 + $0x48] sm:$0xff]  ;;  %v1168_v41 = vld [vmem:[#allocation2 + $0x50] sm:$0xff]  ;;  %441 = vst.msk [vmem:[#allocation2 + $0xf1] sm:$0xff] %vm278_vm0, %v408_v6 }
  0x38   : > { %v810_v39 = vpack.c.bf16 %v780_v38, %v779_v37  ;;  %714 = vrot.lane.b32.xlu1 %v681_v35, %s5888_s19  ;;  %v908_v42 = vld [vmem:[#allocation2 + $0x31] sm:$0xff]  ;;  %v909_v43 = vld [vmem:[#allocation2 + $0x39] sm:$0xff]  ;;  %v4545_v44 = vpack.c.bf16 %v1168_v41, %v1167_v40  ;;  %v784_v46 = vld [vmem:[#allocation2 + $0x68] sm:$0xff]  ;;  %442 = vst.msk [vmem:[#allocation2 + $0xf9] sm:$0xff] %vm278_vm0, %v409_v7 }
  0x39   : > { %504 = vst.msk [vmem:[#allocation4 + $0x8] sm:$0xff] %vm278_vm0, %v809_v36  ;;  %v783_v45 = vld [vmem:[#allocation2 + $0x60] sm:$0xff]  ;;  %v4554_v48 = vpack.c.bf16 %v909_v43, %v908_v42  ;;  %v1171_v49 = vld [vmem:[#allocation2 + $0x78] sm:$0xff]  ;;  %v787_v54 = vld [vmem:[#allocation2 + $0x90] sm:$0xff] }
  0x3a   : > { %505 = vst.msk [vmem:[#allocation4 + $0x10] sm:$0xff] %vm278_vm0, %v810_v39  ;;  %v4549_v47 = vpack.c.bf16 %v784_v46, %v783_v45  ;;  %506 = vst.msk [vmem:[#allocation4 + $0x18] sm:$0xff] %vm278_vm0, %v4545_v44  ;;  %v1172_v50 = vld [vmem:[#allocation2 + $0x80] sm:$0xff]  ;;  %v1037_v51 = vld [vmem:[#allocation2 + $0x32] sm:$0xff] }
  0x3b   : > { %841 = vrot.lane.b32.xlu0 %v809_v36, %s4288_s20  ;;  %v1038_v52 = vld [vmem:[#allocation2 + $0x3a] sm:$0xff]  ;;  %v4556_v53 = vpack.c.bf16 %v1172_v50, %v1171_v49  ;;  %v1175_v58 = vld [vmem:[#allocation2 + $0xa8] sm:$0xff]  ;;  %v1176_v59 = vld [vmem:[#allocation2 + $0xb0] sm:$0xff]  ;;  %443 = vst.msk [vmem:[#allocation2 + $0x109] sm:$0xff] %vm278_vm0, %v410_v10 }
  0x3c   : > { %843 = vrot.lane.b32.xlu1 %v810_v39, %s4288_s20  ;;  %507 = vst.msk [vmem:[#allocation4 + $0x20] sm:$0xff] %vm278_vm0, %v4549_v47  ;;  %v788_v55 = vld [vmem:[#allocation2 + $0x98] sm:$0xff]  ;;  %v4567_v57 = vpack.c.bf16 %v1038_v52, %v1037_v51  ;;  %v4569_v60 = vpack.c.bf16 %v1176_v59, %v1175_v58  ;;  %v791_v61 = vld [vmem:[#allocation2 + $0xc0] sm:$0xff]  ;;  %v792_v62 = vld [vmem:[#allocation2 + $0xc8] sm:$0xff] }
  0x3d   : > { %v4561_v56 = vpack.c.bf16 %v788_v55, %v787_v54  ;;  %508 = vst.msk [vmem:[#allocation4 + $0x28] sm:$0xff] %vm278_vm0, %v4556_v53  ;;  %v4574_v63 = vpack.c.bf16 %v792_v62, %v791_v61  ;;  %v1179_v1 = vld [vmem:[#allocation2 + $0xd8] sm:$0xff]  ;;  %v1180_v2 = vld [vmem:[#allocation2 + $0xe0] sm:$0xff]  ;;  %v1296_v3 = vld [vmem:[#allocation2 + $0x49] sm:$0xff] }
  0x3e   : > { %510 = vst.msk [vmem:[#allocation4 + $0x38] sm:$0xff] %vm278_vm0, %v4569_v60  ;;  %v1297_v4 = vld [vmem:[#allocation2 + $0x51] sm:$0xff]  ;;  %v4580_v5 = vpack.c.bf16 %v1180_v2, %v1179_v1  ;;  %444 = vst.msk [vmem:[#allocation2 + $0x111] sm:$0xff] %vm278_vm0, %v411_v11  ;;  %v912_v26 = vld [vmem:[#allocation2 + $0x61] sm:$0xff] }
  0x3f   : > { %970 = vrot.lane.b32.xlu0 %v552_v31, %s5884_s21  ;;  %509 = vst.msk [vmem:[#allocation4 + $0x30] sm:$0xff] %vm278_vm0, %v4561_v56  ;;  %511 = vst.msk [vmem:[#allocation4 + $0x40] sm:$0xff] %vm278_vm0, %v4574_v63  ;;  %v1327_v12 = vpack.c.bf16 %v1297_v4, %v1296_v3  ;;  %v1425_v14 = vld [vmem:[#allocation2 + $0x4a] sm:$0xff]  ;;  %v1426_v15 = vld [vmem:[#allocation2 + $0x52] sm:$0xff] }
  0x40   : > { %972 = vrot.lane.b32.xlu1 %v4554_v48, %s5884_s21  ;;  %512 = vst.msk [vmem:[#allocation4 + $0x48] sm:$0xff] %vm278_vm0, %v4580_v5  ;;  %v795_v16 = vld [vmem:[#allocation2 + $0xf0] sm:$0xff]  ;;  %v796_v17 = vld [vmem:[#allocation2 + $0xf8] sm:$0xff]  ;;  %v1456_v19 = vpack.c.bf16 %v1426_v15, %v1425_v14  ;;  %445 = vst.msk [vmem:[#allocation2 + $0x121] sm:$0xff] %vm278_vm0, %v412_v24 }
  0x41   : > { %v4613_v20 = vpack.c.bf16 %v796_v17, %v795_v16  ;;  %v413_v25 = vld [vmem:[%s4501_s17 + $0xb8] sm:$0xff]  ;;  %v913_v27 = vld [vmem:[#allocation2 + $0x69] sm:$0xff]  ;;  %v414_v34 = vld [vmem:[%s4501_s17 + $0xc0] sm:$0xff]  ;;  %454 = vst.msk [vmem:[#allocation2 + $0x189] sm:$0xff] %vm278_vm0, %v421_v9 }
  0x42   : > { %v1183_v21 = vld [vmem:[#allocation2 + $0x108] sm:$0xff]  ;;  %446 = vst.msk [vmem:[#allocation2 + $0x129] sm:$0xff] %vm278_vm0, %v413_v25  ;;  %v941_v31 = vpack.c.bf16 %v913_v27, %v912_v26  ;;  %447 = vst.msk [vmem:[#allocation2 + $0x139] sm:$0xff] %vm278_vm0, %v414_v34  ;;  %v1300_v37 = vld [vmem:[#allocation2 + $0x79] sm:$0xff] }
  0x43   : > { %1099 = vrot.lane.b32.xlu0 %v681_v35, %s4290_s22  ;;  %513 = vst.msk [vmem:[#allocation4 + $0x50] sm:$0xff] %vm278_vm0, %v4613_v20  ;;  %v1041_v32 = vld [vmem:[#allocation2 + $0x62] sm:$0xff]  ;;  %v1042_v33 = vld [vmem:[#allocation2 + $0x6a] sm:$0xff]  ;;  %v1429_v43 = vld [vmem:[#allocation2 + $0x7a] sm:$0xff] }
  0x44   : > { %1101 = vrot.lane.b32.xlu1 %v4567_v57, %s4290_s22  ;;  %v415_v35 = vld [vmem:[%s4501_s17 + $0xc8] sm:$0xff]  ;;  %v1070_v36 = vpack.c.bf16 %v1042_v33, %v1041_v32  ;;  %v416_v46 = vld [vmem:[%s4501_s17 + $0xd0] sm:$0xff]  ;;  %v917_v49 = vld [vmem:[#allocation2 + $0x99] sm:$0xff]  ;;  %342 = vst.msk [vmem:[#allocation3 + $0x30] sm:$0xff] %vm334_vm12, %v4285_v0 }
  0x45   : > { %v1184_v22 = vld [vmem:[#allocation2 + $0x110] sm:$0xff]  ;;  %448 = vst.msk [vmem:[#allocation2 + $0x141] sm:$0xff] %vm278_vm0, %v415_v35  ;;  %v1301_v38 = vld [vmem:[#allocation2 + $0x81] sm:$0xff]  ;;  %449 = vst.msk [vmem:[#allocation2 + $0x151] sm:$0xff] %vm278_vm0, %v416_v46 }
  0x46   : > { %v4617_v23 = vpack.c.bf16 %v1184_v22, %v1183_v21  ;;  %v1329_v42 = vpack.c.bf16 %v1301_v38, %v1300_v37  ;;  %v1045_v55 = vld [vmem:[#allocation2 + $0x92] sm:$0xff]  ;;  %v418_v58 = vld [vmem:[%s4501_s17 + $0xe0] sm:$0xff]  ;;  %v419_v59 = vld [vmem:[%s4501_s17 + $0xe8] sm:$0xff]  ;;  %343 = vst.msk [vmem:[#allocation3 + $0x38] sm:$0xff] %vm334_vm12, %v4285_v0 }
  0x47   : > { %1229 = vrot.lane.b32.xlu0 %v810_v39, %s5886_s8  ;;  %v799_v28 = vld [vmem:[#allocation2 + $0x120] sm:$0xff]  ;;  %451 = vst.msk [vmem:[#allocation2 + $0x169] sm:$0xff] %vm278_vm0, %v418_v58  ;;  %452 = vst.msk [vmem:[#allocation2 + $0x171] sm:$0xff] %vm278_vm0, %v419_v59  ;;  %v1304_v61 = vld [vmem:[#allocation2 + $0xa9] sm:$0xff] }
  0x48   : > { %1231 = vrot.lane.b32.xlu1 %v4545_v44, %s5886_s8  ;;  %514 = vst.msk [vmem:[#allocation4 + $0x58] sm:$0xff] %vm278_vm0, %v4617_v23  ;;  %v1305_v62 = vld [vmem:[#allocation2 + $0xb1] sm:$0xff]  ;;  %v920_v10 = vld [vmem:[#allocation2 + $0xc1] sm:$0xff]  ;;  %v921_v11 = vld [vmem:[#allocation2 + $0xc9] sm:$0xff] }
  0x49   : > { %v800_v29 = vld [vmem:[#allocation2 + $0x128] sm:$0xff]  ;;  %v1187_v39 = vld [vmem:[#allocation2 + $0x138] sm:$0xff]  ;;  %v1331_v4 = vpack.c.bf16 %v1305_v62, %v1304_v61  ;;  %335 = vst.msk [vmem:[#allocation3] sm:$0xff] %vm334_vm12, %v4285_v0  ;;  %336 = vst.msk [vmem:[#allocation3 + $0x8] sm:$0xff] %vm334_vm12, %v4285_v0 }
  0x4a   : > { %v4634_v30 = vpack.c.bf16 %v800_v29, %v799_v28  ;;  %v1433_v6 = vld [vmem:[#allocation2 + $0xaa] sm:$0xff]  ;;  %v1434_v7 = vld [vmem:[#allocation2 + $0xb2] sm:$0xff]  ;;  %v1049_v13 = vld [vmem:[#allocation2 + $0xc2] sm:$0xff]  ;;  %339 = vst.msk [vmem:[#allocation3 + $0x18] sm:$0xff] %vm334_vm12, %v4285_v0 }
  0x4b   : > { %1358 = vrot.lane.b32.xlu0 %v4554_v48, %s4292_s16  ;;  %v1460_v8 = vpack.c.bf16 %v1434_v7, %v1433_v6  ;;  %v1050_v14 = vld [vmem:[#allocation2 + $0xca] sm:$0xff]  ;;  %v1309_v18 = vld [vmem:[#allocation2 + $0xe1] sm:$0xff]  ;;  %v925_v35 = vld [vmem:[#allocation2 + $0xf9] sm:$0xff]  ;;  %340 = vst.msk [vmem:[#allocation3 + $0x20] sm:$0xff] %vm334_vm12, %v4285_v0 }
  0x4c   : > { %1360 = vrot.lane.b32.xlu1 %v1327_v12, %s4292_s16  ;;  %515 = vst.msk [vmem:[#allocation4 + $0x60] sm:$0xff] %vm278_vm0, %v4634_v30  ;;  %v1188_v40 = vld [vmem:[#allocation2 + $0x140] sm:$0xff]  ;;  %v803_v50 = vld [vmem:[#allocation2 + $0x150] sm:$0xff]  ;;  %v1074_v15 = vpack.c.bf16 %v1050_v14, %v1049_v13 }
  0x4d   : > { %v4650_v41 = vpack.c.bf16 %v1188_v40, %v1187_v39  ;;  %v1437_v24 = vld [vmem:[#allocation2 + $0xda] sm:$0xff]  ;;  %v1438_v25 = vld [vmem:[#allocation2 + $0xe2] sm:$0xff]  ;;  %v924_v34 = vld [vmem:[#allocation2 + $0xf1] sm:$0xff]  ;;  %345 = vst.msk [vmem:[#allocation3 + $0x48] sm:$0xff] %vm334_vm12, %v4285_v0 }
  0x4e   : > { %v1191_v1 = vld [vmem:[#allocation2 + $0x168] sm:$0xff]  ;;  %v1192_v2 = vld [vmem:[#allocation2 + $0x170] sm:$0xff]  ;;  %v1462_v27 = vpack.c.bf16 %v1438_v25, %v1437_v24  ;;  %v947_v37 = vpack.c.bf16 %v925_v35, %v924_v34  ;;  %v1054_v40 = vld [vmem:[#allocation2 + $0xfa] sm:$0xff]  ;;  %346 = vst.msk [vmem:[#allocation3 + $0x50] sm:$0xff] %vm334_vm12, %v4285_v0 }
  0x4f   : > { %1487 = vrot.lane.b32.xlu0 %v4567_v57, %s5880_s23  ;;  %516 = vst.msk [vmem:[#allocation4 + $0x68] sm:$0xff] %vm278_vm0, %v4650_v41  ;;  %v4686_v3 = vpack.c.bf16 %v1192_v2, %v1191_v1  ;;  %v1053_v39 = vld [vmem:[#allocation2 + $0xf2] sm:$0xff]  ;;  %v1312_v46 = vld [vmem:[#allocation2 + $0x109] sm:$0xff]  ;;  %v928_v6 = vld [vmem:[#allocation2 + $0x121] sm:$0xff] }
  0x50   : > { %587 = vrot.lane.b32.xlu1 %v4554_v48, %s4286_s18  ;;  %v916_v48 = vld [vmem:[#allocation2 + $0x91] sm:$0xff]  ;;  %v929_v7 = vld [vmem:[#allocation2 + $0x129] sm:$0xff]  ;;  %v1445_v24 = vld [vmem:[#allocation2 + $0x13a] sm:$0xff]  ;;  %348 = vst.msk [vmem:[#allocation3 + $0x60] sm:$0xff] %vm334_vm12, %v4285_v0 }
  0x51   : > { %v943_v54 = vpack.c.bf16 %v917_v49, %v916_v48  ;;  %518 = vst.msk [vmem:[#allocation4 + $0x78] sm:$0xff] %vm278_vm0, %v4686_v3  ;;  %v1446_v25 = vld [vmem:[#allocation2 + $0x142] sm:$0xff]  ;;  %v932_v34 = vld [vmem:[#allocation2 + $0x151] sm:$0xff] }
  0x52   : > { %349 = vst.msk [vmem:[#allocation3 + $0x68] sm:$0xff] %vm334_vm12, %v4285_v0  ;;  %351 = vst.msk [vmem:[#allocation3 + $0x78] sm:$0xff] %vm334_vm12, %v4285_v0 }
  0x53   : > { %1489 = vrot.lane.b32.xlu0 %v1456_v19, %s5880_s23  ;;  %352 = vst.msk [vmem:[#allocation3 + $0x80] sm:$0xff] %vm334_vm12, %v4285_v0  ;;  %354 = vst.msk [vmem:[#allocation3 + $0x90] sm:$0xff] %vm334_vm12, %v4285_v0 }
  0x54   : > { %589 = vrot.lane.b32.xlu1 %v1327_v12, %s4286_s18  ;;  %355 = vst.msk [vmem:[#allocation3 + $0x98] sm:$0xff] %vm334_vm12, %v4285_v0  ;;  %357 = vst.msk [vmem:[#allocation3 + $0xa8] sm:$0xff] %vm334_vm12, %v4285_v0 }
  0x55   : > { %358 = vst.msk [vmem:[#allocation3 + $0xb0] sm:$0xff] %vm334_vm12, %v4285_v0  ;;  %360 = vst.msk [vmem:[#allocation3 + $0xc0] sm:$0xff] %vm334_vm12, %v4285_v0 }
  0x56   : > { %361 = vst.msk [vmem:[#allocation3 + $0xc8] sm:$0xff] %vm334_vm12, %v4285_v0  ;;  %363 = vst.msk [vmem:[#allocation3 + $0xd8] sm:$0xff] %vm334_vm12, %v4285_v0 }
  0x57   : > { %716 = vrot.lane.b32.xlu0 %v4567_v57, %s5888_s19  ;;  %v1046_v57 = vld [vmem:[#allocation2 + $0x9a] sm:$0xff]  ;;  %364 = vst.msk [vmem:[#allocation3 + $0xe0] sm:$0xff] %vm334_vm12, %v4285_v0  ;;  %366 = vst.msk [vmem:[#allocation3 + $0xf0] sm:$0xff] %vm334_vm12, %v4285_v0 }
  0x58   : > { %718 = vrot.lane.b32.xlu1 %v1456_v19, %s5888_s19  ;;  %367 = vst.msk [vmem:[#allocation3 + $0xf8] sm:$0xff] %vm334_vm12, %v4285_v0  ;;  %369 = vst.msk [vmem:[#allocation3 + $0x108] sm:$0xff] %vm334_vm12, %v4285_v0 }
  0x59   : > { %370 = vst.msk [vmem:[#allocation3 + $0x110] sm:$0xff] %vm334_vm12, %v4285_v0  ;;  %372 = vst.msk [vmem:[#allocation3 + $0x120] sm:$0xff] %vm334_vm12, %v4285_v0 }
  0x5a   : > { %373 = vst.msk [vmem:[#allocation3 + $0x128] sm:$0xff] %vm334_vm12, %v4285_v0  ;;  %375 = vst.msk [vmem:[#allocation3 + $0x138] sm:$0xff] %vm334_vm12, %v4285_v0 }
  0x5b   : > { %845 = vrot.lane.b32.xlu0 %v4545_v44, %s4288_s20  ;;  %v1430_v44 = vld [vmem:[#allocation2 + $0x82] sm:$0xff]  ;;  %376 = vst.msk [vmem:[#allocation3 + $0x140] sm:$0xff] %vm334_vm12, %v4285_v0  ;;  %378 = vst.msk [vmem:[#allocation3 + $0x150] sm:$0xff] %vm334_vm12, %v4285_v0 }
  0x5c   : > { %847 = vrot.lane.b32.xlu1 %v4549_v47, %s4288_s20  ;;  %v1458_v45 = vpack.c.bf16 %v1430_v44, %v1429_v43  ;;  %v1076_v43 = vpack.c.bf16 %v1054_v40, %v1053_v39  ;;  %379 = vst.msk [vmem:[#allocation3 + $0x158] sm:$0xff] %vm334_vm12, %v4285_v0  ;;  %381 = vst.msk [vmem:[#allocation3 + $0x168] sm:$0xff] %vm334_vm12, %v4285_v0 }
  0x5d   : > { %382 = vst.msk [vmem:[#allocation3 + $0x170] sm:$0xff] %vm334_vm12, %v4285_v0  ;;  %384 = vst.msk [vmem:[#allocation3 + $0x180] sm:$0xff] %vm334_vm12, %v4285_v0 }
  0x5e   : > { %385 = vst.msk [vmem:[#allocation3 + $0x188] sm:$0xff] %vm334_vm12, %v4285_v0  ;;  %387 = vst.msk [vmem:[#allocation3 + $0x198] sm:$0xff] %vm334_vm12, %v4285_v0 }
  0x5f   : > { %974 = vrot.lane.b32.xlu0 %v1327_v12, %s5884_s21  ;;  %v945_v12 = vpack.c.bf16 %v921_v11, %v920_v10  ;;  %v1057_v10 = vld [vmem:[#allocation2 + $0x122] sm:$0xff]  ;;  %v1058_v11 = vld [vmem:[#allocation2 + $0x12a] sm:$0xff]  ;;  %388 = vst.msk [vmem:[#allocation3 + $0x1a0] sm:$0xff] %vm334_vm12, %v4285_v0 }
  0x60   : > { %976 = vrot.lane.b32.xlu1 %v941_v31, %s5884_s21  ;;  %v1078_v13 = vpack.c.bf16 %v1058_v11, %v1057_v10  ;;  %344 = vst.msk [vmem:[#allocation3 + $0x40] sm:$0x3] %vm337_vm13, %v4285_v0  ;;  %338 = vst.msk [vmem:[#allocation3 + $0x10] sm:$0x3] %vm337_vm13, %v4285_v0 }
  0x61   : > { %341 = vst.msk [vmem:[#allocation3 + $0x28] sm:$0x3] %vm337_vm13, %v4285_v0  ;;  %347 = vst.msk [vmem:[#allocation3 + $0x58] sm:$0x3] %vm337_vm13, %v4285_v0 }
  0x62   : > { %350 = vst.msk [vmem:[#allocation3 + $0x70] sm:$0x3] %vm337_vm13, %v4285_v0  ;;  %353 = vst.msk [vmem:[#allocation3 + $0x88] sm:$0x3] %vm337_vm13, %v4285_v0 }
  0x63   : > { %1103 = vrot.lane.b32.xlu0 %v1456_v19, %s4290_s22  ;;  %356 = vst.msk [vmem:[#allocation3 + $0xa0] sm:$0x3] %vm337_vm13, %v4285_v0  ;;  %359 = vst.msk [vmem:[#allocation3 + $0xb8] sm:$0x3] %vm337_vm13, %v4285_v0 }
  0x64   : > { %1105 = vrot.lane.b32.xlu1 %v1070_v36, %s4290_s22  ;;  %362 = vst.msk [vmem:[#allocation3 + $0xd0] sm:$0x3] %vm337_vm13, %v4285_v0  ;;  %365 = vst.msk [vmem:[#allocation3 + $0xe8] sm:$0x3] %vm337_vm13, %v4285_v0 }
  0x65   : > { %368 = vst.msk [vmem:[#allocation3 + $0x100] sm:$0x3] %vm337_vm13, %v4285_v0  ;;  %371 = vst.msk [vmem:[#allocation3 + $0x118] sm:$0x3] %vm337_vm13, %v4285_v0 }
  0x66   : > { %374 = vst.msk [vmem:[#allocation3 + $0x130] sm:$0x3] %vm337_vm13, %v4285_v0  ;;  %377 = vst.msk [vmem:[#allocation3 + $0x148] sm:$0x3] %vm337_vm13, %v4285_v0 }
  0x67   : > { %1233 = vrot.lane.b32.xlu0 %v4549_v47, %s5886_s8  ;;  %v417_v47 = vld [vmem:[%s4501_s17 + $0xd8] sm:$0xff]  ;;  %380 = vst.msk [vmem:[#allocation3 + $0x160] sm:$0x3] %vm337_vm13, %v4285_v0  ;;  %383 = vst.msk [vmem:[#allocation3 + $0x178] sm:$0x3] %vm337_vm13, %v4285_v0 }
  0x68   : > { %1235 = vrot.lane.b32.xlu1 %v4556_v53, %s5886_s8  ;;  %450 = vst.msk [vmem:[#allocation2 + $0x159] sm:$0xff] %vm278_vm0, %v417_v47  ;;  %v1313_v47 = vld [vmem:[#allocation2 + $0x111] sm:$0xff] }
  0x69   : > { %v1335_v49 = vpack.c.bf16 %v1313_v47, %v1312_v46  ;;  %v1321_v46 = vld [vmem:[#allocation2 + $0x171] sm:$0xff]  ;;  %386 = vst.msk [vmem:[#allocation3 + $0x190] sm:$0x3] %vm337_vm13, %v4285_v0  ;;  %389 = vst.msk [vmem:[#allocation3 + $0x1a8] sm:$0x3] %vm337_vm13, %v4285_v0 }
  0x6b   : > { %1362 = vrot.lane.b32.xlu0 %v941_v31, %s4292_s16 }
  0x6c   : > { %1364 = vrot.lane.b32.xlu1 %v1329_v42, %s4292_s16 }
  0x6f   : > { %1491 = vrot.lane.b32.xlu0 %v1070_v36, %s5880_s23  ;;  %v804_v51 = vld [vmem:[#allocation2 + $0x158] sm:$0xff] }
  0x70   : > { %591 = vrot.lane.b32.xlu1 %v941_v31, %s4286_s18  ;;  %v4668_v52 = vpack.c.bf16 %v804_v51, %v803_v50  ;;  %v933_v35 = vld [vmem:[#allocation2 + $0x159] sm:$0xff] }
  0x71   : > { %v1061_v39 = vld [vmem:[#allocation2 + $0x152] sm:$0xff]  ;;  %v1062_v40 = vld [vmem:[#allocation2 + $0x15a] sm:$0xff] }
  0x72   : > { %517 = vst.msk [vmem:[#allocation4 + $0x70] sm:$0xff] %vm278_vm0, %v4668_v52 }
  0x73   : > { %1493 = vrot.lane.b32.xlu0 %v1458_v45, %s5880_s23 }
  0x74   : > { %593 = vrot.lane.b32.xlu1 %v1329_v42, %s4286_s18 }
  0x77   : > { %720 = vrot.lane.b32.xlu0 %v1070_v36, %s5888_s19 }
  0x78   : > { %722 = vrot.lane.b32.xlu1 %v1458_v45, %s5888_s19 }
  0x7b   : > { %849 = vrot.lane.b32.xlu0 %v4556_v53, %s4288_s20  ;;  %v1072_v53 = vpack.c.bf16 %v1046_v57, %v1045_v55  ;;  %v1441_v55 = vld [vmem:[#allocation2 + $0x10a] sm:$0xff] }
  0x7c   : > { %851 = vrot.lane.b32.xlu1 %v4561_v56, %s4288_s20 }
  0x7f   : > { %978 = vrot.lane.b32.xlu0 %v1329_v42, %s5884_s21 }
  0x80   : > { %980 = vrot.lane.b32.xlu1 %v943_v54, %s5884_s21 }
  0x83   : > { %1107 = vrot.lane.b32.xlu0 %v1458_v45, %s4290_s22 }
  0x84   : > { %1109 = vrot.lane.b32.xlu1 %v1072_v53, %s4290_s22 }
  0x87   : > { %1237 = vrot.lane.b32.xlu0 %v4561_v56, %s5886_s8  ;;  %v420_v56 = vld [vmem:[%s4501_s17 + $0xf0] sm:$0xff] }
  0x88   : > { %1239 = vrot.lane.b32.xlu1 %v4569_v60, %s5886_s8  ;;  %453 = vst.msk [vmem:[#allocation2 + $0x181] sm:$0xff] %vm278_vm0, %v420_v56  ;;  %v949_v56 = vpack.c.bf16 %v929_v7, %v928_v6 }
  0x8b   : > { %1366 = vrot.lane.b32.xlu0 %v943_v54, %s4292_s16 }
  0x8c   : > { %1368 = vrot.lane.b32.xlu1 %v1331_v4, %s4292_s16 }
  0x8f   : > { %1495 = vrot.lane.b32.xlu0 %v1072_v53, %s5880_s23  ;;  %v584_v16 = vpop.permute.xlu0 %583  ;;  %v936_v7 = vld [vmem:[#allocation2 + $0x181] sm:$0xff] }
  0x90   : > { %595 = vrot.lane.b32.xlu1 %v943_v54, %s4286_s18  ;;  %632 = vst.msk [vmem:[#allocation4] sm:$0xff] %vm631_vm3, %v584_v16  ;;  %v713_v17 = vpop.permute.xlu1 %712  ;;  %v1316_v16 = vld [vmem:[#allocation2 + $0x139] sm:$0xff]  ;;  %v1065_v11 = vld [vmem:[#allocation2 + $0x182] sm:$0xff] }
  0x91   : > { %761 = vst.msk [vmem:[#allocation4] sm:$0xff] %vm760_vm4, %v713_v17  ;;  %v1317_v17 = vld [vmem:[#allocation2 + $0x141] sm:$0xff] }
  0x93   : > { %1497 = vrot.lane.b32.xlu0 %v1460_v8, %s5880_s23 }
  0x94   : > { %597 = vrot.lane.b32.xlu1 %v1331_v4, %s4286_s18 }
  0x97   : > { %724 = vrot.lane.b32.xlu0 %v1072_v53, %s5888_s19 }
  0x98   : > { %726 = vrot.lane.b32.xlu1 %v1460_v8, %s5888_s19 }
  0x9b   : > { %853 = vrot.lane.b32.xlu0 %v4569_v60, %s4288_s20  ;;  %v1308_v60 = vld [vmem:[#allocation2 + $0xd9] sm:$0xff] }
  0x9c   : > { %855 = vrot.lane.b32.xlu1 %v4574_v63, %s4288_s20  ;;  %v1333_v19 = vpack.c.bf16 %v1309_v18, %v1308_v60  ;;  %v1337_v18 = vpack.c.bf16 %v1317_v17, %v1316_v16 }
  0x9f   : > { %982 = vrot.lane.b32.xlu0 %v1331_v4, %s5884_s21 }
  0xa0   : > { %984 = vrot.lane.b32.xlu1 %v945_v12, %s5884_s21 }
  0xa3   : > { %1111 = vrot.lane.b32.xlu0 %v1460_v8, %s4290_s22 }
  0xa4   : > { %1113 = vrot.lane.b32.xlu1 %v1074_v15, %s4290_s22 }
  0xa7   : > { %1241 = vrot.lane.b32.xlu0 %v4574_v63, %s5886_s8 }
  0xa8   : > { %1243 = vrot.lane.b32.xlu1 %v4580_v5, %s5886_s8 }
  0xa9   : > { %v586_v21 = vpop.permute.xlu0 %585 }
  0xaa   : > { %633 = vst.msk [vmem:[#allocation4 + $0x8] sm:$0xff] %vm631_vm3, %v586_v21  ;;  %v715_v22 = vpop.permute.xlu1 %714 }
  0xab   : > { %762 = vst.msk [vmem:[#allocation4 + $0x8] sm:$0xff] %vm760_vm4, %v715_v22  ;;  %1370 = vrot.lane.b32.xlu0 %v945_v12, %s4292_s16 }
  0xac   : > { %1372 = vrot.lane.b32.xlu1 %v1333_v19, %s4292_s16 }
  0xad   : > { %v842_v26 = vpop.permute.xlu0 %841 }
  0xae   : > { %890 = vst.msk [vmem:[#allocation4] sm:$0xff] %vm889_vm5, %v842_v26  ;;  %v844_v63 = vpop.permute.xlu1 %843 }
  0xaf   : > { %891 = vst.msk [vmem:[#allocation4 + $0x8] sm:$0xff] %vm889_vm5, %v844_v63  ;;  %1499 = vrot.lane.b32.xlu0 %v1074_v15, %s5880_s23 }
  0xb0   : > { %599 = vrot.lane.b32.xlu1 %v945_v12, %s4286_s18 }
  0xb1   : > { %v971_v28 = vpop.permute.xlu0 %970 }
  0xb2   : > { %1019 = vst.msk [vmem:[#allocation4] sm:$0xff] %vm1018_vm6, %v971_v28  ;;  %v973_v29 = vpop.permute.xlu1 %972 }
  0xb3   : > { %1020 = vst.msk [vmem:[#allocation4 + $0x8] sm:$0xff] %vm1018_vm6, %v973_v29  ;;  %1501 = vrot.lane.b32.xlu0 %v1462_v27, %s5880_s23 }
  0xb4   : > { %601 = vrot.lane.b32.xlu1 %v1333_v19, %s4286_s18 }
  0xb5   : > { %v1100_v31 = vpop.permute.xlu0 %1099 }
  0xb6   : > { %1148 = vst.msk [vmem:[#allocation4] sm:$0xff] %vm1147_vm7, %v1100_v31  ;;  %v1102_v32 = vpop.permute.xlu1 %1101 }
  0xb7   : > { %1149 = vst.msk [vmem:[#allocation4 + $0x8] sm:$0xff] %vm1147_vm7, %v1102_v32  ;;  %728 = vrot.lane.b32.xlu0 %v1074_v15, %s5888_s19 }
  0xb8   : > { %730 = vrot.lane.b32.xlu1 %v1462_v27, %s5888_s19 }
  0xb9   : > { %v1230_v33 = vpop.permute.xlu0 %1229 }
  0xba   : > { %1278 = vst.msk [vmem:[#allocation4] sm:$0xff] %vm1277_vm8, %v1230_v33  ;;  %v1232_v36 = vpop.permute.xlu1 %1231 }
  0xbb   : > { %1279 = vst.msk [vmem:[#allocation4 + $0x8] sm:$0xff] %vm1277_vm8, %v1232_v36  ;;  %857 = vrot.lane.b32.xlu0 %v4580_v5, %s4288_s20 }
  0xbc   : > { %859 = vrot.lane.b32.xlu1 %v4613_v20, %s4288_s20 }
  0xbd   : > { %v1359_v38 = vpop.permute.xlu0 %1358 }
  0xbe   : > { %1407 = vst.msk [vmem:[#allocation4] sm:$0xff] %vm1406_vm9, %v1359_v38  ;;  %v1361_v42 = vpop.permute.xlu1 %1360 }
  0xbf   : > { %1408 = vst.msk [vmem:[#allocation4 + $0x8] sm:$0xff] %vm1406_vm9, %v1361_v42  ;;  %986 = vrot.lane.b32.xlu0 %v1333_v19, %s5884_s21 }
  0xc0   : > { %988 = vrot.lane.b32.xlu1 %v947_v37, %s5884_s21 }
  0xc1   : > { %v1488_v5 = vpop.permute.xlu0 %1487 }
  0xc2   : > { %1536 = vst.msk [vmem:[#allocation4] sm:$0xff] %vm1535_vm10, %v1488_v5  ;;  %v588_v44 = vpop.permute.xlu1 %587 }
  0xc3   : > { %634 = vst.msk [vmem:[#allocation4 + $0x10] sm:$0xff] %vm631_vm3, %v588_v44  ;;  %1115 = vrot.lane.b32.xlu0 %v1462_v27, %s4290_s22  ;;  %v1466_v27 = vpack.c.bf16 %v1446_v25, %v1445_v24  ;;  %v1453_v25 = vld [vmem:[#allocation2 + $0x19a] sm:$0xff] }
  0xc4   : > { %1117 = vrot.lane.b32.xlu1 %v1076_v43, %s4290_s22 }
  0xc5   : > { %v1490_v45 = vpop.permute.xlu0 %1489 }
  0xc6   : > { %1537 = vst.msk [vmem:[#allocation4 + $0x8] sm:$0xff] %vm1535_vm10, %v1490_v45  ;;  %v590_v48 = vpop.permute.xlu1 %589  ;;  %v1320_v45 = vld [vmem:[#allocation2 + $0x169] sm:$0xff] }
  0xc7   : > { %635 = vst.msk [vmem:[#allocation4 + $0x18] sm:$0xff] %vm631_vm3, %v590_v48  ;;  %1245 = vrot.lane.b32.xlu0 %v4613_v20, %s5886_s8  ;;  %v1442_v20 = vld [vmem:[#allocation2 + $0x112] sm:$0xff]  ;;  %v1339_v48 = vpack.c.bf16 %v1321_v46, %v1320_v45 }
  0xc8   : > { %1247 = vrot.lane.b32.xlu1 %v4617_v23, %s5886_s8  ;;  %v1464_v53 = vpack.c.bf16 %v1442_v20, %v1441_v55  ;;  %v1450_v55 = vld [vmem:[#allocation2 + $0x172] sm:$0xff] }
  0xc9   : > { %v717_v50 = vpop.permute.xlu0 %716  ;;  %v1552_v51 = vld [vmem:[#allocation4] sm:$0xff] }
  0xca   : > { %763 = vst.msk [vmem:[#allocation4 + $0x10] sm:$0xff] %vm760_vm4, %v717_v50  ;;  %v719_v54 = vpop.permute.xlu1 %718  ;;  %4073 = vmatprep.mubr.msk.bf16.mxu0 %vm1588_vm11, %v1552_v51 }
  0xcb   : > { %764 = vst.msk [vmem:[#allocation4 + $0x18] sm:$0xff] %vm760_vm4, %v719_v54  ;;  %1374 = vrot.lane.b32.xlu0 %v947_v37, %s4292_s16  ;;  %v1449_v54 = vld [vmem:[#allocation2 + $0x16a] sm:$0xff] }
  0xcc   : > { %1376 = vrot.lane.b32.xlu1 %v1335_v49, %s4292_s16 }
  0xcd   : > { %v846_v57 = vpop.permute.xlu0 %845  ;;  %v1553_v58 = vld [vmem:[#allocation4 + $0x8] sm:$0xff] }
  0xce   : > { %892 = vst.msk [vmem:[#allocation4 + $0x10] sm:$0xff] %vm889_vm5, %v846_v57  ;;  %v848_v59 = vpop.permute.xlu1 %847  ;;  %4074 = vmatmul.mubr.msk.bf16.vlgmr.msra.gmra.mrb[0].mxu0 %vm1588_vm11, %v1553_v58  ;;  %v4839_v58 = vpack.c.bf16 %v1450_v55, %v1449_v54 }
  0xcf   : > { %893 = vst.msk [vmem:[#allocation4 + $0x18] sm:$0xff] %vm889_vm5, %v848_v59  ;;  %1503 = vrot.lane.b32.xlu0 %v1076_v43, %s5880_s23 }
  0xd0   : > { %603 = vrot.lane.b32.xlu1 %v947_v37, %s4286_s18  ;;  %v951_v37 = vpack.c.bf16 %v933_v35, %v932_v34  ;;  %v2188_v34 = vld [vmem:[#allocation3 + $0x2] sm:$0xff]  ;;  %v2189_v35 = vld [vmem:[#allocation3 + $0xa] sm:$0xff] }
  0xd1   : > { %v975_v61 = vpop.permute.xlu0 %974 }
  0xd2   : > { %1021 = vst.msk [vmem:[#allocation4 + $0x10] sm:$0xff] %vm1018_vm6, %v975_v61  ;;  %v977_v62 = vpop.permute.xlu1 %976 }
  0xd3   : > { %1022 = vst.msk [vmem:[#allocation4 + $0x18] sm:$0xff] %vm1018_vm6, %v977_v62  ;;  %1505 = vrot.lane.b32.xlu0 %v1464_v53, %s5880_s23  ;;  %v807_v62 = vld [vmem:[#allocation2 + $0x180] sm:$0xff] }
  0xd4   : > { %605 = vrot.lane.b32.xlu1 %v1335_v49, %s4286_s18 }
  0xd5   : > { %v1104_v1 = vpop.permute.xlu0 %1103 }
  0xd6   : > { %1150 = vst.msk [vmem:[#allocation4 + $0x10] sm:$0xff] %vm1147_vm7, %v1104_v1  ;;  %v1106_v2 = vpop.permute.xlu1 %1105  ;;  %v808_v1 = vld [vmem:[#allocation2 + $0x188] sm:$0xff] }
  0xd7   : > { %1151 = vst.msk [vmem:[#allocation4 + $0x18] sm:$0xff] %vm1147_vm7, %v1106_v2  ;;  %732 = vrot.lane.b32.xlu0 %v1076_v43, %s5888_s19  ;;  %v1080_v43 = vpack.c.bf16 %v1062_v40, %v1061_v39 }
  0xd8   : > { %734 = vrot.lane.b32.xlu1 %v1464_v53, %s5888_s19 }
  0xd9   : > { %v1234_v4 = vpop.permute.xlu0 %1233 }
  0xda   : > { %1280 = vst.msk [vmem:[#allocation4 + $0x10] sm:$0xff] %vm1277_vm8, %v1234_v4  ;;  %v1236_v8 = vpop.permute.xlu1 %1235  ;;  %v4852_v4 = vpack.c.bf16 %v808_v1, %v807_v62 }
  0xdb   : > { %1281 = vst.msk [vmem:[#allocation4 + $0x18] sm:$0xff] %vm1277_vm8, %v1236_v8  ;;  %861 = vrot.lane.b32.xlu0 %v4617_v23, %s4288_s20  ;;  %v937_v8 = vld [vmem:[#allocation2 + $0x189] sm:$0xff] }
  0xdc   : > { %863 = vrot.lane.b32.xlu1 %v4634_v30, %s4288_s20 }
  0xdd   : > { %v1363_v9 = vpop.permute.xlu0 %1362 }
  0xde   : > { %1409 = vst.msk [vmem:[#allocation4 + $0x10] sm:$0xff] %vm1406_vm9, %v1363_v9  ;;  %v1365_v12 = vpop.permute.xlu1 %1364  ;;  %v4860_v9 = vpack.c.bf16 %v937_v8, %v936_v7 }
  0xdf   : > { %1410 = vst.msk [vmem:[#allocation4 + $0x18] sm:$0xff] %vm1406_vm9, %v1365_v12  ;;  %990 = vrot.lane.b32.xlu0 %v1335_v49, %s5884_s21  ;;  %v1066_v12 = vld [vmem:[#allocation2 + $0x18a] sm:$0xff] }
  0xe0   : > { %992 = vrot.lane.b32.xlu1 %v949_v56, %s5884_s21 }
  0xe1   : > { %v1492_v14 = vpop.permute.xlu0 %1491 }
  0xe2   : > { %1538 = vst.msk [vmem:[#allocation4 + $0x10] sm:$0xff] %vm1535_vm10, %v1492_v14  ;;  %v592_v23 = vpop.permute.xlu1 %591  ;;  %v4867_v14 = vpack.c.bf16 %v1066_v12, %v1065_v11 }
  0xe3   : > { %636 = vst.msk [vmem:[#allocation4 + $0x20] sm:$0xff] %vm631_vm3, %v592_v23  ;;  %1119 = vrot.lane.b32.xlu0 %v1464_v53, %s4290_s22  ;;  %v4869_v23 = vld [vmem:[#allocation2 + $0x198] sm:$0xff] }
  0xe4   : > { %1121 = vrot.lane.b32.xlu1 %v1078_v13, %s4290_s22 }
  0xe5   : > { %v1494_v15 = vpop.permute.xlu0 %1493 }
  0xe6   : > { %1539 = vst.msk [vmem:[#allocation4 + $0x18] sm:$0xff] %vm1535_vm10, %v1494_v15  ;;  %v594_v60 = vpop.permute.xlu1 %593  ;;  %v4871_v15 = vld [vmem:[#allocation2 + $0x1a0] sm:$0xff] }
  0xe7   : > { %637 = vst.msk [vmem:[#allocation4 + $0x28] sm:$0xff] %vm631_vm3, %v594_v60  ;;  %1249 = vrot.lane.b32.xlu0 %v4634_v30, %s5886_s8  ;;  %v1212_v17 = vpack.c.bf16 %v4871_v15, %v4869_v23 }
  0xe8   : > { %1251 = vrot.lane.b32.xlu1 %v4650_v41, %s5886_s8 }
  0xe9   : > { %v721_v19 = vpop.permute.xlu0 %720  ;;  %v1554_v21 = vld [vmem:[#allocation4 + $0x10] sm:$0xff] }
  0xea   : > { %765 = vst.msk [vmem:[#allocation4 + $0x20] sm:$0xff] %vm760_vm4, %v721_v19  ;;  %v723_v22 = vpop.permute.xlu1 %722  ;;  %4077 = vmatprep.mubr.msk.bf16.mxu0 %vm1588_vm11, %v1554_v21  ;;  %v1325_v19 = vld [vmem:[#allocation2 + $0x1a1] sm:$0xff] }
  0xeb   : > { %766 = vst.msk [vmem:[#allocation4 + $0x28] sm:$0xff] %vm760_vm4, %v723_v22  ;;  %1378 = vrot.lane.b32.xlu0 %v949_v56, %s4292_s16 }
  0xec   : > { %1380 = vrot.lane.b32.xlu1 %v1337_v18, %s4292_s16 }
  0xed   : > { %v850_v30 = vpop.permute.xlu0 %849  ;;  %v1555_v26 = vld [vmem:[#allocation4 + $0x18] sm:$0xff] }
  0xee   : > { %894 = vst.msk [vmem:[#allocation4 + $0x20] sm:$0xff] %vm889_vm5, %v850_v30  ;;  %v852_v63 = vpop.permute.xlu1 %851  ;;  %4078 = vmatmul.mubr.msk.bf16.gmra.mrb[4].mxu0 %vm1588_vm11, %v1555_v26  ;;  %v1454_v30 = vld [vmem:[#allocation2 + $0x1a2] sm:$0xff] }
  0xef   : > { %895 = vst.msk [vmem:[#allocation4 + $0x28] sm:$0xff] %vm889_vm5, %v852_v63  ;;  %1507 = vrot.lane.b32.xlu0 %v1078_v13, %s5880_s23  ;;  %v1470_v63 = vpack.c.bf16 %v1454_v30, %v1453_v25 }
  0xf0   : > { %607 = vrot.lane.b32.xlu1 %v949_v56, %s4286_s18 }
  0xf1   : > { %v979_v28 = vpop.permute.xlu0 %978 }
  0xf2   : > { %1023 = vst.msk [vmem:[#allocation4 + $0x20] sm:$0xff] %vm1018_vm6, %v979_v28  ;;  %v981_v29 = vpop.permute.xlu1 %980  ;;  %v2060_v28 = vld [vmem:[#allocation3 + $0x9] sm:$0xff] }
  0xf3   : > { %1024 = vst.msk [vmem:[#allocation4 + $0x28] sm:$0xff] %vm1018_vm6, %v981_v29  ;;  %1509 = vrot.lane.b32.xlu0 %v1466_v27, %s5880_s23 }
  0xf4   : > { %609 = vrot.lane.b32.xlu1 %v1337_v18, %s4286_s18 }
  0xf5   : > { %v1108_v31 = vpop.permute.xlu0 %1107 }
  0xf6   : > { %1152 = vst.msk [vmem:[#allocation4 + $0x20] sm:$0xff] %vm1147_vm7, %v1108_v31  ;;  %v1110_v32 = vpop.permute.xlu1 %1109 }
  0xf7   : > { %1153 = vst.msk [vmem:[#allocation4 + $0x28] sm:$0xff] %vm1147_vm7, %v1110_v32  ;;  %736 = vrot.lane.b32.xlu0 %v1078_v13, %s5888_s19 }
  0xf8   : > { %738 = vrot.lane.b32.xlu1 %v1466_v27, %s5888_s19 }
  0xf9   : > { %v1238_v33 = vpop.permute.xlu0 %1237 }
  0xfa   : > { %1282 = vst.msk [vmem:[#allocation4 + $0x20] sm:$0xff] %vm1277_vm8, %v1238_v33  ;;  %v1240_v36 = vpop.permute.xlu1 %1239 }
  0xfb   : > { %1283 = vst.msk [vmem:[#allocation4 + $0x28] sm:$0xff] %vm1277_vm8, %v1240_v36  ;;  %865 = vrot.lane.b32.xlu0 %v4650_v41, %s4288_s20 }
  0xfc   : > { %867 = vrot.lane.b32.xlu1 %v4668_v52, %s4288_s20 }
  0xfd   : > { %v1367_v38 = vpop.permute.xlu0 %1366 }
  0xfe   : > { %1411 = vst.msk [vmem:[#allocation4 + $0x20] sm:$0xff] %vm1406_vm9, %v1367_v38  ;;  %v1369_v42 = vpop.permute.xlu1 %1368  ;;  %v2220_v38 = vpack.c.bf16 %v2189_v35, %v2188_v34  ;;  %v1996_v34 = vld [vmem:[#allocation3 + $0x8] sm:$0xff] }
  0xff   : > { %1412 = vst.msk [vmem:[#allocation4 + $0x28] sm:$0xff] %vm1406_vm9, %v1369_v42  ;;  %994 = vrot.lane.b32.xlu0 %v1337_v18, %s5884_s21  ;;  %v1324_v18 = vld [vmem:[#allocation2 + $0x199] sm:$0xff] }
 0x100   : > { %996 = vrot.lane.b32.xlu1 %v951_v37, %s5884_s21  ;;  %v1341_v21 = vpack.c.bf16 %v1325_v19, %v1324_v18 }
 0x101   : > { %v1496_v5 = vpop.permute.xlu0 %1495 }
 0x102   : > { %1540 = vst.msk [vmem:[#allocation4 + $0x20] sm:$0xff] %vm1535_vm10, %v1496_v5  ;;  %v596_v41 = vpop.permute.xlu1 %595 }
 0x103   : > { %638 = vst.msk [vmem:[#allocation4 + $0x30] sm:$0xff] %vm631_vm3, %v596_v41  ;;  %1123 = vrot.lane.b32.xlu0 %v1466_v27, %s4290_s22  ;;  %v2059_v27 = vld [vmem:[#allocation3 + $0x1] sm:$0xff] }
 0x104   : > { %1125 = vrot.lane.b32.xlu1 %v1080_v43, %s4290_s22  ;;  %v2091_v33 = vpack.c.bf16 %v2060_v28, %v2059_v27 }
 0x105   : > { %v1498_v44 = vpop.permute.xlu0 %1497 }
 0x106   : > { %1541 = vst.msk [vmem:[#allocation4 + $0x28] sm:$0xff] %vm1535_vm10, %v1498_v44  ;;  %v598_v47 = vpop.permute.xlu1 %597 }
 0x107   : > { %639 = vst.msk [vmem:[#allocation4 + $0x38] sm:$0xff] %vm631_vm3, %v598_v47  ;;  %1253 = vrot.lane.b32.xlu0 %v4668_v52, %s5886_s8 }
 0x108   : > { %1255 = vrot.lane.b32.xlu1 %v4686_v3, %s5886_s8 }
 0x109   : > { %v725_v49 = vpop.permute.xlu0 %724  ;;  %v1556_v50 = vld [vmem:[#allocation4 + $0x20] sm:$0xff] }
 0x10a   : > { %767 = vst.msk [vmem:[#allocation4 + $0x30] sm:$0xff] %vm760_vm4, %v725_v49  ;;  %v727_v51 = vpop.permute.xlu1 %726  ;;  %4081 = vmatprep.mubr.msk.bf16.mxu0 %vm1588_vm11, %v1556_v50 }
 0x10b   : > { %768 = vst.msk [vmem:[#allocation4 + $0x38] sm:$0xff] %vm760_vm4, %v727_v51  ;;  %1382 = vrot.lane.b32.xlu0 %v951_v37, %s4292_s16 }
 0x10c   : > { %1384 = vrot.lane.b32.xlu1 %v1339_v48, %s4292_s16 }
 0x10d   : > { %v854_v52 = vpop.permute.xlu0 %853  ;;  %v1557_v20 = vld [vmem:[#allocation4 + $0x28] sm:$0xff] }
 0x10e   : > { %896 = vst.msk [vmem:[#allocation4 + $0x30] sm:$0xff] %vm889_vm5, %v854_v52  ;;  %v856_v57 = vpop.permute.xlu1 %855  ;;  %4082 = vmatmul.mubr.msk.bf16.gmra.mrb[8].mxu0 %vm1588_vm11, %v1557_v20 }
 0x10f   : > { %897 = vst.msk [vmem:[#allocation4 + $0x38] sm:$0xff] %vm889_vm5, %v856_v57  ;;  %1511 = vrot.lane.b32.xlu0 %v1080_v43, %s5880_s23 }
 0x110   : > { %611 = vrot.lane.b32.xlu1 %v951_v37, %s4286_s18 }
 0x111   : > { %v983_v59 = vpop.permute.xlu0 %982 }
 0x112   : > { %1025 = vst.msk [vmem:[#allocation4 + $0x30] sm:$0xff] %vm1018_vm6, %v983_v59  ;;  %v985_v53 = vpop.permute.xlu1 %984 }
 0x113   : > { %1026 = vst.msk [vmem:[#allocation4 + $0x38] sm:$0xff] %vm1018_vm6, %v985_v53  ;;  %1513 = vrot.lane.b32.xlu0 %v4839_v58, %s5880_s23 }
 0x114   : > { %613 = vrot.lane.b32.xlu1 %v1339_v48, %s4286_s18  ;;  %s5876_s18 = smov 56  }
 0x115   : > { %v1112_v61 = vpop.permute.xlu0 %1111 }
 0x116   : > { %1154 = vst.msk [vmem:[#allocation4 + $0x30] sm:$0xff] %vm1147_vm7, %v1112_v61  ;;  %v1114_v2 = vpop.permute.xlu1 %1113 }
 0x117   : > { %1155 = vst.msk [vmem:[#allocation4 + $0x38] sm:$0xff] %vm1147_vm7, %v1114_v2  ;;  %740 = vrot.lane.b32.xlu0 %v1080_v43, %s5888_s19 }
 0x118   : > { %742 = vrot.lane.b32.xlu1 %v4839_v58, %s5888_s19 }
 0x119   : > { %v1242_v6 = vpop.permute.xlu0 %1241 }
 0x11a   : > { %1284 = vst.msk [vmem:[#allocation4 + $0x30] sm:$0xff] %vm1277_vm8, %v1242_v6  ;;  %v1244_v56 = vpop.permute.xlu1 %1243 }
 0x11b   : > { %1285 = vst.msk [vmem:[#allocation4 + $0x38] sm:$0xff] %vm1277_vm8, %v1244_v56  ;;  %869 = vrot.lane.b32.xlu0 %v4686_v3, %s4288_s20 }
 0x11c   : > { %871 = vrot.lane.b32.xlu1 %v4852_v4, %s4288_s20  ;;  %s5874_s20 = smov 64  }
 0x11d   : > { %v1371_v10 = vpop.permute.xlu0 %1370 }
 0x11e   : > { %1413 = vst.msk [vmem:[#allocation4 + $0x30] sm:$0xff] %vm1406_vm9, %v1371_v10  ;;  %v1373_v13 = vpop.permute.xlu1 %1372 }
 0x11f   : > { %1414 = vst.msk [vmem:[#allocation4 + $0x38] sm:$0xff] %vm1406_vm9, %v1373_v13  ;;  %998 = vrot.lane.b32.xlu0 %v1339_v48, %s5884_s21 }
 0x120   : > { %1000 = vrot.lane.b32.xlu1 %v4860_v9, %s5884_s21 }
 0x121   : > { %v1500_v3 = vpop.permute.xlu0 %1499 }
 0x122   : > { %1542 = vst.msk [vmem:[#allocation4 + $0x30] sm:$0xff] %vm1535_vm10, %v1500_v3  ;;  %v600_v16 = vpop.permute.xlu1 %599 }
 0x123   : > { %640 = vst.msk [vmem:[#allocation4 + $0x40] sm:$0xff] %vm631_vm3, %v600_v16  ;;  %1127 = vrot.lane.b32.xlu0 %v4839_v58, %s4290_s22 }
 0x124   : > { %1129 = vrot.lane.b32.xlu1 %v4867_v14, %s4290_s22  ;;  %s5882_s22 = smov 40  }
 0x125   : > { %v1502_v60 = vpop.permute.xlu0 %1501 }
 0x126   : > { %1543 = vst.msk [vmem:[#allocation4 + $0x38] sm:$0xff] %vm1535_vm10, %v1502_v60  ;;  %v602_v0 = vpop.permute.xlu1 %601 }
 0x127   : > { %641 = vst.msk [vmem:[#allocation4 + $0x48] sm:$0xff] %vm631_vm3, %v602_v0  ;;  %1257 = vrot.lane.b32.xlu0 %v4852_v4, %s5886_s8 }
 0x128   : > { %1259 = vrot.lane.b32.xlu1 %v1212_v17, %s5886_s8 }
 0x129   : > { %v729_v22 = vpop.permute.xlu0 %728  ;;  %v1558_v24 = vld [vmem:[#allocation4 + $0x30] sm:$0xff] }
 0x12a   : > { %769 = vst.msk [vmem:[#allocation4 + $0x40] sm:$0xff] %vm760_vm4, %v729_v22  ;;  %v731_v26 = vpop.permute.xlu1 %730  ;;  %4085 = vmatprep.mubr.msk.bf16.mxu0 %vm1588_vm11, %v1558_v24 }
 0x12b   : > { %770 = vst.msk [vmem:[#allocation4 + $0x48] sm:$0xff] %vm760_vm4, %v731_v26  ;;  %1386 = vrot.lane.b32.xlu0 %v4860_v9, %s4292_s16 }
 0x12c   : > { %1388 = vrot.lane.b32.xlu1 %v1341_v21, %s4292_s16  ;;  %s5878_s16 = smov 48  }
 0x12d   : > { %v858_v29 = vpop.permute.xlu0 %857  ;;  %v1559_v31 = vld [vmem:[#allocation4 + $0x38] sm:$0xff] }
 0x12e   : > { %898 = vst.msk [vmem:[#allocation4 + $0x40] sm:$0xff] %vm889_vm5, %v858_v29  ;;  %v860_v32 = vpop.permute.xlu1 %859  ;;  %4086 = vmatmul.mubr.msk.bf16.gmra.mrb[12].mxu0 %vm1588_vm11, %v1559_v31 }
 0x12f   : > { %899 = vst.msk [vmem:[#allocation4 + $0x48] sm:$0xff] %vm889_vm5, %v860_v32  ;;  %1515 = vrot.lane.b32.xlu0 %v4867_v14, %s5880_s23 }
 0x130   : > { %1517 = vrot.lane.b32.xlu1 %v1470_v63, %s5880_s23 }
 0x131   : > { %v987_v36 = vpop.permute.xlu0 %986 }
 0x132   : > { %1027 = vst.msk [vmem:[#allocation4 + $0x40] sm:$0xff] %vm1018_vm6, %v987_v36  ;;  %v989_v37 = vpop.permute.xlu1 %988 }
 0x133   : > { %1028 = vst.msk [vmem:[#allocation4 + $0x48] sm:$0xff] %vm1018_vm6, %v989_v37  ;;  %2123 = vrot.lane.b32.xlu0 %v2091_v33, %s5888_s19  ;;  %v1995_v33 = vld [vmem:[#allocation3] sm:$0xff] }
 0x134   : > { %v2027_v35 = vpack.c.bf16 %v1996_v34, %v1995_v33 }
 0x135   : > { %v1116_v39 = vpop.permute.xlu0 %1115 }
 0x136   : > { %1156 = vst.msk [vmem:[#allocation4 + $0x40] sm:$0xff] %vm1147_vm7, %v1116_v39  ;;  %v1118_v40 = vpop.permute.xlu1 %1117  ;;  %v1802_v39 = vld [vmem:[%s5867_s1] sm:$0xff] }
 0x137   : > { %1157 = vst.msk [vmem:[#allocation4 + $0x48] sm:$0xff] %vm1147_vm7, %v1118_v40  ;;  %2252 = vrot.lane.b32.xlu0 %v2220_v38, %s5884_s21  ;;  %v1804_v38 = vld [vmem:[%s5867_s1 + $0x10] sm:$0xff] }
 0x138   : > { %2043 = vst.msk [vmem:[#allocation5] sm:$0xff] %vm334_vm12, %v2027_v35 }
 0x139   : > { %v1246_v42 = vpop.permute.xlu0 %1245 }
 0x13a   : > { %1286 = vst.msk [vmem:[#allocation4 + $0x40] sm:$0xff] %vm1277_vm8, %v1246_v42  ;;  %v1248_v43 = vpop.permute.xlu1 %1247 }
 0x13b   : > { %1287 = vst.msk [vmem:[#allocation4 + $0x48] sm:$0xff] %vm1277_vm8, %v1248_v43  ;;  %v1805_v43 = vld [vmem:[%s5867_s1 + $0x18] sm:$0xff] }
 0x13d   : > { %v1375_v5 = vpop.permute.xlu0 %1374 }
 0x13e   : > { %1415 = vst.msk [vmem:[#allocation4 + $0x40] sm:$0xff] %vm1406_vm9, %v1375_v5  ;;  %v1377_v41 = vpop.permute.xlu1 %1376 }
 0x13f   : > { %1416 = vst.msk [vmem:[#allocation4 + $0x48] sm:$0xff] %vm1406_vm9, %v1377_v41 }
 0x141   : > { %v1504_v44 = vpop.permute.xlu0 %1503 }
 0x142   : > { %1544 = vst.msk [vmem:[#allocation4 + $0x40] sm:$0xff] %vm1535_vm10, %v1504_v44  ;;  %v604_v45 = vpop.permute.xlu1 %603 }
 0x143   : > { %642 = vst.msk [vmem:[#allocation4 + $0x50] sm:$0xff] %vm631_vm3, %v604_v45  ;;  %v1803_v45 = vld [vmem:[%s5867_s1 + $0x8] sm:$0xff] }
 0x145   : > { %v1506_v46 = vpop.permute.xlu0 %1505 }
 0x146   : > { %1545 = vst.msk [vmem:[#allocation4 + $0x48] sm:$0xff] %vm1535_vm10, %v1506_v46  ;;  %v606_v47 = vpop.permute.xlu1 %605 }
 0x147   : > { %643 = vst.msk [vmem:[#allocation4 + $0x58] sm:$0xff] %vm631_vm3, %v606_v47 }
 0x149   : > { %v733_v48 = vpop.permute.xlu0 %732  ;;  %v1560_v49 = vld [vmem:[#allocation4 + $0x40] sm:$0xff] }
 0x14a   : > { %771 = vst.msk [vmem:[#allocation4 + $0x50] sm:$0xff] %vm760_vm4, %v733_v48  ;;  %v735_v50 = vpop.permute.xlu1 %734  ;;  %4089 = vmatprep.mubr.msk.bf16.mxu0 %vm1588_vm11, %v1560_v49 }
 0x14b   : > { %772 = vst.msk [vmem:[#allocation4 + $0x58] sm:$0xff] %vm760_vm4, %v735_v50 }
 0x14d   : > { %v862_v51 = vpop.permute.xlu0 %861  ;;  %v1561_v54 = vld [vmem:[#allocation4 + $0x48] sm:$0xff] }
 0x14e   : > { %900 = vst.msk [vmem:[#allocation4 + $0x50] sm:$0xff] %vm889_vm5, %v862_v51  ;;  %v864_v55 = vpop.permute.xlu1 %863  ;;  %4090 = vmatmul.mubr.msk.bf16.gmra.mrb[16].mxu0 %vm1588_vm11, %v1561_v54 }
 0x14f   : > { %901 = vst.msk [vmem:[#allocation4 + $0x58] sm:$0xff] %vm889_vm5, %v864_v55 }
 0x151   : > { %v991_v52 = vpop.permute.xlu0 %990 }
 0x152   : > { %1029 = vst.msk [vmem:[#allocation4 + $0x50] sm:$0xff] %vm1018_vm6, %v991_v52  ;;  %v993_v20 = vpop.permute.xlu1 %992 }
 0x153   : > { %1030 = vst.msk [vmem:[#allocation4 + $0x58] sm:$0xff] %vm1018_vm6, %v993_v20 }
 0x155   : > { %v1120_v57 = vpop.permute.xlu0 %1119 }
 0x156   : > { %1158 = vst.msk [vmem:[#allocation4 + $0x50] sm:$0xff] %vm1147_vm7, %v1120_v57  ;;  %v1122_v58 = vpop.permute.xlu1 %1121 }
 0x157   : > { %1159 = vst.msk [vmem:[#allocation4 + $0x58] sm:$0xff] %vm1147_vm7, %v1122_v58 }
 0x159   : > { %v1250_v59 = vpop.permute.xlu0 %1249 }
 0x15a   : > { %1288 = vst.msk [vmem:[#allocation4 + $0x50] sm:$0xff] %vm1277_vm8, %v1250_v59  ;;  %v1252_v53 = vpop.permute.xlu1 %1251 }
 0x15b   : > { %1289 = vst.msk [vmem:[#allocation4 + $0x58] sm:$0xff] %vm1277_vm8, %v1252_v53 }
 0x15d   : > { %v1379_v61 = vpop.permute.xlu0 %1378 }
 0x15e   : > { %1417 = vst.msk [vmem:[#allocation4 + $0x50] sm:$0xff] %vm1406_vm9, %v1379_v61  ;;  %v1381_v62 = vpop.permute.xlu1 %1380 }
 0x15f   : > { %1418 = vst.msk [vmem:[#allocation4 + $0x58] sm:$0xff] %vm1406_vm9, %v1381_v62 }
 0x161   : > { %v1508_v1 = vpop.permute.xlu0 %1507 }
 0x162   : > { %1546 = vst.msk [vmem:[#allocation4 + $0x50] sm:$0xff] %vm1535_vm10, %v1508_v1  ;;  %v608_v2 = vpop.permute.xlu1 %607 }
 0x163   : > { %644 = vst.msk [vmem:[#allocation4 + $0x60] sm:$0xff] %vm631_vm3, %v608_v2 }
 0x165   : > { %v1510_v4 = vpop.permute.xlu0 %1509 }
 0x166   : > { %1547 = vst.msk [vmem:[#allocation4 + $0x58] sm:$0xff] %vm1535_vm10, %v1510_v4  ;;  %v610_v6 = vpop.permute.xlu1 %609 }
 0x167   : > { %645 = vst.msk [vmem:[#allocation4 + $0x68] sm:$0xff] %vm631_vm3, %v610_v6 }
 0x169   : > { %v737_v7 = vpop.permute.xlu0 %736  ;;  %v1562_v8 = vld [vmem:[#allocation4 + $0x50] sm:$0xff] }
 0x16a   : > { %773 = vst.msk [vmem:[#allocation4 + $0x60] sm:$0xff] %vm760_vm4, %v737_v7  ;;  %v739_v56 = vpop.permute.xlu1 %738  ;;  %4093 = vmatprep.mubr.msk.bf16.mxu0 %vm1588_vm11, %v1562_v8 }
 0x16b   : > { %774 = vst.msk [vmem:[#allocation4 + $0x68] sm:$0xff] %vm760_vm4, %v739_v56 }
 0x16d   : > { %v866_v9 = vpop.permute.xlu0 %865  ;;  %v1563_v10 = vld [vmem:[#allocation4 + $0x58] sm:$0xff] }
 0x16e   : > { %902 = vst.msk [vmem:[#allocation4 + $0x60] sm:$0xff] %vm889_vm5, %v866_v9  ;;  %v868_v11 = vpop.permute.xlu1 %867  ;;  %4094 = vmatmul.mubr.msk.bf16.gmra.mrb[20].mxu0 %vm1588_vm11, %v1563_v10 }
 0x16f   : > { %903 = vst.msk [vmem:[#allocation4 + $0x68] sm:$0xff] %vm889_vm5, %v868_v11 }
 0x171   : > { %v995_v12 = vpop.permute.xlu0 %994 }
 0x172   : > { %1031 = vst.msk [vmem:[#allocation4 + $0x60] sm:$0xff] %vm1018_vm6, %v995_v12  ;;  %v997_v13 = vpop.permute.xlu1 %996 }
 0x173   : > { %1032 = vst.msk [vmem:[#allocation4 + $0x68] sm:$0xff] %vm1018_vm6, %v997_v13 }
 0x175   : > { %v1124_v14 = vpop.permute.xlu0 %1123 }
 0x176   : > { %1160 = vst.msk [vmem:[#allocation4 + $0x60] sm:$0xff] %vm1147_vm7, %v1124_v14  ;;  %v1126_v3 = vpop.permute.xlu1 %1125 }
 0x177   : > { %1161 = vst.msk [vmem:[#allocation4 + $0x68] sm:$0xff] %vm1147_vm7, %v1126_v3 }
 0x179   : > { %v1254_v23 = vpop.permute.xlu0 %1253 }
 0x17a   : > { %1290 = vst.msk [vmem:[#allocation4 + $0x60] sm:$0xff] %vm1277_vm8, %v1254_v23  ;;  %v1256_v15 = vpop.permute.xlu1 %1255  ;;  %v1808_v23 = vld [vmem:[%s5867_s1 + $0x30] sm:$0xff] }
 0x17b   : > { %1291 = vst.msk [vmem:[#allocation4 + $0x68] sm:$0xff] %vm1277_vm8, %v1256_v15  ;;  %v1806_v15 = vld [vmem:[%s5867_s1 + $0x20] sm:$0xff] }
 0x17d   : > { %v1383_v16 = vpop.permute.xlu0 %1382 }
 0x17e   : > { %1419 = vst.msk [vmem:[#allocation4 + $0x60] sm:$0xff] %vm1406_vm9, %v1383_v16  ;;  %v1385_v17 = vpop.permute.xlu1 %1384 }
 0x17f   : > { %1420 = vst.msk [vmem:[#allocation4 + $0x68] sm:$0xff] %vm1406_vm9, %v1385_v17 }
 0x181   : > { %v1512_v60 = vpop.permute.xlu0 %1511 }
 0x182   : > { %1548 = vst.msk [vmem:[#allocation4 + $0x60] sm:$0xff] %vm1535_vm10, %v1512_v60  ;;  %v612_v18 = vpop.permute.xlu1 %611 }
 0x183   : > { %646 = vst.msk [vmem:[#allocation4 + $0x70] sm:$0xff] %vm631_vm3, %v612_v18  ;;  %v1809_v18 = vld [vmem:[%s5867_s1 + $0x38] sm:$0xff] }
 0x185   : > { %v1514_v19 = vpop.permute.xlu0 %1513 }
 0x186   : > { %1549 = vst.msk [vmem:[#allocation4 + $0x68] sm:$0xff] %vm1535_vm10, %v1514_v19  ;;  %v614_v0 = vpop.permute.xlu1 %613 }
 0x187   : > { %647 = vst.msk [vmem:[#allocation4 + $0x78] sm:$0xff] %vm631_vm3, %v614_v0 }
 0x189   : > { %v741_v21 = vpop.permute.xlu0 %740  ;;  %v1564_v22 = vld [vmem:[#allocation4 + $0x60] sm:$0xff] }
 0x18a   : > { %775 = vst.msk [vmem:[#allocation4 + $0x70] sm:$0xff] %vm760_vm4, %v741_v21  ;;  %v743_v24 = vpop.permute.xlu1 %742  ;;  %4097 = vmatprep.mubr.msk.bf16.mxu0 %vm1588_vm11, %v1564_v22  ;;  %v1807_v21 = vld [vmem:[%s5867_s1 + $0x28] sm:$0xff] }
 0x18b   : > { %776 = vst.msk [vmem:[#allocation4 + $0x78] sm:$0xff] %vm760_vm4, %v743_v24 }
 0x18d   : > { %v870_v25 = vpop.permute.xlu0 %869  ;;  %v1565_v30 = vld [vmem:[#allocation4 + $0x68] sm:$0xff] }
 0x18e   : > { %904 = vst.msk [vmem:[#allocation4 + $0x70] sm:$0xff] %vm889_vm5, %v870_v25  ;;  %v872_v26 = vpop.permute.xlu1 %871  ;;  %4098 = vmatmul.mubr.msk.bf16.gmra.mrb[24].mxu0 %vm1588_vm11, %v1565_v30 }
 0x18f   : > { %905 = vst.msk [vmem:[#allocation4 + $0x78] sm:$0xff] %vm889_vm5, %v872_v26  ;;  %vm2300_vm5 = vcmask 195712  }
 0x191   : > { %v999_v63 = vpop.permute.xlu0 %998 }
 0x192   : > { %1033 = vst.msk [vmem:[#allocation4 + $0x70] sm:$0xff] %vm1018_vm6, %v999_v63  ;;  %v1001_v27 = vpop.permute.xlu1 %1000 }
 0x193   : > { %1034 = vst.msk [vmem:[#allocation4 + $0x78] sm:$0xff] %vm1018_vm6, %v1001_v27 }
 0x195   : > { %v1128_v28 = vpop.permute.xlu0 %1127 }
 0x196   : > { %1162 = vst.msk [vmem:[#allocation4 + $0x70] sm:$0xff] %vm1147_vm7, %v1128_v28  ;;  %v1130_v29 = vpop.permute.xlu1 %1129 }
 0x197   : > { %1163 = vst.msk [vmem:[#allocation4 + $0x78] sm:$0xff] %vm1147_vm7, %v1130_v29 }
 0x199   : > { %v1258_v31 = vpop.permute.xlu0 %1257 }
 0x19a   : > { %1292 = vst.msk [vmem:[#allocation4 + $0x70] sm:$0xff] %vm1277_vm8, %v1258_v31  ;;  %v1260_v32 = vpop.permute.xlu1 %1259 }
 0x19b   : > { %1293 = vst.msk [vmem:[#allocation4 + $0x78] sm:$0xff] %vm1277_vm8, %v1260_v32 }
 0x19d   : > { %v1387_v36 = vpop.permute.xlu0 %1386 }
 0x19e   : > { %1421 = vst.msk [vmem:[#allocation4 + $0x70] sm:$0xff] %vm1406_vm9, %v1387_v36  ;;  %v1389_v37 = vpop.permute.xlu1 %1388 }
 0x19f   : > { %1422 = vst.msk [vmem:[#allocation4 + $0x78] sm:$0xff] %vm1406_vm9, %v1389_v37 }
 0x1a1   : > { %v1516_v40 = vpop.permute.xlu0 %1515  ;;  %v4075_v42 = vpop.f32.mrb[0].mxu0 }
 0x1a2   : > { %1550 = vst.msk [vmem:[#allocation4 + $0x70] sm:$0xff] %vm1535_vm10, %v1516_v40  ;;  %v1836_v5 = vadd.f32 %v4075_v42, %v1804_v38  ;;  %v1518_v41 = vpop.permute.xlu1 %1517  ;;  %v1675_v44 = vpop.f32.mrb[1].mxu0  ;;  %v4216_v38 = vld [vmem:[%s5897_s4] sm:$0xff]  }
 0x1a3   : > { %1551 = vst.msk [vmem:[#allocation4 + $0x78] sm:$0xff] %vm1535_vm10, %v1518_v41  ;;  %v1834_v46 = vadd.f32 %v1802_v39, %v1675_v44  ;;  %v4076_v47 = vpop.f32.mrb[2].mxu0  ;;  %4105 = vmatprep.subr.bf16.mxu1 %v4216_v38  ;;  %v4217_v44 = vld [vmem:[%s5897_s4 + $0x8] sm:$0xff]   ;;  %vm3193_vm10 = vcmask 1043456  }
 0x1a4   : > { %vm1868_vm15 = vcmp.ge.f32.partialorder %v1836_v5, 0.0  ;;  %v1900_v48 = vmul.f32 0.2, %v1836_v5  ;;  %v1837_v49 = vadd.f32 %v4076_v47, %v1805_v43  ;;  %v1678_v50 = vpop.f32.mrb[3].mxu0  ;;  %4106 = vmatpush3.bf16.msra.mxu1 %v4216_v38 }
 0x1a5   : > { %vm1866_vm1 = vcmp.ge.f32.partialorder %v1834_v46, 0.0  ;;  %v1898_v51 = vmul.f32 0.2, %v1834_v46  ;;  %v1835_v54 = vadd.f32 %v1803_v45, %v1678_v50  ;;  %v2124_v55 = vpop.permute.xlu0 %2123  ;;  %4107 = vmatprep.subr.bf16.mxu1 %v4217_v44  ;;  %v4218_v50 = vld [vmem:[%s5897_s4 + $0x10] sm:$0xff]  }
 0x1a6   : > { %v1932_v52 = vsel %vm1868_vm15, %v1836_v5, %v1900_v48  ;;  %vm1869_vm3 = vcmp.ge.f32.partialorder %v1837_v49, 0.0  ;;  %v1901_v20 = vmul.f32 0.2, %v1837_v49  ;;  %2172 = vst.msk [vmem:[#allocation5] sm:$0xff] %vm2171_vm14, %v2124_v55 }
 0x1a7   : > { %1965 = vst.msk [vmem:[#allocation3 + $0x31] sm:$0xff] %vm334_vm12, %v1932_v52  ;;  %v1930_v57 = vsel %vm1866_vm1, %v1834_v46, %v1898_v51  ;;  %vm1867_vm4 = vcmp.ge.f32.partialorder %v1835_v54, 0.0  ;;  %v1899_v58 = vmul.f32 0.2, %v1835_v54 }
 0x1a8   : > { %1963 = vst.msk [vmem:[#allocation3 + $0x19] sm:$0xff] %vm334_vm12, %v1930_v57  ;;  %v1933_v59 = vsel %vm1869_vm3, %v1837_v49, %v1901_v20  ;;  %4108 = vmatpush3.bf16.msra.mxu1 %v4217_v44  ;;  %v4220_v20 = vld [vmem:[%s5897_s4 + $0x20] ss:$0 sps:$4 sm:$0xff]   ;;  %v1812_v57 = vld [vmem:[%s5867_s1 + $0x50] sm:$0xff] }
 0x1a9   : > { %1966 = vst.msk [vmem:[#allocation3 + $0x39] sm:$0xff] %vm334_vm12, %v1933_v59  ;;  %v1931_v53 = vsel %vm1867_vm4, %v1835_v54, %v1899_v58  ;;  %v1566_v61 = vld [vmem:[#allocation4 + $0x70] sm:$0xff]  ;;  %v2253_v62 = vpop.permute.xlu0 %2252  ;;  %4109 = vmatprep.subr.bf16.mxu1 %v4218_v50  ;;  %v4219_v54 = vld [vmem:[%s5897_s4 + $0x18] sm:$0xff]   ;;  %v1810_v58 = vld [vmem:[%s5867_s1 + $0x40] sm:$0xff]  ;;  %v3195_v59 = vsel %vm3193_vm10, %v4220_v20, 0  ;;  %s3936_s4 = sshll.u32 %s269_s3, 6 }
 0x1aa   : > { %1964 = vst.msk [vmem:[#allocation3 + $0x21] sm:$0xff] %vm334_vm12, %v1931_v53  ;;  %4101 = vmatprep.mubr.msk.bf16.mxu0 %vm1588_vm11, %v1566_v61  ;;  %v1567_v1 = vld [vmem:[#allocation4 + $0x78] sm:$0xff]  ;;  %v3984_v44 = vld [vmem:[%s4501_s17 + $0x60] ss:$2 sm:$0xff]  ;;  %s5665_s29 = scalar_lea.vmem [#allocation7], %s3936_s4 }
 0x1ab   : > { %2301 = vst.msk [vmem:[#allocation5] sm:$0xff] %vm2300_vm5, %v2253_v62  ;;  %4102 = vmatmul.mubr.msk.bf16.gmra.mrb[28].mxu0 %vm1588_vm11, %v1567_v1  ;;  %v1813_v62 = vld [vmem:[%s5867_s1 + $0x58] sm:$0xff]  ;;  %s3870_s14 = sshll.u32 %s5665_s29, 4  ;;  %s5818_s14 = int_to_ptr.vmem [resolvable:$true] %s3870_s14 }
 0x1ac   : > { %4110 = vmatpush3.bf16.msra.mxu1 %v4218_v50  ;;  %v4000_v50 = vld [vmem:[%s4501_s17 + $0x61] ss:$2 sm:$0xff] }
 0x1ad   : > { %4111 = vmatprep.subr.bf16.mxu1 %v4219_v54 }
 0x1ae   : > { %v2705_v2 = vld [vmem:[#allocation3 + $0x30] sm:$0xff] }
 0x1af   : > { %v2317_v7 = vld [vmem:[#allocation3 + $0x18] sm:$0xff] }
 0x1b0   : > { %v2706_v4 = vld [vmem:[#allocation3 + $0x38] sm:$0xff]  ;;  %4112 = vmatpush3.bf16.msra.mxu1 %v4219_v54 }
 0x1b1   : > { %v2737_v6 = vpack.c.bf16 %v2706_v4, %v2705_v2  ;;  %v2318_v8 = vld [vmem:[#allocation3 + $0x20] sm:$0xff]  ;;  %v2834_v10 = vld [vmem:[#allocation3 + $0x31] sm:$0xff]  ;;  %4158 = vmatprep.subr.msk.bf16.mxu1 %vm3193_vm10, %v4220_v20 }
 0x1b2   : > { %v2835_v56 = vld [vmem:[#allocation3 + $0x39] sm:$0xff]  ;;  %v2349_v9 = vpack.c.bf16 %v2318_v8, %v2317_v7  ;;  %v2062_v3 = vld [vmem:[#allocation3 + $0x21] sm:$0xff] }
 0x1b3   : > { %2769 = vrot.lane.b32.xlu0 %v2737_v6, %s5878_s16  ;;  %2383 = vrot.lane.b32.xlu1 %v2737_v6, %s5886_s8  ;;  %2045 = vst.msk [vmem:[#allocation5 + $0x10] sm:$0xff] %vm334_vm12, %v2737_v6  ;;  %v2866_v11 = vpack.c.bf16 %v2835_v56, %v2834_v10  ;;  %v2963_v12 = vld [vmem:[#allocation3 + $0x32] sm:$0xff]  ;;  %v2964_v13 = vld [vmem:[#allocation3 + $0x3a] sm:$0xff]  ;;  %v2191_v24 = vld [vmem:[#allocation3 + $0x22] sm:$0xff] }
 0x1b4   : > { %2044 = vst.msk [vmem:[#allocation5 + $0x8] sm:$0xff] %vm334_vm12, %v2349_v9  ;;  %v2995_v14 = vpack.c.bf16 %v2964_v13, %v2963_v12  ;;  %v2061_v16 = vld [vmem:[#allocation3 + $0x19] sm:$0xff]  ;;  %4114 = vmatpush3.bf16.msra.mxu1 %v3195_v59 }
 0x1b5   : > { %v2092_v60 = vpack.c.bf16 %v2062_v3, %v2061_v16  ;;  %v2190_v22 = vld [vmem:[#allocation3 + $0x1a] sm:$0xff] }
 0x1b6   : > { %v2221_v31 = vpack.c.bf16 %v2191_v24, %v2190_v22  ;;  %v1811_v4 = vld [vmem:[%s5867_s1 + $0x48] sm:$0xff] }
 0x1b7   : > { %2898 = vrot.lane.b32.xlu0 %v2866_v11, %s5876_s18  ;;  %2512 = vrot.lane.b32.xlu1 %v2866_v11, %s5880_s23 }
 0x1bb   : > { %3027 = vrot.lane.b32.xlu0 %v2995_v14, %s5874_s20  ;;  %2641 = vrot.lane.b32.xlu1 %v2995_v14, %s5882_s22  ;;  %s5900_s20 = smov 64  }
 0x1bf   : > { %2256 = vrot.lane.b32.xlu0 %v2995_v14, %s5884_s21  ;;  %2127 = vrot.lane.b32.xlu1 %v2866_v11, %s5888_s19 }
 0x1c1   : > { %v4079_v17 = vpop.f32.mrb[4].mxu0 }
 0x1c2   : > { %v1840_v19 = vadd.f32 %v4079_v17, %v1808_v23  ;;  %v1691_v0 = vpop.f32.mrb[5].mxu0 }
 0x1c3   : > { %v1838_v25 = vadd.f32 %v1806_v15, %v1691_v0  ;;  %2381 = vrot.lane.b32.xlu0 %v2349_v9, %s5886_s8  ;;  %2125 = vrot.lane.b32.xlu1 %v2092_v60, %s5888_s19  ;;  %v4080_v30 = vpop.f32.mrb[6].mxu0 }
 0x1c4   : > { %vm1872_vm6 = vcmp.ge.f32.partialorder %v1840_v19, 0.0  ;;  %v1904_v26 = vmul.f32 0.2, %v1840_v19  ;;  %v1841_v63 = vadd.f32 %v4080_v30, %v1809_v18  ;;  %v1694_v27 = vpop.f32.mrb[7].mxu0  ;;  %v3980_v30 = vld [vmem:[%s4501_s17 + $0x20] ss:$2 sm:$0xff] }
 0x1c5   : > { %vm1870_vm7 = vcmp.ge.f32.partialorder %v1838_v25, 0.0  ;;  %v1902_v28 = vmul.f32 0.2, %v1838_v25  ;;  %v1839_v29 = vadd.f32 %v1807_v21, %v1694_v27  ;;  %v3645_v21 = vld [vmem:[%s4501_s17] ss:$2 sm:$0xff] }
 0x1c6   : > { %v1936_v32 = vsel %vm1872_vm6, %v1840_v19, %v1904_v26  ;;  %vm1873_vm8 = vcmp.ge.f32.partialorder %v1841_v63, 0.0  ;;  %v1905_v33 = vmul.f32 0.2, %v1841_v63  ;;  %v3744_v26 = vld [vmem:[%s5871_s5] sm:$0x3] }
 0x1c7   : > { %1969 = vst.msk [vmem:[#allocation3 + $0x61] sm:$0xff] %vm334_vm12, %v1936_v32  ;;  %v1934_v34 = vsel %vm1870_vm7, %v1838_v25, %v1902_v28  ;;  %vm1871_vm9 = vcmp.ge.f32.partialorder %v1839_v29, 0.0  ;;  %v1903_v35 = vmul.f32 0.2, %v1839_v29  ;;  %2510 = vrot.lane.b32.xlu0 %v2092_v60, %s5880_s23  ;;  %2254 = vrot.lane.b32.xlu1 %v2221_v31, %s5884_s21  ;;  %v3979_v25 = vld [vmem:[%s4501_s17 + $0x10] ss:$2 sm:$0xff] }
 0x1c8   : > { %1967 = vst.msk [vmem:[#allocation3 + $0x49] sm:$0xff] %vm334_vm12, %v1934_v34  ;;  %v1937_v36 = vsel %vm1873_vm8, %v1841_v63, %v1905_v33  ;;  %v3981_v63 = vld [vmem:[%s4501_s17 + $0x30] ss:$2 sm:$0xff]  ;;  %4159 = vmatprep.subr.msk.bf16.mxu0 %vm1637_vm2, %v3744_v26  ;;  %v3994_v32 = vld [vmem:[%s4501_s17 + $0x1] ss:$2 sm:$0xff] }
 0x1c9   : > { %1970 = vst.msk [vmem:[#allocation3 + $0x69] sm:$0xff] %vm334_vm12, %v1937_v36  ;;  %v1935_v37 = vsel %vm1871_vm9, %v1839_v29, %v1903_v35  ;;  %v3995_v33 = vld [vmem:[%s4501_s17 + $0x11] ss:$2 sm:$0xff]  ;;  %v3996_v36 = vld [vmem:[%s4501_s17 + $0x21] ss:$2 sm:$0xff]  ;;  %v3708_v38 = vadd.f32 %v3994_v32, %v3645_v21 }
 0x1ca   : > { %1968 = vst.msk [vmem:[#allocation3 + $0x51] sm:$0xff] %vm334_vm12, %v1935_v37  ;;  %v3997_v37 = vld [vmem:[%s4501_s17 + $0x31] ss:$2 sm:$0xff] }
 0x1cb   : > { %2639 = vrot.lane.b32.xlu0 %v2221_v31, %s5882_s22  ;;  %v3765_v31 = vsel %vm1637_vm2, %v3744_v26, 0 }
 0x1cc   : > { %4148 = vmatpush3.bf16.msra.mxu0 %v3765_v31 }
 0x1ce   : > { %v2709_v39 = vld [vmem:[#allocation3 + $0x60] sm:$0xff] }
 0x1cf   : > { %v2707_v43 = vld [vmem:[#allocation3 + $0x48] sm:$0xff] }
 0x1d0   : > { %v2710_v40 = vld [vmem:[#allocation3 + $0x68] sm:$0xff] }
 0x1d1   : > { %v2739_v42 = vpack.c.bf16 %v2710_v40, %v2709_v39  ;;  %v2839_v5 = vld [vmem:[#allocation3 + $0x69] sm:$0xff]  ;;  %v2838_v46 = vld [vmem:[#allocation3 + $0x61] sm:$0xff]  ;;  %v2966_v52 = vld [vmem:[#allocation3 + $0x52] sm:$0xff]  ;;  %v3709_v39 = vadd.f32 %v3995_v33, %v3979_v25 }
 0x1d2   : > { %v2708_v41 = vld [vmem:[#allocation3 + $0x50] sm:$0xff]  ;;  %v2868_v47 = vpack.c.bf16 %v2839_v5, %v2838_v46  ;;  %v2967_v48 = vld [vmem:[#allocation3 + $0x62] sm:$0xff]  ;;  %v3711_v5 = vadd.f32 %v3997_v37, %v3981_v63 }
 0x1d3   : > { %2773 = vrot.lane.b32.xlu0 %v2739_v42, %s5898_s9  ;;  %2387 = vrot.lane.b32.xlu1 %v2739_v42, %s5886_s8  ;;  %v2738_v45 = vpack.c.bf16 %v2708_v41, %v2707_v43  ;;  %2047 = vst.msk [vmem:[#allocation5 + $0x20] sm:$0xff] %vm334_vm12, %v2739_v42  ;;  %v2968_v49 = vld [vmem:[#allocation3 + $0x6a] sm:$0xff]  ;;  %v3710_v43 = vadd.f32 %v3996_v36, %v3980_v30 }
 0x1d4   : > { %v2997_v51 = vpack.c.bf16 %v2968_v49, %v2967_v48  ;;  %v2965_v55 = vld [vmem:[#allocation3 + $0x4a] sm:$0xff]  ;;  %v3724_v46 = vadd.f32 %v3709_v39, %v3708_v38 }
 0x1d5   : > { %2046 = vst.msk [vmem:[#allocation5 + $0x18] sm:$0xff] %vm334_vm12, %v2738_v45  ;;  %v2996_v61 = vpack.c.bf16 %v2966_v52, %v2965_v55  ;;  %v2837_v6 = vld [vmem:[#allocation3 + $0x51] sm:$0xff]  ;;  %v2836_v11 = vld [vmem:[#allocation3 + $0x49] sm:$0xff]  ;;  %v3725_v49 = vadd.f32 %v3711_v5, %v3710_v43 }
 0x1d6   : > { %v2867_v14 = vpack.c.bf16 %v2837_v6, %v2836_v11  ;;  %v3982_v40 = vld [vmem:[%s4501_s17 + $0x40] ss:$2 sm:$0xff]  ;;  %v3983_v41 = vld [vmem:[%s4501_s17 + $0x50] ss:$2 sm:$0xff]  ;;  %v3999_v48 = vld [vmem:[%s4501_s17 + $0x51] ss:$2 sm:$0xff] }
 0x1d7   : > { %2902 = vrot.lane.b32.xlu0 %v2868_v47, %s5899_s15  ;;  %2516 = vrot.lane.b32.xlu1 %v2868_v47, %s5880_s23  ;;  %s5902_s23 = smov 40   ;;  %v3713_v55 = vadd.f32 %v3999_v48, %v3983_v41  ;;  %v3732_v20 = vmul.f32 0.25, %v3724_v46  ;;  %v3733_v59 = vmul.f32 0.25, %v3725_v49  ;;  %v1820_v48 = vld [vmem:[%s5867_s1 + $0x90] sm:$0xff]  ;;  %v1818_v49 = vld [vmem:[%s5867_s1 + $0x80] sm:$0xff] }
 0x1db   : > { %3031 = vrot.lane.b32.xlu0 %v2997_v51, %s5900_s20  ;;  %2645 = vrot.lane.b32.xlu1 %v2997_v51, %s5882_s22  ;;  %s5903_s22 = smov 16  }
 0x1df   : > { %2260 = vrot.lane.b32.xlu0 %v2997_v51, %s5884_s21  ;;  %2131 = vrot.lane.b32.xlu1 %v2868_v47, %s5888_s19  ;;  %s5901_s21 = smov 32   ;;  %v3998_v47 = vld [vmem:[%s4501_s17 + $0x41] ss:$2 sm:$0xff]  ;;  %v4001_v51 = vld [vmem:[%s4501_s17 + $0x71] ss:$2 sm:$0xff] }
 0x1e0   : > { %v3712_v54 = vadd.f32 %v3998_v47, %v3982_v40 }
 0x1e1   : > { %v4083_v53 = vpop.f32.mrb[8].mxu0 }
 0x1e2   : > { %v1844_v1 = vadd.f32 %v4083_v53, %v1812_v57  ;;  %v1707_v2 = vpop.f32.mrb[9].mxu0  ;;  %v3714_v57 = vadd.f32 %v4000_v50, %v3984_v44  ;;  %v3726_v53 = vadd.f32 %v3713_v55, %v3712_v54 }
 0x1e3   : > { %v1842_v7 = vadd.f32 %v1810_v58, %v1707_v2  ;;  %3029 = vrot.lane.b32.xlu0 %v2996_v61, %s5900_s20  ;;  %2771 = vrot.lane.b32.xlu1 %v2738_v45, %s5898_s9  ;;  %v4084_v8 = vpop.f32.mrb[10].mxu0 }
 0x1e4   : > { %vm1876_vm11 = vcmp.ge.f32.partialorder %v1844_v1, 0.0  ;;  %v1908_v56 = vmul.f32 0.2, %v1844_v1  ;;  %v1845_v9 = vadd.f32 %v4084_v8, %v1813_v62  ;;  %v1710_v10 = vpop.f32.mrb[11].mxu0  ;;  %v3740_v62 = vpack.c.bf16 %v3733_v59, %v3732_v20  ;;  %v1816_v8 = vld [vmem:[%s5867_s1 + $0x70] sm:$0xff] }
 0x1e5   : > { %vm1874_vm13 = vcmp.ge.f32.partialorder %v1842_v7, 0.0  ;;  %v1906_v12 = vmul.f32 0.2, %v1842_v7  ;;  %v1843_v13 = vadd.f32 %v1811_v4, %v1710_v10 }
 0x1e6   : > { %v1940_v3 = vsel %vm1876_vm11, %v1844_v1, %v1908_v56  ;;  %vm1877_vm15 = vcmp.ge.f32.partialorder %v1845_v9, 0.0  ;;  %v1909_v23 = vmul.f32 0.2, %v1845_v9  ;;  %v3734_v1 = vmul.f32 0.25, %v3726_v53  ;;  %4149 = vmatprep.mubr.msk.bf16.mxu0 %vm278_vm0, %v3740_v62 }
 0x1e7   : > { %1973 = vst.msk [vmem:[#allocation3 + $0x91] sm:$0xff] %vm334_vm12, %v1940_v3  ;;  %v1938_v15 = vsel %vm1874_vm13, %v1842_v7, %v1906_v12  ;;  %vm1875_vm1 = vcmp.ge.f32.partialorder %v1843_v13, 0.0  ;;  %v1907_v16 = vmul.f32 0.2, %v1843_v13  ;;  %2900 = vrot.lane.b32.xlu1 %v2867_v14, %s5899_s15  ;;  %2385 = vrot.lane.b32.xlu0 %v2738_v45, %s5886_s8  ;;  %v3985_v45 = vld [vmem:[%s4501_s17 + $0x70] ss:$2 sm:$0xff] }
 0x1e8   : > { %1971 = vst.msk [vmem:[#allocation3 + $0x79] sm:$0xff] %vm334_vm12, %v1938_v15  ;;  %v1941_v17 = vsel %vm1877_vm15, %v1845_v9, %v1909_v23  ;;  %v3715_v58 = vadd.f32 %v4001_v51, %v3985_v45  ;;  %v1814_v9 = vld [vmem:[%s5867_s1 + $0x60] sm:$0xff]  ;;  %v1815_v15 = vld [vmem:[%s5867_s1 + $0x68] sm:$0xff]  ;;  %vm2429_vm11 = vcmask 261312   ;;  %vm2558_vm13 = vcmask 326912  }
 0x1e9   : > { %1974 = vst.msk [vmem:[#allocation3 + $0x99] sm:$0xff] %vm334_vm12, %v1941_v17  ;;  %v1939_v60 = vsel %vm1875_vm1, %v1843_v13, %v1907_v16  ;;  %vm2687_vm15 = vcmask 392512   ;;  %vm2817_vm1 = vcmask 458112  }
 0x1ea   : > { %1972 = vst.msk [vmem:[#allocation3 + $0x81] sm:$0xff] %vm334_vm12, %v1939_v60 }
 0x1eb   : > { %2514 = vrot.lane.b32.xlu0 %v2867_v14, %s5901_s21  ;;  %2129 = vrot.lane.b32.xlu1 %v2867_v14, %s5888_s19  ;;  %v1817_v14 = vld [vmem:[%s5867_s1 + $0x78] sm:$0xff] }
 0x1ee   : > { %v2713_v18 = vld [vmem:[#allocation3 + $0x90] sm:$0xff] }
 0x1ef   : > { %2643 = vrot.lane.b32.xlu0 %v2996_v61, %s5902_s23  ;;  %2258 = vrot.lane.b32.xlu1 %v2996_v61, %s5903_s22  ;;  %v2842_v22 = vld [vmem:[#allocation3 + $0x91] sm:$0xff]  ;;  %v3727_v61 = vadd.f32 %v3715_v58, %v3714_v57  ;;  %v2840_v21 = vld [vmem:[#allocation3 + $0x79] sm:$0xff] }
 0x1f0   : > { %v2714_v19 = vld [vmem:[#allocation3 + $0x98] sm:$0xff] }
 0x1f1   : > { %v2741_v0 = vpack.c.bf16 %v2714_v19, %v2713_v18  ;;  %v2843_v24 = vld [vmem:[#allocation3 + $0x99] sm:$0xff]  ;;  %v3735_v2 = vmul.f32 0.25, %v3727_v61  ;;  %v2970_v6 = vld [vmem:[#allocation3 + $0x82] sm:$0xff] }
 0x1f2   : > { %v2005_v27 = vld [vmem:[#allocation3 + $0x78] sm:$0xff]  ;;  %v2006_v34 = vld [vmem:[#allocation3 + $0x80] sm:$0xff]  ;;  %v2870_v35 = vpack.c.bf16 %v2843_v24, %v2842_v22 }
 0x1f3   : > { %2777 = vrot.lane.b32.xlu0 %v2741_v0, %s5898_s9  ;;  %2391 = vrot.lane.b32.xlu1 %v2741_v0, %s5886_s8  ;;  %2049 = vst.msk [vmem:[#allocation5 + $0x30] sm:$0xff] %vm334_vm12, %v2741_v0  ;;  %v2971_v28 = vld [vmem:[#allocation3 + $0x92] sm:$0xff]  ;;  %v2972_v29 = vld [vmem:[#allocation3 + $0x9a] sm:$0xff]  ;;  %v2032_v42 = vpack.c.bf16 %v2006_v34, %v2005_v27  ;;  %v3741_v56 = vpack.c.bf16 %v3735_v2, %v3734_v1  ;;  %s5905_s8 = smov 8  }
 0x1f4   : > { %v2999_v52 = vpack.c.bf16 %v2972_v29, %v2971_v28  ;;  %v2969_v4 = vld [vmem:[#allocation3 + $0x7a] sm:$0xff] }
 0x1f5   : > { %2048 = vst.msk [vmem:[#allocation5 + $0x28] sm:$0xff] %vm334_vm12, %v2032_v42  ;;  %v2712_v7 = vld [vmem:[#allocation3 + $0x80] sm:$0xff]  ;;  %v2711_v10 = vld [vmem:[#allocation3 + $0x78] sm:$0xff]  ;;  %v2998_v12 = vpack.c.bf16 %v2970_v6, %v2969_v4  ;;  %4150 = vmatmul.mubr.msk.bf16.vlgmr.msra.gmra.mrb[32].mxu0 %vm278_vm0, %v3741_v56 }
 0x1f6   : > { %v2740_v13 = vpack.c.bf16 %v2712_v7, %v2711_v10  ;;  %v2841_v16 = vld [vmem:[#allocation3 + $0x81] sm:$0xff]  ;;  %v1819_v58 = vld [vmem:[%s5867_s1 + $0x88] sm:$0xff] }
 0x1f7   : > { %2906 = vrot.lane.b32.xlu0 %v2870_v35, %s5899_s15  ;;  %2520 = vrot.lane.b32.xlu1 %v2870_v35, %s5901_s21  ;;  %v2869_v25 = vpack.c.bf16 %v2841_v16, %v2840_v21 }
 0x1fb   : > { %3035 = vrot.lane.b32.xlu0 %v2999_v52, %s5900_s20  ;;  %2649 = vrot.lane.b32.xlu1 %v2999_v52, %s5902_s23 }
 0x1ff   : > { %2264 = vrot.lane.b32.xlu0 %v2999_v52, %s5903_s22  ;;  %2135 = vrot.lane.b32.xlu1 %v2870_v35, %s5888_s19  ;;  %s5904_s19 = smov 24   ;;  %v1821_v52 = vld [vmem:[%s5867_s1 + $0x98] sm:$0xff] }
 0x201   : > { %v4087_v11 = vpop.f32.mrb[12].mxu0 }
 0x202   : > { %v1848_v3 = vadd.f32 %v4087_v11, %v1816_v8  ;;  %v1723_v23 = vpop.f32.mrb[13].mxu0 }
 0x203   : > { %v1846_v17 = vadd.f32 %v1814_v9, %v1723_v23  ;;  %3033 = vrot.lane.b32.xlu0 %v2998_v12, %s5900_s20  ;;  %2775 = vrot.lane.b32.xlu1 %v2740_v13, %s5898_s9  ;;  %v4088_v60 = vpop.f32.mrb[14].mxu0 }
 0x204   : > { %vm1880_vm2 = vcmp.ge.f32.partialorder %v1848_v3, 0.0  ;;  %v1912_v18 = vmul.f32 0.2, %v1848_v3  ;;  %v1849_v19 = vadd.f32 %v4088_v60, %v1817_v14  ;;  %v1726_v0 = vpop.f32.mrb[15].mxu0 }
 0x205   : > { %vm1878_vm3 = vcmp.ge.f32.partialorder %v1846_v17, 0.0  ;;  %v1910_v22 = vmul.f32 0.2, %v1846_v17  ;;  %v1847_v24 = vadd.f32 %v1815_v15, %v1726_v0 }
 0x206   : > { %v1944_v30 = vsel %vm1880_vm2, %v1848_v3, %v1912_v18  ;;  %vm1881_vm4 = vcmp.ge.f32.partialorder %v1849_v19, 0.0  ;;  %v1913_v26 = vmul.f32 0.2, %v1849_v19  ;;  %vm2946_vm2 = vcmask 523712  }
 0x207   : > { %1977 = vst.msk [vmem:[#allocation3 + $0xc1] sm:$0xff] %vm334_vm12, %v1944_v30  ;;  %v1942_v63 = vsel %vm1878_vm3, %v1846_v17, %v1910_v22  ;;  %vm1879_vm6 = vcmp.ge.f32.partialorder %v1847_v24, 0.0  ;;  %v1911_v27 = vmul.f32 0.2, %v1847_v24  ;;  %2904 = vrot.lane.b32.xlu1 %v2869_v25, %s5899_s15  ;;  %2389 = vrot.lane.b32.xlu0 %v2740_v13, %s5904_s19  ;;  %vm3075_vm3 = vcmask 589312  }
 0x208   : > { %1975 = vst.msk [vmem:[#allocation3 + $0xa9] sm:$0xff] %vm334_vm12, %v1942_v63  ;;  %v1945_v28 = vsel %vm1881_vm4, %v1849_v19, %v1913_v26 }
 0x209   : > { %1978 = vst.msk [vmem:[#allocation3 + $0xc9] sm:$0xff] %vm334_vm12, %v1945_v28  ;;  %v1943_v29 = vsel %vm1879_vm6, %v1847_v24, %v1911_v27 }
 0x20a   : > { %1976 = vst.msk [vmem:[#allocation3 + $0xb1] sm:$0xff] %vm334_vm12, %v1943_v29 }
 0x20b   : > { %2518 = vrot.lane.b32.xlu0 %v2869_v25, %s5901_s21  ;;  %2133 = vrot.lane.b32.xlu1 %v2869_v25, %s5905_s8 }
 0x20e   : > { %v2717_v31 = vld [vmem:[#allocation3 + $0xc0] sm:$0xff] }
 0x20f   : > { %2647 = vrot.lane.b32.xlu0 %v2998_v12, %s5902_s23  ;;  %2262 = vrot.lane.b32.xlu1 %v2998_v12, %s5903_s22  ;;  %v2011_v35 = vld [vmem:[#allocation3 + $0xc0] sm:$0xff]  ;;  %v2009_v38 = vld [vmem:[#allocation3 + $0xa8] sm:$0xff] }
 0x210   : > { %v2718_v32 = vld [vmem:[#allocation3 + $0xc8] sm:$0xff] }
 0x211   : > { %v2743_v33 = vpack.c.bf16 %v2718_v32, %v2717_v31  ;;  %v2847_v34 = vld [vmem:[#allocation3 + $0xc9] sm:$0xff]  ;;  %v2846_v40 = vld [vmem:[#allocation3 + $0xc1] sm:$0xff]  ;;  %v2974_v46 = vld [vmem:[#allocation3 + $0xb2] sm:$0xff] }
 0x212   : > { %v2012_v36 = vld [vmem:[#allocation3 + $0xc8] sm:$0xff]  ;;  %v2010_v39 = vld [vmem:[#allocation3 + $0xb0] sm:$0xff]  ;;  %v2872_v43 = vpack.c.bf16 %v2847_v34, %v2846_v40 }
 0x213   : > { %2781 = vrot.lane.b32.xlu0 %v2743_v33, %s5898_s9  ;;  %2395 = vrot.lane.b32.xlu1 %v2743_v33, %s5904_s19  ;;  %v2035_v37 = vpack.c.bf16 %v2012_v36, %v2011_v35  ;;  %v2034_v42 = vpack.c.bf16 %v2010_v39, %v2009_v38  ;;  %v2975_v5 = vld [vmem:[#allocation3 + $0xc2] sm:$0xff]  ;;  %v2976_v41 = vld [vmem:[#allocation3 + $0xca] sm:$0xff] }
 0x214   : > { %v3001_v44 = vpack.c.bf16 %v2976_v41, %v2975_v5  ;;  %v2973_v45 = vld [vmem:[#allocation3 + $0xaa] sm:$0xff] }
 0x215   : > { %2051 = vst.msk [vmem:[#allocation5 + $0x40] sm:$0xff] %vm334_vm12, %v2035_v37  ;;  %2050 = vst.msk [vmem:[#allocation5 + $0x38] sm:$0xff] %vm334_vm12, %v2034_v42  ;;  %v2716_v47 = vld [vmem:[#allocation3 + $0xb0] sm:$0xff]  ;;  %v2715_v50 = vld [vmem:[#allocation3 + $0xa8] sm:$0xff]  ;;  %v3000_v54 = vpack.c.bf16 %v2974_v46, %v2973_v45 }
 0x216   : > { %v2742_v55 = vpack.c.bf16 %v2716_v47, %v2715_v50  ;;  %v2845_v59 = vld [vmem:[#allocation3 + $0xb1] sm:$0xff]  ;;  %v2844_v4 = vld [vmem:[#allocation3 + $0xa9] sm:$0xff]  ;;  %v1824_v45 = vld [vmem:[%s5867_s1 + $0xb0] sm:$0xff] }
 0x217   : > { %2910 = vrot.lane.b32.xlu0 %v2872_v43, %s5899_s15  ;;  %2524 = vrot.lane.b32.xlu1 %v2872_v43, %s5901_s21  ;;  %v2871_v9 = vpack.c.bf16 %v2845_v59, %v2844_v4  ;;  %v1822_v46 = vld [vmem:[%s5867_s1 + $0xa0] sm:$0xff]  ;;  %v1825_v50 = vld [vmem:[%s5867_s1 + $0xb8] sm:$0xff] }
 0x21b   : > { %3039 = vrot.lane.b32.xlu0 %v3001_v44, %s5900_s20  ;;  %2653 = vrot.lane.b32.xlu1 %v3001_v44, %s5902_s23 }
 0x21f   : > { %2268 = vrot.lane.b32.xlu0 %v3001_v44, %s5903_s22  ;;  %2139 = vrot.lane.b32.xlu1 %v2872_v43, %s5905_s8 }
 0x221   : > { %v4091_v51 = vpop.f32.mrb[16].mxu0 }
 0x222   : > { %v1852_v20 = vadd.f32 %v4091_v51, %v1820_v48  ;;  %v1739_v57 = vpop.f32.mrb[17].mxu0 }
 0x223   : > { %v1850_v53 = vadd.f32 %v1818_v49, %v1739_v57  ;;  %3037 = vrot.lane.b32.xlu0 %v3000_v54, %s5900_s20  ;;  %2779 = vrot.lane.b32.xlu1 %v2742_v55, %s5898_s9  ;;  %v4092_v61 = vpop.f32.mrb[18].mxu0 }
 0x224   : > { %vm1884_vm7 = vcmp.ge.f32.partialorder %v1852_v20, 0.0  ;;  %v1916_v62 = vmul.f32 0.2, %v1852_v20  ;;  %v1853_v1 = vadd.f32 %v4092_v61, %v1821_v52  ;;  %v1742_v2 = vpop.f32.mrb[19].mxu0 }
 0x225   : > { %vm1882_vm8 = vcmp.ge.f32.partialorder %v1850_v53, 0.0  ;;  %v1914_v6 = vmul.f32 0.2, %v1850_v53  ;;  %v1851_v7 = vadd.f32 %v1819_v58, %v1742_v2  ;;  %v5254_v8 = vpop.permute.xlu0 %2769  ;;  %v5256_v56 = vpop.permute.xlu1 %2383 }
 0x226   : > { %v1948_v10 = vsel %vm1884_vm7, %v1852_v20, %v1916_v62  ;;  %vm1885_vm9 = vcmp.ge.f32.partialorder %v1853_v1, 0.0  ;;  %v1917_v11 = vmul.f32 0.2, %v1853_v1 }
 0x227   : > { %1981 = vst.msk [vmem:[#allocation3 + $0xf1] sm:$0xff] %vm334_vm12, %v1948_v10  ;;  %v1946_v12 = vsel %vm1882_vm8, %v1850_v53, %v1914_v6  ;;  %vm1883_vm10 = vcmp.ge.f32.partialorder %v1851_v7, 0.0  ;;  %v1915_v13 = vmul.f32 0.2, %v1851_v7  ;;  %2908 = vrot.lane.b32.xlu1 %v2871_v9, %s5899_s15  ;;  %2393 = vrot.lane.b32.xlu0 %v2742_v55, %s5904_s19  ;;  %v1823_v55 = vld [vmem:[%s5867_s1 + $0xa8] sm:$0xff]  ;;  %vm3144_vm8 = vcmask 588800  }
 0x228   : > { %1979 = vst.msk [vmem:[#allocation3 + $0xd9] sm:$0xff] %vm334_vm12, %v1946_v12  ;;  %v1949_v14 = vsel %vm1885_vm9, %v1853_v1, %v1917_v11 }
 0x229   : > { %1982 = vst.msk [vmem:[#allocation3 + $0xf9] sm:$0xff] %vm334_vm12, %v1949_v14  ;;  %v1947_v3 = vsel %vm1883_vm10, %v1851_v7, %v1915_v13  ;;  %v5263_v23 = vpop.permute.xlu0 %2898  ;;  %v2513_v15 = vpop.permute.xlu1 %2512 }
 0x22a   : > { %1980 = vst.msk [vmem:[#allocation3 + $0xe1] sm:$0xff] %vm334_vm12, %v1947_v3 }
 0x22b   : > { %2522 = vrot.lane.b32.xlu0 %v2871_v9, %s5901_s21  ;;  %2137 = vrot.lane.b32.xlu1 %v2871_v9, %s5905_s8 }
 0x22d   : > { %v5268_v16 = vpop.permute.xlu0 %3027  ;;  %v2642_v17 = vpop.permute.xlu1 %2641 }
 0x22e   : > { %v2721_v60 = vld [vmem:[#allocation3 + $0xf0] sm:$0xff] }
 0x22f   : > { %2651 = vrot.lane.b32.xlu0 %v3000_v54, %s5902_s23  ;;  %2266 = vrot.lane.b32.xlu1 %v3000_v54, %s5903_s22  ;;  %v2013_v24 = vld [vmem:[#allocation3 + $0xd8] sm:$0xff]  ;;  %v2015_v26 = vld [vmem:[#allocation3 + $0xf0] sm:$0xff] }
 0x230   : > { %v2722_v18 = vld [vmem:[#allocation3 + $0xf8] sm:$0xff] }
 0x231   : > { %v2257_v19 = vpop.permute.xlu0 %2256  ;;  %v2128_v0 = vpop.permute.xlu1 %2127  ;;  %v2745_v21 = vpack.c.bf16 %v2722_v18, %v2721_v60  ;;  %v2851_v22 = vld [vmem:[#allocation3 + $0xf9] sm:$0xff]  ;;  %v2850_v27 = vld [vmem:[#allocation3 + $0xf1] sm:$0xff]  ;;  %v2978_v36 = vld [vmem:[#allocation3 + $0xe2] sm:$0xff] }
 0x232   : > { %2174 = vst.msk [vmem:[#allocation5 + $0x10] sm:$0xff] %vm2171_vm14, %v2128_v0  ;;  %v2014_v25 = vld [vmem:[#allocation3 + $0xe0] sm:$0xff]  ;;  %v2016_v63 = vld [vmem:[#allocation3 + $0xf8] sm:$0xff]  ;;  %v5276_v32 = vpack.c.bf16 %v2851_v22, %v2850_v27 }
 0x233   : > { %2303 = vst.msk [vmem:[#allocation5 + $0x10] sm:$0xff] %vm2300_vm5, %v2257_v19  ;;  %2785 = vrot.lane.b32.xlu0 %v2745_v21, %s5898_s9  ;;  %2399 = vrot.lane.b32.xlu1 %v2745_v21, %s5904_s19  ;;  %v2036_v30 = vpack.c.bf16 %v2014_v25, %v2013_v24  ;;  %v2037_v28 = vpack.c.bf16 %v2016_v63, %v2015_v26  ;;  %v2593_v33 = vld [vmem:[#allocation3 + $0xf2] sm:$0xff]  ;;  %v2594_v34 = vld [vmem:[#allocation3 + $0xfa] sm:$0xff] }
 0x234   : > { %v2977_v35 = vld [vmem:[#allocation3 + $0xda] sm:$0xff]  ;;  %v5286_v39 = vpack.c.bf16 %v2594_v34, %v2593_v33  ;;  %v1829_v33 = vld [vmem:[%s5867_s1 + $0xd8] sm:$0xff] }
 0x235   : > { %v2382_v29 = vpop.permute.xlu0 %2381  ;;  %v2126_v31 = vpop.permute.xlu1 %2125  ;;  %2052 = vst.msk [vmem:[#allocation5 + $0x48] sm:$0xff] %vm334_vm12, %v2036_v30  ;;  %2053 = vst.msk [vmem:[#allocation5 + $0x50] sm:$0xff] %vm334_vm12, %v2037_v28  ;;  %v5288_v40 = vpack.c.bf16 %v2978_v36, %v2977_v35  ;;  %v2720_v42 = vld [vmem:[#allocation3 + $0xe0] sm:$0xff]  ;;  %v2719_v43 = vld [vmem:[#allocation3 + $0xd8] sm:$0xff] }
 0x236   : > { %2430 = vst.msk [vmem:[#allocation5] sm:$0xff] %vm2429_vm11, %v2382_v29  ;;  %v2744_v41 = vpack.c.bf16 %v2720_v42, %v2719_v43  ;;  %v2849_v44 = vld [vmem:[#allocation3 + $0xe1] sm:$0xff]  ;;  %v2848_v47 = vld [vmem:[#allocation3 + $0xd9] sm:$0xff] }
 0x237   : > { %2173 = vst.msk [vmem:[#allocation5 + $0x8] sm:$0xff] %vm2171_vm14, %v2126_v31  ;;  %2914 = vrot.lane.b32.xlu0 %v5276_v32, %s5899_s15  ;;  %2528 = vrot.lane.b32.xlu1 %v5276_v32, %s5901_s21  ;;  %v2873_v49 = vpack.c.bf16 %v2849_v44, %v2848_v47  ;;  %v1828_v31 = vld [vmem:[%s5867_s1 + $0xd0] sm:$0xff] }
 0x239   : > { %v2511_v37 = vpop.permute.xlu0 %2510  ;;  %v2255_v38 = vpop.permute.xlu1 %2254 }
 0x23a   : > { %2559 = vst.msk [vmem:[#allocation5] sm:$0xff] %vm2558_vm13, %v2511_v37 }
 0x23b   : > { %2302 = vst.msk [vmem:[#allocation5 + $0x8] sm:$0xff] %vm2300_vm5, %v2255_v38  ;;  %2657 = vrot.lane.b32.xlu1 %v5286_v39, %s5902_s23  ;;  %3041 = vrot.lane.b32.xlu0 %v5288_v40, %s5900_s20  ;;  %v3986_v38 = vld [vmem:[%s4501_s17 + $0x80] ss:$2 sm:$0xff] }
 0x23c   : > { %2431 = vst.msk [vmem:[#allocation5 + $0x8] sm:$0xff] %vm2429_vm11, %v5256_v56 }
 0x23d   : > { %2560 = vst.msk [vmem:[#allocation5 + $0x8] sm:$0xff] %vm2558_vm13, %v2513_v15  ;;  %v2640_v5 = vpop.permute.xlu0 %2639 }
 0x23e   : > { %2689 = vst.msk [vmem:[#allocation5 + $0x8] sm:$0xff] %vm2687_vm15, %v2642_v17  ;;  %2688 = vst.msk [vmem:[#allocation5] sm:$0xff] %vm2687_vm15, %v2640_v5  ;;  %v3989_v5 = vld [vmem:[%s4501_s17 + $0xb0] ss:$2 sm:$0xff] }
 0x23f   : > { %2818 = vst.msk [vmem:[#allocation5] sm:$0xff] %vm2817_vm1, %v5254_v8  ;;  %2783 = vrot.lane.b32.xlu1 %v2744_v41, %s5898_s9  ;;  %2397 = vrot.lane.b32.xlu0 %v2744_v41, %s5904_s19  ;;  %v4002_v41 = vld [vmem:[%s4501_s17 + $0x81] ss:$2 sm:$0xff] }
 0x240   : > { %2947 = vst.msk [vmem:[#allocation5] sm:$0xff] %vm2946_vm2, %v5263_v23 }
 0x241   : > { %3076 = vst.msk [vmem:[#allocation5] sm:$0xff] %vm3075_vm3, %v5268_v16  ;;  %v4095_v48 = vpop.f32.mrb[20].mxu0 }
 0x242   : > { %v1856_v51 = vadd.f32 %v4095_v48, %v1824_v45  ;;  %v1755_v54 = vpop.f32.mrb[21].mxu0  ;;  %v4003_v48 = vld [vmem:[%s4501_s17 + $0x91] ss:$2 sm:$0xff] }
 0x243   : > { %v1854_v52 = vadd.f32 %v1822_v46, %v1755_v54  ;;  %2912 = vrot.lane.b32.xlu1 %v2873_v49, %s5899_s15  ;;  %2526 = vrot.lane.b32.xlu0 %v2873_v49, %s5901_s21  ;;  %v4096_v20 = vpop.f32.mrb[22].mxu0  ;;  %v1827_v46 = vld [vmem:[%s5867_s1 + $0xc8] sm:$0xff] }
 0x244   : > { %vm1888_vm4 = vcmp.ge.f32.partialorder %v1856_v51, 0.0  ;;  %v1920_v57 = vmul.f32 0.2, %v1856_v51  ;;  %v1857_v58 = vadd.f32 %v4096_v20, %v1825_v50  ;;  %v1758_v59 = vpop.f32.mrb[23].mxu0  ;;  %v3716_v50 = vadd.f32 %v4002_v41, %v3986_v38 }
 0x245   : > { %vm1886_vm6 = vcmp.ge.f32.partialorder %v1854_v52, 0.0  ;;  %v1918_v53 = vmul.f32 0.2, %v1854_v52  ;;  %v1855_v61 = vadd.f32 %v1823_v55, %v1758_v59  ;;  %v5323_v62 = vpop.permute.xlu0 %2773  ;;  %v5325_v1 = vpop.permute.xlu1 %2387  ;;  %v4005_v55 = vld [vmem:[%s4501_s17 + $0xb1] ss:$2 sm:$0xff] }
 0x246   : > { %v1952_v2 = vsel %vm1888_vm4, %v1856_v51, %v1920_v57  ;;  %vm1889_vm7 = vcmp.ge.f32.partialorder %v1857_v58, 0.0  ;;  %v1921_v4 = vmul.f32 0.2, %v1857_v58  ;;  %v3990_v57 = vld [vmem:[%s4501_s17 + $0xc0] ss:$2 sm:$0xff] }
 0x247   : > { %1985 = vst.msk [vmem:[#allocation3 + $0x121] sm:$0xff] %vm334_vm12, %v1952_v2  ;;  %v1950_v6 = vsel %vm1886_vm6, %v1854_v52, %v1918_v53  ;;  %vm1887_vm9 = vcmp.ge.f32.partialorder %v1855_v61, 0.0  ;;  %v1919_v7 = vmul.f32 0.2, %v1855_v61  ;;  %2655 = vrot.lane.b32.xlu0 %v5288_v40, %s5902_s23  ;;  %2141 = vrot.lane.b32.xlu1 %v2873_v49, %s5905_s8  ;;  %v4004_v49 = vld [vmem:[%s4501_s17 + $0xa1] ss:$2 sm:$0xff] }
 0x248   : > { %1983 = vst.msk [vmem:[#allocation3 + $0x109] sm:$0xff] %vm334_vm12, %v1950_v6  ;;  %v1953_v8 = vsel %vm1889_vm7, %v1857_v58, %v1921_v4  ;;  %v3092_v56 = vld [vmem:[#allocation5] sm:$0xff] }
 0x249   : > { %1986 = vst.msk [vmem:[#allocation3 + $0x129] sm:$0xff] %vm334_vm12, %v1953_v8  ;;  %v1951_v9 = vsel %vm1887_vm9, %v1855_v61, %v1919_v7  ;;  %4115 = vmatprep.mubr.msk.bf16.mxu1 %vm3144_vm8, %v3092_v56  ;;  %v5334_v10 = vpop.permute.xlu0 %2902  ;;  %v5336_v11 = vpop.permute.xlu1 %2516  ;;  %v3992_v56 = vld [vmem:[%s4501_s17 + $0xe0] ss:$2 sm:$0xff] }
 0x24a   : > { %1984 = vst.msk [vmem:[#allocation3 + $0x111] sm:$0xff] %vm334_vm12, %v1951_v9 }
 0x24b   : > { %3043 = vrot.lane.b32.xlu0 %v5286_v39, %s5900_s20  ;;  %2270 = vrot.lane.b32.xlu1 %v5288_v40, %s5903_s22  ;;  %v3988_v40 = vld [vmem:[%s4501_s17 + $0xa0] ss:$2 sm:$0xff] }
 0x24c   : > { %v3718_v20 = vadd.f32 %v4004_v49, %v3988_v40 }
 0x24d   : > { %v5343_v12 = vpop.permute.xlu0 %3031  ;;  %v5345_v13 = vpop.permute.xlu1 %2645 }
 0x24e   : > { %v2339_v3 = vld [vmem:[#allocation3 + $0x120] sm:$0xff] }
 0x24f   : > { %2143 = vrot.lane.b32.xlu1 %v5276_v32, %s5905_s8  ;;  %v2723_v14 = vld [vmem:[#allocation3 + $0x108] sm:$0xff]  ;;  %v1826_v32 = vld [vmem:[%s5867_s1 + $0xc0] sm:$0xff] }
 0x250   : > { %v2340_v23 = vld [vmem:[#allocation3 + $0x128] sm:$0xff] }
 0x251   : > { %v2261_v15 = vpop.permute.xlu0 %2260  ;;  %v2132_v16 = vpop.permute.xlu1 %2131  ;;  %v2981_v17 = vld [vmem:[#allocation3 + $0x10a] sm:$0xff]  ;;  %v2982_v60 = vld [vmem:[#allocation3 + $0x112] sm:$0xff]  ;;  %v5349_v19 = vpack.c.bf16 %v2340_v23, %v2339_v3  ;;  %v2468_v34 = vld [vmem:[#allocation3 + $0x121] sm:$0xff] }
 0x252   : > { %v2724_v18 = vld [vmem:[#allocation3 + $0x110] sm:$0xff]  ;;  %2176 = vst.msk [vmem:[#allocation5 + $0x20] sm:$0xff] %vm2171_vm14, %v2132_v16  ;;  %v3004_v0 = vpack.c.bf16 %v2982_v60, %v2981_v17  ;;  %v2597_v7 = vld [vmem:[#allocation3 + $0x122] sm:$0xff] }
 0x253   : > { %v2746_v21 = vpack.c.bf16 %v2724_v18, %v2723_v14  ;;  %2305 = vst.msk [vmem:[#allocation5 + $0x20] sm:$0xff] %vm2300_vm5, %v2261_v15  ;;  %v2853_v22 = vld [vmem:[#allocation3 + $0x111] sm:$0xff]  ;;  %v2852_v30 = vld [vmem:[#allocation3 + $0x109] sm:$0xff] }
 0x254   : > { %2055 = vst.msk [vmem:[#allocation5 + $0x60] sm:$0xff] %vm334_vm12, %v5349_v19  ;;  %3045 = vrot.lane.b32.xlu0 %v3004_v0, %s5900_s20  ;;  %v2875_v26 = vpack.c.bf16 %v2853_v22, %v2852_v30  ;;  %v2469_v35 = vld [vmem:[#allocation3 + $0x129] sm:$0xff]  ;;  %v4006_v15 = vld [vmem:[%s4501_s17 + $0xc1] ss:$2 sm:$0xff] }
 0x255   : > { %2787 = vrot.lane.b32.xlu1 %v2746_v21, %s5898_s9  ;;  %2054 = vst.msk [vmem:[#allocation5 + $0x58] sm:$0xff] %vm334_vm12, %v2746_v21  ;;  %v3030_v24 = vpop.permute.xlu0 %3029  ;;  %v2772_v25 = vpop.permute.xlu1 %2771  ;;  %v5395_v47 = vpack.c.bf16 %v2469_v35, %v2468_v34  ;;  %v4007_v18 = vld [vmem:[%s4501_s17 + $0xd1] ss:$2 sm:$0xff] }
 0x256   : > { %2819 = vst.msk [vmem:[#allocation5 + $0x8] sm:$0xff] %vm2817_vm1, %v2772_v25  ;;  %v4009_v25 = vld [vmem:[%s4501_s17 + $0xf1] ss:$2 sm:$0xff] }
 0x258   : > { %2272 = vrot.lane.b32.xlu0 %v5286_v39, %s5903_s22  ;;  %v3987_v39 = vld [vmem:[%s4501_s17 + $0x90] ss:$2 sm:$0xff] }
 0x259   : > { %2916 = vrot.lane.b32.xlu1 %v2875_v26, %s5899_s15  ;;  %v2901_v63 = vpop.permute.xlu1 %2900  ;;  %v2386_v27 = vpop.permute.xlu0 %2385  ;;  %v3717_v52 = vadd.f32 %v4003_v48, %v3987_v39 }
 0x25a   : > { %2948 = vst.msk [vmem:[#allocation5 + $0x8] sm:$0xff] %vm2946_vm2, %v2901_v63 }
 0x25b   : > { %2432 = vst.msk [vmem:[#allocation5 + $0x10] sm:$0xff] %vm2429_vm11, %v2386_v27  ;;  %v3728_v8 = vadd.f32 %v3717_v52, %v3716_v50 }
 0x25c   : > { %3077 = vst.msk [vmem:[#allocation5 + $0x8] sm:$0xff] %vm3075_vm3, %v3030_v24  ;;  %2401 = vrot.lane.b32.xlu0 %v2746_v21, %s5904_s19  ;;  %v3720_v21 = vadd.f32 %v4006_v15, %v3990_v57 }
 0x25d   : > { %2145 = vrot.lane.b32.xlu1 %v2875_v26, %s5905_s8  ;;  %v2515_v28 = vpop.permute.xlu0 %2514  ;;  %v2130_v29 = vpop.permute.xlu1 %2129  ;;  %v3736_v23 = vmul.f32 0.25, %v3728_v8 }
 0x25e   : > { %2561 = vst.msk [vmem:[#allocation5 + $0x10] sm:$0xff] %vm2558_vm13, %v2515_v28 }
 0x25f   : > { %2175 = vst.msk [vmem:[#allocation5 + $0x18] sm:$0xff] %vm2171_vm14, %v2130_v29 }
 0x260   : > { %2530 = vrot.lane.b32.xlu0 %v2875_v26, %s5901_s21 }
 0x261   : > { %2274 = vrot.lane.b32.xlu1 %v3004_v0, %s5903_s22  ;;  %v2644_v36 = vpop.permute.xlu0 %2643  ;;  %v2259_v37 = vpop.permute.xlu1 %2258 }
 0x262   : > { %2690 = vst.msk [vmem:[#allocation5 + $0x10] sm:$0xff] %vm2687_vm15, %v2644_v36  ;;  %v4099_v42 = vpop.f32.mrb[24].mxu0 }
 0x263   : > { %2304 = vst.msk [vmem:[#allocation5 + $0x18] sm:$0xff] %vm2300_vm5, %v2259_v37  ;;  %v3093_v43 = vld [vmem:[#allocation5 + $0x8] sm:$0xff]  ;;  %v1860_v44 = vadd.f32 %v4099_v42, %v1828_v31  ;;  %v1771_v45 = vpop.f32.mrb[25].mxu0 }
 0x264   : > { %2820 = vst.msk [vmem:[#allocation5 + $0x10] sm:$0xff] %vm2817_vm1, %v5323_v62  ;;  %4116 = vmatmul.mubr.msk.bf16.vlgmr.msra.gmra.mrb[0].mxu1 %vm3144_vm8, %v3093_v43  ;;  %v1858_v51 = vadd.f32 %v1826_v32, %v1771_v45  ;;  %v4100_v54 = vpop.f32.mrb[26].mxu0  ;;  %2659 = vrot.lane.b32.xlu0 %v3004_v0, %s5902_s23  ;;  %v3719_v62 = vadd.f32 %v4005_v55, %v3989_v5  ;;  %v4008_v0 = vld [vmem:[%s4501_s17 + $0xe1] ss:$2 sm:$0xff] }
 0x265   : > { %2433 = vst.msk [vmem:[#allocation5 + $0x18] sm:$0xff] %vm2429_vm11, %v5325_v1  ;;  %2403 = vrot.lane.b32.xlu1 %v5349_v19, %s5904_s19  ;;  %vm1892_vm10 = vcmp.ge.f32.partialorder %v1860_v44, 0.0  ;;  %v1924_v58 = vmul.f32 0.2, %v1860_v44  ;;  %v1861_v59 = vadd.f32 %v4100_v54, %v1829_v33  ;;  %v1774_v53 = vpop.f32.mrb[27].mxu0  ;;  %v5412_v61 = vpop.permute.xlu0 %2777  ;;  %v3722_v26 = vadd.f32 %v4008_v0, %v3992_v56 }
 0x266   : > { %2949 = vst.msk [vmem:[#allocation5 + $0x10] sm:$0xff] %vm2946_vm2, %v5334_v10  ;;  %v3991_v1 = vld [vmem:[%s4501_s17 + $0xd0] ss:$2 sm:$0xff]  ;;  %vm1890_vm4 = vcmp.ge.f32.partialorder %v1858_v51, 0.0  ;;  %v1922_v2 = vmul.f32 0.2, %v1858_v51  ;;  %v1859_v4 = vadd.f32 %v1827_v46, %v1774_v53  ;;  %v5415_v6 = vpop.permute.xlu1 %2391 }
 0x267   : > { %2562 = vst.msk [vmem:[#allocation5 + $0x18] sm:$0xff] %vm2558_vm13, %v5336_v11  ;;  %v1956_v9 = vsel %vm1892_vm10, %v1860_v44, %v1924_v58  ;;  %vm1893_vm6 = vcmp.ge.f32.partialorder %v1861_v59, 0.0  ;;  %v1925_v10 = vmul.f32 0.2, %v1861_v59  ;;  %v2598_v11 = vld [vmem:[#allocation3 + $0x12a] sm:$0xff]  ;;  %v3721_v30 = vadd.f32 %v4007_v18, %v3991_v1 }
 0x268   : > { %3078 = vst.msk [vmem:[#allocation5 + $0x10] sm:$0xff] %vm3075_vm3, %v5343_v12  ;;  %v3729_v12 = vadd.f32 %v3719_v62, %v3718_v20  ;;  %v1954_v14 = vsel %vm1890_vm4, %v1858_v51, %v1922_v2  ;;  %vm1891_vm7 = vcmp.ge.f32.partialorder %v1859_v4, 0.0  ;;  %v1923_v3 = vmul.f32 0.2, %v1859_v4  ;;  %2789 = vrot.lane.b32.xlu0 %v5349_v19, %s5898_s9  ;;  %v1832_v20 = vld [vmem:[%s5867_s1 + $0xf0] sm:$0xff]  ;;  %v1830_v58 = vld [vmem:[%s5867_s1 + $0xe0] sm:$0xff] }
 0x269   : > { %2691 = vst.msk [vmem:[#allocation5 + $0x18] sm:$0xff] %vm2687_vm15, %v5345_v13  ;;  %v3993_v13 = vld [vmem:[%s4501_s17 + $0xf0] ss:$2 sm:$0xff]  ;;  %2532 = vrot.lane.b32.xlu1 %v5395_v47, %s5901_s21  ;;  %v1957_v16 = vsel %vm1893_vm6, %v1861_v59, %v1925_v10  ;;  %v5426_v17 = vpop.permute.xlu0 %2906  ;;  %v2618_v19 = vpack.c.bf16 %v2598_v11, %v2597_v7  ;;  %v3730_v29 = vadd.f32 %v3721_v30, %v3720_v21 }
 0x26a   : > { %1989 = vst.msk [vmem:[#allocation3 + $0x151] sm:$0xff] %vm334_vm12, %v1956_v9  ;;  %1987 = vst.msk [vmem:[#allocation3 + $0x139] sm:$0xff] %vm334_vm12, %v1954_v14  ;;  %v3737_v60 = vmul.f32 0.25, %v3729_v12  ;;  %v1955_v22 = vsel %vm1891_vm7, %v1859_v4, %v1923_v3  ;;  %v5431_v24 = vpop.permute.xlu1 %2520  ;;  %v3723_v27 = vadd.f32 %v4009_v25, %v3993_v13  ;;  %v1833_v62 = vld [vmem:[%s5867_s1 + $0xf8] sm:$0xff] }
 0x26b   : > { %1990 = vst.msk [vmem:[#allocation3 + $0x159] sm:$0xff] %vm334_vm12, %v1957_v16  ;;  %1988 = vst.msk [vmem:[#allocation3 + $0x141] sm:$0xff] %vm334_vm12, %v1955_v22  ;;  %v3738_v34 = vmul.f32 0.25, %v3730_v29 }
 0x26c   : > { %v3742_v63 = vpack.c.bf16 %v3737_v60, %v3736_v23  ;;  %2918 = vrot.lane.b32.xlu0 %v5395_v47, %s5899_s15  ;;  %v3731_v32 = vadd.f32 %v3723_v27, %v3722_v26 }
 0x26d   : > { %2661 = vrot.lane.b32.xlu1 %v2618_v19, %s5902_s23  ;;  %v5439_v31 = vpop.permute.xlu0 %3035 }
 0x26e   : > { %4153 = vmatprep.mubr.msk.bf16.mxu0 %vm278_vm0, %v3742_v63  ;;  %v5442_v33 = vpop.permute.xlu1 %2649  ;;  %v3739_v35 = vmul.f32 0.25, %v3731_v32 }
 0x26f   : > { %v3094_v28 = vld [vmem:[#allocation5 + $0x10] sm:$0xff] }
 0x270   : > { %4119 = vmatprep.mubr.msk.bf16.mxu1 %vm3144_vm8, %v3094_v28  ;;  %3047 = vrot.lane.b32.xlu0 %v2618_v19, %s5900_s20  ;;  %v3743_v40 = vpack.c.bf16 %v3739_v35, %v3738_v34 }
 0x271   : > { %v2265_v36 = vpop.permute.xlu0 %2264  ;;  %v2727_v37 = vld [vmem:[#allocation3 + $0x138] sm:$0xff]  ;;  %v2729_v38 = vld [vmem:[#allocation3 + $0x150] sm:$0xff] }
 0x272   : > { %v2730_v39 = vld [vmem:[#allocation3 + $0x158] sm:$0xff]  ;;  %v2136_v42 = vpop.permute.xlu1 %2135  ;;  %v2986_v5 = vld [vmem:[#allocation3 + $0x142] sm:$0xff]  ;;  %4154 = vmatmul.mubr.msk.bf16.gmra.mrb[36].mxu0 %vm278_vm0, %v3743_v40 }
 0x273   : > { %v2985_v43 = vld [vmem:[#allocation3 + $0x13a] sm:$0xff]  ;;  %v5445_v44 = vpack.c.bf16 %v2730_v39, %v2729_v38  ;;  %2178 = vst.msk [vmem:[#allocation5 + $0x30] sm:$0xff] %vm2171_vm14, %v2136_v42  ;;  %v2858_v22 = vld [vmem:[#allocation3 + $0x151] sm:$0xff] }
 0x274   : > { %v2728_v41 = vld [vmem:[#allocation3 + $0x140] sm:$0xff]  ;;  %v5448_v45 = vpack.c.bf16 %v2986_v5, %v2985_v43  ;;  %2307 = vst.msk [vmem:[#allocation5 + $0x30] sm:$0xff] %vm2300_vm5, %v2265_v36  ;;  %v2987_v25 = vld [vmem:[#allocation3 + $0x152] sm:$0xff] }
 0x275   : > { %v2748_v46 = vpack.c.bf16 %v2728_v41, %v2727_v37  ;;  %v2857_v48 = vld [vmem:[#allocation3 + $0x141] sm:$0xff]  ;;  %2057 = vst.msk [vmem:[#allocation5 + $0x70] sm:$0xff] %vm334_vm12, %v5445_v44  ;;  %v3034_v49 = vpop.permute.xlu0 %3033  ;;  %v2856_v51 = vld [vmem:[#allocation3 + $0x139] sm:$0xff] }
 0x276   : > { %3049 = vrot.lane.b32.xlu0 %v5448_v45, %s5900_s20  ;;  %v2776_v50 = vpop.permute.xlu1 %2775  ;;  %v2877_v54 = vpack.c.bf16 %v2857_v48, %v2856_v51  ;;  %v2859_v18 = vld [vmem:[#allocation3 + $0x159] sm:$0xff] }
 0x277   : > { %2791 = vrot.lane.b32.xlu1 %v2748_v46, %s5898_s9  ;;  %2056 = vst.msk [vmem:[#allocation5 + $0x68] sm:$0xff] %vm334_vm12, %v2748_v46  ;;  %v2988_v30 = vld [vmem:[#allocation3 + $0x15a] sm:$0xff] }
 0x278   : > { %2821 = vst.msk [vmem:[#allocation5 + $0x18] sm:$0xff] %vm2817_vm1, %v2776_v50  ;;  %v3007_v29 = vpack.c.bf16 %v2988_v30, %v2987_v25 }
 0x279   : > { %v2390_v55 = vpop.permute.xlu0 %2389 }
 0x27a   : > { %2276 = vrot.lane.b32.xlu0 %v2618_v19, %s5903_s22  ;;  %v2905_v52 = vpop.permute.xlu1 %2904  ;;  %2434 = vst.msk [vmem:[#allocation5 + $0x20] sm:$0xff] %vm2429_vm11, %v2390_v55 }
 0x27b   : > { %2920 = vrot.lane.b32.xlu1 %v2877_v54, %s5899_s15  ;;  %2950 = vst.msk [vmem:[#allocation5 + $0x18] sm:$0xff] %vm2946_vm2, %v2905_v52 }
 0x27c   : > { %3079 = vst.msk [vmem:[#allocation5 + $0x18] sm:$0xff] %vm3075_vm3, %v3034_v49 }
 0x27d   : > { %v2519_v57 = vpop.permute.xlu0 %2518 }
 0x27e   : > { %2405 = vrot.lane.b32.xlu0 %v2748_v46, %s5904_s19  ;;  %2563 = vst.msk [vmem:[#allocation5 + $0x20] sm:$0xff] %vm2558_vm13, %v2519_v57  ;;  %v2134_v59 = vpop.permute.xlu1 %2133  ;;  %v4103_v53 = vpop.f32.mrb[28].mxu0 }
 0x27f   : > { %2147 = vrot.lane.b32.xlu1 %v5395_v47, %s5905_s8  ;;  %2177 = vst.msk [vmem:[#allocation5 + $0x28] sm:$0xff] %vm2171_vm14, %v2134_v59  ;;  %v1864_v1 = vadd.f32 %v4103_v53, %v1832_v20  ;;  %v1787_v2 = vpop.f32.mrb[29].mxu0  ;;  %v1831_v47 = vld [vmem:[%s5867_s1 + $0xe8] sm:$0xff] }
 0x280   : > { %v1862_v4 = vadd.f32 %v1830_v58, %v1787_v2  ;;  %v4104_v7 = vpop.f32.mrb[30].mxu0 }
 0x281   : > { %vm1896_vm0 = vcmp.ge.f32.partialorder %v1864_v1, 0.0  ;;  %v1928_v8 = vmul.f32 0.2, %v1864_v1  ;;  %v1865_v56 = vadd.f32 %v4104_v7, %v1833_v62  ;;  %v2648_v9 = vpop.permute.xlu0 %2647  ;;  %v1790_v10 = vpop.f32.mrb[31].mxu0  ;;  %v2736_v7 = vld [vmem:[#allocation3 + $0x1a0] sm:$0xff] }
 0x282   : > { %2534 = vrot.lane.b32.xlu0 %v2877_v54, %s5901_s21  ;;  %vm1894_vm9 = vcmp.ge.f32.partialorder %v1862_v4, 0.0  ;;  %v1926_v11 = vmul.f32 0.2, %v1862_v4  ;;  %2692 = vst.msk [vmem:[#allocation5 + $0x20] sm:$0xff] %vm2687_vm15, %v2648_v9  ;;  %v2263_v12 = vpop.permute.xlu1 %2262  ;;  %v1863_v13 = vadd.f32 %v1831_v47, %v1790_v10 }
 0x283   : > { %2149 = vrot.lane.b32.xlu1 %v2877_v54, %s5905_s8  ;;  %v1960_v14 = vsel %vm1896_vm0, %v1864_v1, %v1928_v8  ;;  %vm1897_vm10 = vcmp.ge.f32.partialorder %v1865_v56, 0.0  ;;  %v1929_v3 = vmul.f32 0.2, %v1865_v56  ;;  %2822 = vst.msk [vmem:[#allocation5 + $0x20] sm:$0xff] %vm2817_vm1, %v5412_v61  ;;  %v3095_v23 = vld [vmem:[#allocation5 + $0x18] sm:$0xff] }
 0x284   : > { %2306 = vst.msk [vmem:[#allocation5 + $0x28] sm:$0xff] %vm2300_vm5, %v2263_v12  ;;  %v1958_v15 = vsel %vm1894_vm9, %v1862_v4, %v1926_v11  ;;  %vm1895_vm4 = vcmp.ge.f32.partialorder %v1863_v13, 0.0  ;;  %v1927_v16 = vmul.f32 0.2, %v1863_v13  ;;  %4120 = vmatmul.mubr.msk.bf16.gmra.mrb[4].mxu1 %vm3144_vm8, %v3095_v23  ;;  %v2735_v4 = vld [vmem:[#allocation3 + $0x198] sm:$0xff]  ;;  %v2865_v12 = vld [vmem:[#allocation3 + $0x1a1] sm:$0xff] }
 0x285   : > { %1993 = vst.msk [vmem:[#allocation3 + $0x181] sm:$0xff] %vm334_vm12, %v1960_v14  ;;  %1991 = vst.msk [vmem:[#allocation3 + $0x169] sm:$0xff] %vm334_vm12, %v1958_v15  ;;  %v1961_v60 = vsel %vm1897_vm10, %v1865_v56, %v1929_v3  ;;  %v2782_v61 = vpop.permute.xlu0 %2781  ;;  %v2752_v9 = vpack.c.bf16 %v2736_v7, %v2735_v4  ;;  %v2864_v11 = vld [vmem:[#allocation3 + $0x199] sm:$0xff]  ;;  %v2994_v15 = vld [vmem:[#allocation3 + $0x1a2] sm:$0xff] }
 0x286   : > { %2951 = vst.msk [vmem:[#allocation5 + $0x20] sm:$0xff] %vm2946_vm2, %v5426_v17  ;;  %2663 = vrot.lane.b32.xlu0 %v5448_v45, %s5902_s23  ;;  %v2396_v17 = vpop.permute.xlu1 %2395  ;;  %v2881_v14 = vpack.c.bf16 %v2865_v12, %v2864_v11  ;;  %v2993_v23 = vld [vmem:[#allocation3 + $0x19a] sm:$0xff] }
 0x287   : > { %2435 = vst.msk [vmem:[#allocation5 + $0x28] sm:$0xff] %vm2429_vm11, %v5415_v6  ;;  %2278 = vrot.lane.b32.xlu1 %v5448_v45, %s5903_s22  ;;  %v1959_v6 = vsel %vm1895_vm4, %v1863_v13, %v1927_v16 }
 0x288   : > { %3080 = vst.msk [vmem:[#allocation5 + $0x20] sm:$0xff] %vm3075_vm3, %v5439_v31 }
 0x289   : > { %2564 = vst.msk [vmem:[#allocation5 + $0x28] sm:$0xff] %vm2558_vm13, %v5431_v24  ;;  %v2911_v0 = vpop.permute.xlu0 %2910  ;;  %v2878_v24 = vpack.c.bf16 %v2859_v18, %v2858_v22 }
 0x28a   : > { %1994 = vst.msk [vmem:[#allocation3 + $0x189] sm:$0xff] %vm334_vm12, %v1961_v60  ;;  %1992 = vst.msk [vmem:[#allocation3 + $0x171] sm:$0xff] %vm334_vm12, %v1959_v6  ;;  %2793 = vrot.lane.b32.xlu0 %v5445_v44, %s5898_s9  ;;  %v2525_v21 = vpop.permute.xlu1 %2524  ;;  %v3010_v60 = vpack.c.bf16 %v2994_v15, %v2993_v23 }
 0x28b   : > { %2693 = vst.msk [vmem:[#allocation5 + $0x28] sm:$0xff] %vm2687_vm15, %v5442_v33  ;;  %2407 = vrot.lane.b32.xlu1 %v5445_v44, %s5904_s19 }
 0x28c   : > { %v2731_v27 = vld [vmem:[#allocation3 + $0x168] sm:$0xff]  ;;  %v2733_v49 = vld [vmem:[#allocation3 + $0x180] sm:$0xff] }
 0x28d   : > { %v3040_v26 = vpop.permute.xlu0 %3039  ;;  %v2860_v40 = vld [vmem:[#allocation3 + $0x169] sm:$0xff]  ;;  %v2862_v52 = vld [vmem:[#allocation3 + $0x181] sm:$0xff] }
 0x28e   : > { %2922 = vrot.lane.b32.xlu0 %v2878_v24, %s5899_s15  ;;  %v2654_v63 = vpop.permute.xlu1 %2653 }
 0x28f   : > { %v3096_v19 = vld [vmem:[#allocation5 + $0x20] sm:$0xff]  ;;  %2536 = vrot.lane.b32.xlu1 %v2878_v24, %s5901_s21 }
 0x290   : > { %4123 = vmatprep.mubr.msk.bf16.mxu1 %vm3144_vm8, %v3096_v19 }
 0x291   : > { %v2732_v28 = vld [vmem:[#allocation3 + $0x170] sm:$0xff]  ;;  %v2269_v34 = vpop.permute.xlu0 %2268  ;;  %v2734_v50 = vld [vmem:[#allocation3 + $0x188] sm:$0xff] }
 0x292   : > { %v2750_v31 = vpack.c.bf16 %v2732_v28, %v2731_v27  ;;  %v2989_v32 = vld [vmem:[#allocation3 + $0x16a] sm:$0xff]  ;;  %v2990_v33 = vld [vmem:[#allocation3 + $0x172] sm:$0xff]  ;;  %3051 = vrot.lane.b32.xlu0 %v3007_v29, %s5900_s20  ;;  %v2140_v35 = vpop.permute.xlu1 %2139  ;;  %v2751_v55 = vpack.c.bf16 %v2734_v50, %v2733_v49  ;;  %v2991_v62 = vld [vmem:[#allocation3 + $0x182] sm:$0xff] }
 0x293   : > { %2665 = vrot.lane.b32.xlu1 %v3007_v29, %s5902_s23  ;;  %2180 = vst.msk [vmem:[#allocation5 + $0x40] sm:$0xff] %vm2171_vm14, %v2140_v35  ;;  %v3008_v36 = vpack.c.bf16 %v2990_v33, %v2989_v32  ;;  %v2861_v37 = vld [vmem:[#allocation3 + $0x171] sm:$0xff]  ;;  %v2863_v20 = vld [vmem:[#allocation3 + $0x189] sm:$0xff] }
 0x294   : > { %2058 = vst.msk [vmem:[#allocation5 + $0x78] sm:$0xff] %vm334_vm12, %v2750_v31  ;;  %v2879_v42 = vpack.c.bf16 %v2861_v37, %v2860_v40  ;;  %v2880_v59 = vpack.c.bf16 %v2863_v20, %v2862_v52  ;;  %v2992_v1 = vld [vmem:[#allocation3 + $0x18a] sm:$0xff] }
 0x295   : > { %2309 = vst.msk [vmem:[#allocation5 + $0x40] sm:$0xff] %vm2300_vm5, %v2269_v34  ;;  %v3038_v38 = vpop.permute.xlu0 %3037  ;;  %v3009_v8 = vpack.c.bf16 %v2992_v1, %v2991_v62 }
 0x296   : > { %3053 = vrot.lane.b32.xlu0 %v3008_v36, %s5900_s20  ;;  %v2780_v39 = vpop.permute.xlu1 %2779 }
 0x297   : > { %2795 = vrot.lane.b32.xlu1 %v2750_v31, %s5898_s9  ;;  %2823 = vst.msk [vmem:[#allocation5 + $0x28] sm:$0xff] %vm2817_vm1, %v2780_v39 }
 0x299   : > { %v2394_v43 = vpop.permute.xlu0 %2393 }
 0x29a   : > { %2280 = vrot.lane.b32.xlu0 %v3007_v29, %s5903_s22  ;;  %v2909_v5 = vpop.permute.xlu1 %2908  ;;  %2436 = vst.msk [vmem:[#allocation5 + $0x30] sm:$0xff] %vm2429_vm11, %v2394_v43 }
 0x29b   : > { %2924 = vrot.lane.b32.xlu1 %v2879_v42, %s5899_s15  ;;  %2952 = vst.msk [vmem:[#allocation5 + $0x28] sm:$0xff] %vm2946_vm2, %v2909_v5 }
 0x29c   : > { %3081 = vst.msk [vmem:[#allocation5 + $0x28] sm:$0xff] %vm3075_vm3, %v3038_v38 }
 0x29d   : > { %v2523_v41 = vpop.permute.xlu0 %2522 }
 0x29e   : > { %2409 = vrot.lane.b32.xlu0 %v2750_v31, %s5904_s19  ;;  %2565 = vst.msk [vmem:[#allocation5 + $0x30] sm:$0xff] %vm2558_vm13, %v2523_v41  ;;  %v2138_v44 = vpop.permute.xlu1 %2137 }
 0x29f   : > { %2151 = vrot.lane.b32.xlu1 %v2878_v24, %s5905_s8  ;;  %2179 = vst.msk [vmem:[#allocation5 + $0x38] sm:$0xff] %vm2171_vm14, %v2138_v44 }
 0x2a1   : > { %v2652_v45 = vpop.permute.xlu0 %2651 }
 0x2a2   : > { %2538 = vrot.lane.b32.xlu0 %v2879_v42, %s5901_s21  ;;  %2694 = vst.msk [vmem:[#allocation5 + $0x30] sm:$0xff] %vm2687_vm15, %v2652_v45  ;;  %v2267_v46 = vpop.permute.xlu1 %2266 }
 0x2a3   : > { %2153 = vrot.lane.b32.xlu1 %v2879_v42, %s5905_s8  ;;  %2824 = vst.msk [vmem:[#allocation5 + $0x30] sm:$0xff] %vm2817_vm1, %v2782_v61  ;;  %v3097_v48 = vld [vmem:[#allocation5 + $0x28] sm:$0xff] }
 0x2a4   : > { %2308 = vst.msk [vmem:[#allocation5 + $0x38] sm:$0xff] %vm2300_vm5, %v2267_v46  ;;  %4124 = vmatmul.mubr.msk.bf16.gmra.mrb[8].mxu1 %vm3144_vm8, %v3097_v48 }
 0x2a5   : > { %2953 = vst.msk [vmem:[#allocation5 + $0x30] sm:$0xff] %vm2946_vm2, %v2911_v0  ;;  %v2786_v51 = vpop.permute.xlu0 %2785 }
 0x2a6   : > { %2437 = vst.msk [vmem:[#allocation5 + $0x38] sm:$0xff] %vm2429_vm11, %v2396_v17  ;;  %2667 = vrot.lane.b32.xlu0 %v3008_v36, %s5902_s23  ;;  %v2400_v54 = vpop.permute.xlu1 %2399 }
 0x2a7   : > { %3082 = vst.msk [vmem:[#allocation5 + $0x30] sm:$0xff] %vm3075_vm3, %v3040_v26  ;;  %2282 = vrot.lane.b32.xlu1 %v3008_v36, %s5903_s22 }
 0x2a8   : > { %2566 = vst.msk [vmem:[#allocation5 + $0x38] sm:$0xff] %vm2558_vm13, %v2525_v21 }
 0x2a9   : > { %2695 = vst.msk [vmem:[#allocation5 + $0x38] sm:$0xff] %vm2687_vm15, %v2654_v63  ;;  %v2915_v57 = vpop.permute.xlu0 %2914 }
 0x2aa   : > { %2797 = vrot.lane.b32.xlu0 %v2751_v55, %s5898_s9  ;;  %v2529_v58 = vpop.permute.xlu1 %2528 }
 0x2ab   : > { %2411 = vrot.lane.b32.xlu1 %v2751_v55, %s5904_s19 }
 0x2ad   : > { %v3042_v2 = vpop.permute.xlu0 %3041 }
 0x2ae   : > { %v3098_v53 = vld [vmem:[#allocation5 + $0x30] sm:$0xff]  ;;  %2926 = vrot.lane.b32.xlu0 %v2880_v59, %s5899_s15  ;;  %v2658_v47 = vpop.permute.xlu1 %2657 }
 0x2af   : > { %2540 = vrot.lane.b32.xlu1 %v2880_v59, %s5901_s21  ;;  %4127 = vmatprep.mubr.msk.bf16.mxu1 %vm3144_vm8, %v3098_v53  ;;  %s4221_s21 = scalar_lea.vmem %s5818_s14, 1024 }
 0x2b0   : > { %p4222_p11 = scmp.ne.s32.totalorder %s5818_s14, %s4221_s21 }
 0x2b1   : > { %v2398_v56 = vpop.permute.xlu0 %2397 }
 0x2b2   : > { %3055 = vrot.lane.b32.xlu0 %v3009_v8, %s5900_s20  ;;  %v2784_v10 = vpop.permute.xlu1 %2783  ;;  %2438 = vst.msk [vmem:[#allocation5 + $0x40] sm:$0xff] %vm2429_vm11, %v2398_v56  ;;  %p4223_p12 = pnand %p4222_p11, %p4378_p5 }
 0x2b3   : > { %2669 = vrot.lane.b32.xlu1 %v3009_v8, %s5902_s23  ;;  %2825 = vst.msk [vmem:[#allocation5 + $0x38] sm:$0xff] %vm2817_vm1, %v2784_v10  ;;  %s4225_s23 = sshll.u32 %s4298_s28, 4  ;;  %s4226_s23 = int_to_ptr.vmem [resolvable:$false] %s4225_s23 }
 0x2b4   : > { %p4224_p13 = pneg %p4223_p12  ;;  %s4227_s22 = scalar_lea.vmem %s4226_s23, 2048 }
 0x2b5   : > { %v2527_v13 = vpop.permute.xlu0 %2526  ;;  %p4228_p0 = scmp.lt.s32.totalorder %s5818_s14, %s4226_s23  ;;  %p4229_p1 = scmp.lt.s32.totalorder %s4227_s22, %s4221_s21 }
 0x2b6   : > { %v2913_v3 = vpop.permute.xlu1 %2912  ;;  %2567 = vst.msk [vmem:[#allocation5 + $0x40] sm:$0xff] %vm2558_vm13, %v2527_v13 }
 0x2b7   : > { %2799 = vrot.lane.b32.xlu1 %v2752_v9, %s5898_s9  ;;  %2954 = vst.msk [vmem:[#allocation5 + $0x38] sm:$0xff] %vm2946_vm2, %v2913_v3  ;;  %p4230_p2 = por %p4229_p1, %p4228_p0 }
 0x2b8   : > { %3083 = vst.msk [vmem:[#allocation5 + $0x38] sm:$0xff] %vm3075_vm3, %v3042_v2 }
 0x2b9   : > { %v2656_v16 = vpop.permute.xlu0 %2655  ;;  %p4231_p3 = pnand %p4230_p2, %p4224_p13 }
 0x2ba   : > { %2696 = vst.msk [vmem:[#allocation5 + $0x40] sm:$0xff] %vm2687_vm15, %v2656_v16  ;;  %v2142_v61 = vpop.permute.xlu1 %2141 }
 0x2bb   : > { %2928 = vrot.lane.b32.xlu1 %v2881_v14, %s5899_s15  ;;  %2826 = vst.msk [vmem:[#allocation5 + $0x40] sm:$0xff] %vm2817_vm1, %v2786_v51  ;;  %s5816_s15 = scalar_lea.hbm %s5873_s7, %s4021_s13 }
 0x2bc   : > { %2181 = vst.msk [vmem:[#allocation5 + $0x48] sm:$0xff] %vm2171_vm14, %v2142_v61 }
 0x2bd   : > { %2955 = vst.msk [vmem:[#allocation5 + $0x40] sm:$0xff] %vm2946_vm2, %v2915_v57  ;;  %v3044_v6 = vpop.permute.xlu0 %3043 }
 0x2be   : > { %3084 = vst.msk [vmem:[#allocation5 + $0x40] sm:$0xff] %vm3075_vm3, %v3044_v6  ;;  %v2271_v17 = vpop.permute.xlu1 %2270 }
 0x2bf   : > { %3057 = vrot.lane.b32.xlu1 %v3010_v60, %s5900_s20  ;;  %2310 = vst.msk [vmem:[#allocation5 + $0x48] sm:$0xff] %vm2300_vm5, %v2271_v17  ;;  %v3099_v18 = vld [vmem:[#allocation5 + $0x38] sm:$0xff]  ;;  %v3360_v17 = vld [vmem:[%s5868_s2 + $0x10] sm:$0xff]  ;;  %s5824_s20 = scalar_lea.sflag [#allocation8], %s269_s3 }
 0x2c0   : > { %2439 = vst.msk [vmem:[#allocation5 + $0x48] sm:$0xff] %vm2429_vm11, %v2400_v54  ;;  %4128 = vmatmul.mubr.msk.bf16.gmra.mrb[12].mxu1 %vm3144_vm8, %v3099_v18  ;;  %v3358_v18 = vld [vmem:[%s5868_s2] sm:$0xff] }
 0x2c1   : > { %2568 = vst.msk [vmem:[#allocation5 + $0x48] sm:$0xff] %vm2558_vm13, %v2529_v58 }
 0x2c2   : > { %2697 = vst.msk [vmem:[#allocation5 + $0x48] sm:$0xff] %vm2687_vm15, %v2658_v47  ;;  %v2144_v0 = vpop.permute.xlu1 %2143 }
 0x2c3   : > { %2182 = vst.msk [vmem:[#allocation5 + $0x50] sm:$0xff] %vm2171_vm14, %v2144_v0 }
 0x2c5   : > { %v3100_v21 = vld [vmem:[#allocation5 + $0x40] sm:$0xff] }
 0x2c6   : > { %4131 = vmatprep.mubr.msk.bf16.mxu1 %vm3144_vm8, %v3100_v21  ;;  %v3046_v22 = vpop.permute.xlu0 %3045  ;;  %v3361_v21 = vld [vmem:[%s5868_s2 + $0x18] sm:$0xff] }
 0x2c7   : > { %v2788_v24 = vpop.permute.xlu1 %2787 }
 0x2c8   : > { %2827 = vst.msk [vmem:[#allocation5 + $0x48] sm:$0xff] %vm2817_vm1, %v2788_v24  ;;  %v5579_v29 = vpop.f32.mrb[32].mxu0 }
 0x2c9   : > { %v5581_v31 = vpop.f32.mrb[33].mxu0 }
 0x2ca   : > { %v2273_v19 = vpop.permute.xlu0 %2272  ;;  %v5589_v38 = vpop.f32.mrb[34].mxu0 }
 0x2cb   : > { %v2917_v25 = vpop.permute.xlu1 %2916  ;;  %2311 = vst.msk [vmem:[#allocation5 + $0x50] sm:$0xff] %vm2300_vm5, %v2273_v19  ;;  %v5595_v44 = vpop.f32.mrb[35].mxu0 }
 0x2cc   : > { %2956 = vst.msk [vmem:[#allocation5 + $0x48] sm:$0xff] %vm2946_vm2, %v2917_v25  ;;  %v3359_v25 = vld [vmem:[%s5868_s2 + $0x8] sm:$0xff] }
 0x2cd   : > { %3085 = vst.msk [vmem:[#allocation5 + $0x48] sm:$0xff] %vm3075_vm3, %v3046_v22 }
 0x2ce   : > { %v2402_v30 = vpop.permute.xlu0 %2401 }
 0x2cf   : > { %v2146_v26 = vpop.permute.xlu1 %2145  ;;  %2440 = vst.msk [vmem:[#allocation5 + $0x50] sm:$0xff] %vm2429_vm11, %v2402_v30 }
 0x2d0   : > { %2183 = vst.msk [vmem:[#allocation5 + $0x58] sm:$0xff] %vm2171_vm14, %v2146_v26 }
 0x2d2   : > { %v2531_v63 = vpop.permute.xlu0 %2530 }
 0x2d3   : > { %v2275_v27 = vpop.permute.xlu1 %2274  ;;  %2569 = vst.msk [vmem:[#allocation5 + $0x50] sm:$0xff] %vm2558_vm13, %v2531_v63 }
 0x2d4   : > { %2312 = vst.msk [vmem:[#allocation5 + $0x58] sm:$0xff] %vm2300_vm5, %v2275_v27  ;;  %v3101_v28 = vld [vmem:[#allocation5 + $0x48] sm:$0xff] }
 0x2d5   : > { %4132 = vmatmul.mubr.msk.bf16.gmra.mrb[16].mxu1 %vm3144_vm8, %v3101_v28 }
 0x2d6   : > { %v2660_v32 = vpop.permute.xlu0 %2659 }
 0x2d7   : > { %v2404_v33 = vpop.permute.xlu1 %2403  ;;  %2698 = vst.msk [vmem:[#allocation5 + $0x50] sm:$0xff] %vm2687_vm15, %v2660_v32 }
 0x2d8   : > { %2441 = vst.msk [vmem:[#allocation5 + $0x58] sm:$0xff] %vm2429_vm11, %v2404_v33 }
 0x2da   : > { %v2790_v34 = vpop.permute.xlu0 %2789 }
 0x2db   : > { %v2533_v35 = vpop.permute.xlu1 %2532  ;;  %2828 = vst.msk [vmem:[#allocation5 + $0x50] sm:$0xff] %vm2817_vm1, %v2790_v34 }
 0x2dc   : > { %2570 = vst.msk [vmem:[#allocation5 + $0x58] sm:$0xff] %vm2558_vm13, %v2533_v35 }
 0x2de   : > { %v2919_v36 = vpop.permute.xlu0 %2918 }
 0x2df   : > { %v2662_v37 = vpop.permute.xlu1 %2661  ;;  %2957 = vst.msk [vmem:[#allocation5 + $0x50] sm:$0xff] %vm2946_vm2, %v2919_v36 }
 0x2e0   : > { %2699 = vst.msk [vmem:[#allocation5 + $0x58] sm:$0xff] %vm2687_vm15, %v2662_v37 }
 0x2e2   : > { %v3048_v39 = vpop.permute.xlu0 %3047 }
 0x2e3   : > { %3086 = vst.msk [vmem:[#allocation5 + $0x50] sm:$0xff] %vm3075_vm3, %v3048_v39 }
 0x2e8   : > { %v3050_v40 = vpop.permute.xlu0 %3049 }
 0x2e9   : > { %v2792_v42 = vpop.permute.xlu1 %2791 }
 0x2ea   : > { %2829 = vst.msk [vmem:[#allocation5 + $0x58] sm:$0xff] %vm2817_vm1, %v2792_v42  ;;  %v3102_v43 = vld [vmem:[#allocation5 + $0x50] sm:$0xff]  ;;  %v5654_v42 = vld [vmem:[%s5872_s6] ss:$0 sm:$0xff] }
 0x2eb   : > { %4135 = vmatprep.mubr.msk.bf16.mxu1 %vm3144_vm8, %v3102_v43 }
 0x2ec   : > { %v2277_v5 = vpop.permute.xlu0 %2276 }
 0x2ed   : > { %v2921_v41 = vpop.permute.xlu1 %2920 }
 0x2ee   : > { %2958 = vst.msk [vmem:[#allocation5 + $0x58] sm:$0xff] %vm2946_vm2, %v2921_v41 }
 0x2ef   : > { %3087 = vst.msk [vmem:[#allocation5 + $0x58] sm:$0xff] %vm3075_vm3, %v3050_v40 }
 0x2f0   : > { %v2406_v46 = vpop.permute.xlu0 %2405 }
 0x2f1   : > { %v2148_v45 = vpop.permute.xlu1 %2147 }
 0x2f2   : > { %2184 = vst.msk [vmem:[#allocation5 + $0x60] sm:$0xff] %vm2171_vm14, %v2148_v45 }
 0x2f3   : > { %2313 = vst.msk [vmem:[#allocation5 + $0x60] sm:$0xff] %vm2300_vm5, %v2277_v5 }
 0x2f4   : > { %2442 = vst.msk [vmem:[#allocation5 + $0x60] sm:$0xff] %vm2429_vm11, %v2406_v46  ;;  %v2535_v48 = vpop.permute.xlu0 %2534 }
 0x2f5   : > { %v2150_v49 = vpop.permute.xlu1 %2149  ;;  %2571 = vst.msk [vmem:[#allocation5 + $0x60] sm:$0xff] %vm2558_vm13, %v2535_v48 }
 0x2f6   : > { %2185 = vst.msk [vmem:[#allocation5 + $0x68] sm:$0xff] %vm2171_vm14, %v2150_v49  ;;  %v3103_v50 = vld [vmem:[#allocation5 + $0x58] sm:$0xff] }
 0x2f7   : > { %4136 = vmatmul.mubr.msk.bf16.gmra.mrb[20].mxu1 %vm3144_vm8, %v3103_v50 }
 0x2f8   : > { %v2664_v51 = vpop.permute.xlu0 %2663 }
 0x2f9   : > { %v2279_v54 = vpop.permute.xlu1 %2278  ;;  %2700 = vst.msk [vmem:[#allocation5 + $0x60] sm:$0xff] %vm2687_vm15, %v2664_v51 }
 0x2fa   : > { %2314 = vst.msk [vmem:[#allocation5 + $0x68] sm:$0xff] %vm2300_vm5, %v2279_v54  ;;  %v3802_v54 = vadd.f32 %v5654_v42, %v5581_v31  ;;  %v3362_v31 = vld [vmem:[%s5868_s2 + $0x20] sm:$0xff] }
 0x2fc   : > { %v2794_v55 = vpop.permute.xlu0 %2793 }
 0x2fd   : > { %v2408_v52 = vpop.permute.xlu1 %2407  ;;  %2830 = vst.msk [vmem:[#allocation5 + $0x60] sm:$0xff] %vm2817_vm1, %v2794_v55 }
 0x2fe   : > { %2443 = vst.msk [vmem:[#allocation5 + $0x68] sm:$0xff] %vm2429_vm11, %v2408_v52 }
 0x300   : > { %v2923_v20 = vpop.permute.xlu0 %2922 }
 0x301   : > { %v2537_v57 = vpop.permute.xlu1 %2536  ;;  %2959 = vst.msk [vmem:[#allocation5 + $0x60] sm:$0xff] %vm2946_vm2, %v2923_v20 }
 0x302   : > { %2572 = vst.msk [vmem:[#allocation5 + $0x68] sm:$0xff] %vm2558_vm13, %v2537_v57 }
 0x304   : > { %v3052_v58 = vpop.permute.xlu0 %3051 }
 0x305   : > { %v2666_v59 = vpop.permute.xlu1 %2665  ;;  %3088 = vst.msk [vmem:[#allocation5 + $0x60] sm:$0xff] %vm3075_vm3, %v3052_v58  ;;  %v3364_v58 = vld [vmem:[%s5868_s2 + $0x30] sm:$0xff] }
 0x306   : > { %2701 = vst.msk [vmem:[#allocation5 + $0x68] sm:$0xff] %vm2687_vm15, %v2666_v59 }
 0x308   : > { %v3054_v53 = vpop.permute.xlu0 %3053 }
 0x309   : > { %v2796_v62 = vpop.permute.xlu1 %2795 }
 0x30a   : > { %2831 = vst.msk [vmem:[#allocation5 + $0x68] sm:$0xff] %vm2817_vm1, %v2796_v62 }
 0x30c   : > { %v2281_v1 = vpop.permute.xlu0 %2280  ;;  %v3104_v47 = vld [vmem:[#allocation5 + $0x60] sm:$0xff] }
 0x30d   : > { %v2925_v2 = vpop.permute.xlu1 %2924  ;;  %4139 = vmatprep.mubr.msk.bf16.mxu1 %vm3144_vm8, %v3104_v47 }
 0x30e   : > { %2960 = vst.msk [vmem:[#allocation5 + $0x68] sm:$0xff] %vm2946_vm2, %v2925_v2  ;;  %v3363_v2 = vld [vmem:[%s5868_s2 + $0x28] sm:$0xff] }
 0x30f   : > { %3089 = vst.msk [vmem:[#allocation5 + $0x68] sm:$0xff] %vm3075_vm3, %v3054_v53  ;;  %v3365_v53 = vld [vmem:[%s5868_s2 + $0x38] sm:$0xff] }
 0x310   : > { %v2410_v7 = vpop.permute.xlu0 %2409 }
 0x311   : > { %v2152_v4 = vpop.permute.xlu1 %2151 }
 0x312   : > { %2186 = vst.msk [vmem:[#allocation5 + $0x70] sm:$0xff] %vm2171_vm14, %v2152_v4 }
 0x313   : > { %2315 = vst.msk [vmem:[#allocation5 + $0x70] sm:$0xff] %vm2300_vm5, %v2281_v1 }
 0x314   : > { %2444 = vst.msk [vmem:[#allocation5 + $0x70] sm:$0xff] %vm2429_vm11, %v2410_v7  ;;  %v2539_v8 = vpop.permute.xlu0 %2538 }
 0x315   : > { %v2154_v56 = vpop.permute.xlu1 %2153  ;;  %2573 = vst.msk [vmem:[#allocation5 + $0x70] sm:$0xff] %vm2558_vm13, %v2539_v8 }
 0x316   : > { %2187 = vst.msk [vmem:[#allocation5 + $0x78] sm:$0xff] %vm2171_vm14, %v2154_v56  ;;  %v3105_v9 = vld [vmem:[#allocation5 + $0x68] sm:$0xff] }
 0x317   : > { %4140 = vmatmul.mubr.msk.bf16.gmra.mrb[24].mxu1 %vm3144_vm8, %v3105_v9 }
 0x318   : > { %v2668_v10 = vpop.permute.xlu0 %2667 }
 0x319   : > { %v2283_v11 = vpop.permute.xlu1 %2282  ;;  %2702 = vst.msk [vmem:[#allocation5 + $0x70] sm:$0xff] %vm2687_vm15, %v2668_v10 }
 0x31a   : > { %2316 = vst.msk [vmem:[#allocation5 + $0x78] sm:$0xff] %vm2300_vm5, %v2283_v11 }
 0x31c   : > { %v2798_v12 = vpop.permute.xlu0 %2797 }
 0x31d   : > { %v2412_v13 = vpop.permute.xlu1 %2411  ;;  %2832 = vst.msk [vmem:[#allocation5 + $0x70] sm:$0xff] %vm2817_vm1, %v2798_v12 }
 0x31e   : > { %2445 = vst.msk [vmem:[#allocation5 + $0x78] sm:$0xff] %vm2429_vm11, %v2412_v13 }
 0x320   : > { %v2927_v14 = vpop.permute.xlu0 %2926 }
 0x321   : > { %v2541_v3 = vpop.permute.xlu1 %2540  ;;  %2961 = vst.msk [vmem:[#allocation5 + $0x70] sm:$0xff] %vm2946_vm2, %v2927_v14 }
 0x322   : > { %2574 = vst.msk [vmem:[#allocation5 + $0x78] sm:$0xff] %vm2558_vm13, %v2541_v3 }
 0x324   : > { %v3056_v23 = vpop.permute.xlu0 %3055 }
 0x325   : > { %v2670_v15 = vpop.permute.xlu1 %2669  ;;  %3090 = vst.msk [vmem:[#allocation5 + $0x70] sm:$0xff] %vm3075_vm3, %v3056_v23 }
 0x326   : > { %2703 = vst.msk [vmem:[#allocation5 + $0x78] sm:$0xff] %vm2687_vm15, %v2670_v15 }
 0x329   : > { %v2800_v16 = vpop.permute.xlu1 %2799 }
 0x32a   : > { %2833 = vst.msk [vmem:[#allocation5 + $0x78] sm:$0xff] %vm2817_vm1, %v2800_v16 }
 0x32c   : > { %v3106_v61 = vld [vmem:[#allocation5 + $0x70] sm:$0xff] }
 0x32d   : > { %v2929_v60 = vpop.permute.xlu1 %2928  ;;  %4143 = vmatprep.mubr.msk.bf16.mxu1 %vm3144_vm8, %v3106_v61 }
 0x32e   : > { %2962 = vst.msk [vmem:[#allocation5 + $0x78] sm:$0xff] %vm2946_vm2, %v2929_v60 }
 0x331   : > { %v3058_v6 = vpop.permute.xlu1 %3057 }
 0x332   : > { %3091 = vst.msk [vmem:[#allocation5 + $0x78] sm:$0xff] %vm3075_vm3, %v3058_v6 }
 0x337   : > { %v4117_v0 = vpop.f32.mrb[0].mxu1 }
 0x338   : > { %v3392_v22 = vadd.f32 %v4117_v0, %v3360_v17  ;;  %v3231_v24 = vpop.f32.mrb[1].mxu1 }
 0x339   : > { %v3107_v19 = vld [vmem:[#allocation5 + $0x78] sm:$0xff]  ;;  %v3390_v30 = vadd.f32 %v3358_v18, %v3231_v24  ;;  %v4118_v26 = vpop.f32.mrb[2].mxu1 }
 0x33a   : > { %4144 = vmatmul.mubr.msk.bf16.gmra.mrb[28].mxu1 %vm3144_vm8, %v3107_v19  ;;  %vm3424_vm14 = vcmp.ge.f32.partialorder %v3392_v22, 0.0  ;;  %v3456_v63 = vmul.f32 0.2, %v3392_v22  ;;  %v3393_v27 = vadd.f32 %v4118_v26, %v3361_v21  ;;  %v3234_v28 = vpop.f32.mrb[3].mxu1  ;;  %v3805_v21 = vadd.f32 %v5654_v42, %v5595_v44 }
 0x33b   : > { %vm3422_vm5 = vcmp.ge.f32.partialorder %v3390_v30, 0.0  ;;  %v3454_v32 = vmul.f32 0.2, %v3390_v30  ;;  %v3391_v33 = vadd.f32 %v3359_v25, %v3234_v28  ;;  %v3368_v25 = vld [vmem:[%s5868_s2 + $0x50] sm:$0xff]  ;;  %v3367_v28 = vld [vmem:[%s5868_s2 + $0x48] sm:$0xff] }
 0x33c   : > { %v3488_v34 = vsel %vm3424_vm14, %v3392_v22, %v3456_v63  ;;  %vm3425_vm11 = vcmp.ge.f32.partialorder %v3393_v27, 0.0  ;;  %v3457_v35 = vmul.f32 0.2, %v3393_v27  ;;  %v3369_v63 = vld [vmem:[%s5868_s2 + $0x58] sm:$0xff] }
 0x33d   : > { %3520 = vst.msk [vmem:[#allocation6 + $0x10] sm:$0xff] %vm334_vm12, %v3488_v34  ;;  %v3486_v36 = vsel %vm3422_vm5, %v3390_v30, %v3454_v32  ;;  %vm3423_vm13 = vcmp.ge.f32.partialorder %v3391_v33, 0.0  ;;  %v3455_v37 = vmul.f32 0.2, %v3391_v33  ;;  %v3366_v30 = vld [vmem:[%s5868_s2 + $0x40] sm:$0xff] }
 0x33e   : > { %3518 = vst.msk [vmem:[#allocation6] sm:$0xff] %vm334_vm12, %v3486_v36  ;;  %v3489_v39 = vsel %vm3425_vm11, %v3393_v27, %v3457_v35 }
 0x33f   : > { %3521 = vst.msk [vmem:[#allocation6 + $0x18] sm:$0xff] %vm334_vm12, %v3489_v39  ;;  %v3487_v40 = vsel %vm3423_vm13, %v3391_v33, %v3455_v37 }
 0x340   : > { %3519 = vst.msk [vmem:[#allocation6 + $0x8] sm:$0xff] %vm334_vm12, %v3487_v40 }
 0x345   : > { %v5656_v48 = vpop.f32.mrb[36].mxu0 }
 0x346   : > { %v3552_v43 = vld [vmem:[#allocation6 + $0x10] ss:$2 sm:$0xff]  ;;  %v3584_v5 = vld [vmem:[#allocation6 + $0x11] ss:$2 sm:$0xff]  ;;  %v5658_v50 = vpop.f32.mrb[37].mxu0 }
 0x347   : > { %v3550_v41 = vld [vmem:[#allocation6] ss:$2 sm:$0xff]  ;;  %v3582_v45 = vld [vmem:[#allocation6 + $0x1] ss:$2 sm:$0xff]  ;;  %v3614_v46 = vadd.f32 %v3584_v5, %v3552_v43  ;;  %v5669_v57 = vpop.f32.mrb[38].mxu0 }
 0x348   : > { %v3613_v49 = vadd.f32 %v3582_v45, %v3550_v41  ;;  %v5684_v3 = vpop.f32.mrb[39].mxu0 }
 0x34a   : > { %v3629_v51 = vadd.f32 %v3614_v46, %v3613_v49 }
 0x34c   : > { %v3637_v55 = vmul.f32 0.25, %v3629_v51 }
 0x34e   : > { %v3832_v52 = vadd.f32 %v3802_v54, %v3637_v55 }
 0x350   : > { %v3840_v20 = vmul.f32 0.70710677, %v3832_v52 }
 0x352   : > { %3848 = vst.msk [vmem:[%s5665_s29] sm:$0xff] %vm334_vm12, %v3840_v20 }
 0x357   : > { %v4121_v59 = vpop.f32.mrb[4].mxu1 }
 0x358   : > { %v3396_v62 = vadd.f32 %v4121_v59, %v3364_v58  ;;  %v3247_v1 = vpop.f32.mrb[5].mxu1  ;;  %v3810_v58 = vadd.f32 %v5579_v29, %v5654_v42 }
 0x359   : > { %v3394_v47 = vadd.f32 %v3362_v31, %v3247_v1  ;;  %v4122_v4 = vpop.f32.mrb[6].mxu1  ;;  %v3372_v1 = vld [vmem:[%s5868_s2 + $0x70] sm:$0xff] }
 0x35a   : > { %vm3428_vm15 = vcmp.ge.f32.partialorder %v3396_v62, 0.0  ;;  %v3460_v7 = vmul.f32 0.2, %v3396_v62  ;;  %v3397_v8 = vadd.f32 %v4122_v4, %v3365_v53  ;;  %v3250_v56 = vpop.f32.mrb[7].mxu1  ;;  %v3373_v4 = vld [vmem:[%s5868_s2 + $0x78] sm:$0xff] }
 0x35b   : > { %vm3426_vm1 = vcmp.ge.f32.partialorder %v3394_v47, 0.0  ;;  %v3458_v9 = vmul.f32 0.2, %v3394_v47  ;;  %v3395_v10 = vadd.f32 %v3363_v2, %v3250_v56  ;;  %v3370_v2 = vld [vmem:[%s5868_s2 + $0x60] sm:$0xff] }
 0x35c   : > { %v3492_v11 = vsel %vm3428_vm15, %v3396_v62, %v3460_v7  ;;  %vm3429_vm2 = vcmp.ge.f32.partialorder %v3397_v8, 0.0  ;;  %v3461_v12 = vmul.f32 0.2, %v3397_v8 }
 0x35d   : > { %3524 = vst.msk [vmem:[#allocation6 + $0x30] sm:$0xff] %vm334_vm12, %v3492_v11  ;;  %v3490_v13 = vsel %vm3426_vm1, %v3394_v47, %v3458_v9  ;;  %vm3427_vm3 = vcmp.ge.f32.partialorder %v3395_v10, 0.0  ;;  %v3459_v14 = vmul.f32 0.2, %v3395_v10 }
 0x35e   : > { %3522 = vst.msk [vmem:[#allocation6 + $0x20] sm:$0xff] %vm334_vm12, %v3490_v13  ;;  %v3493_v23 = vsel %vm3429_vm2, %v3397_v8, %v3461_v12  ;;  %v3371_v8 = vld [vmem:[%s5868_s2 + $0x68] sm:$0xff] }
 0x35f   : > { %3525 = vst.msk [vmem:[#allocation6 + $0x38] sm:$0xff] %vm334_vm12, %v3493_v23  ;;  %v3491_v15 = vsel %vm3427_vm3, %v3395_v10, %v3459_v14 }
 0x360   : > { %3523 = vst.msk [vmem:[#allocation6 + $0x28] sm:$0xff] %vm334_vm12, %v3491_v15 }
 0x366   : > { %v3556_v16 = vld [vmem:[#allocation6 + $0x30] ss:$2 sm:$0xff]  ;;  %v3588_v60 = vld [vmem:[#allocation6 + $0x31] ss:$2 sm:$0xff] }
 0x367   : > { %v3554_v61 = vld [vmem:[#allocation6 + $0x20] ss:$2 sm:$0xff]  ;;  %v3586_v6 = vld [vmem:[#allocation6 + $0x21] ss:$2 sm:$0xff]  ;;  %v3616_v17 = vadd.f32 %v3588_v60, %v3556_v16 }
 0x368   : > { %v3615_v18 = vadd.f32 %v3586_v6, %v3554_v61 }
 0x36a   : > { %v3630_v0 = vadd.f32 %v3616_v17, %v3615_v18 }
 0x36c   : > { %v3638_v22 = vmul.f32 0.25, %v3630_v0 }
 0x36e   : > { %v3833_v24 = vadd.f32 %v3805_v21, %v3638_v22 }
 0x370   : > { %v3841_v19 = vmul.f32 0.70710677, %v3833_v24 }
 0x372   : > { %3849 = vst.msk [vmem:[%s5665_s29 + $0x8] sm:$0xff] %vm334_vm12, %v3841_v19  ;;  %v3376_v19 = vld [vmem:[%s5868_s2 + $0x90] sm:$0xff] }
 0x377   : > { %v4125_v26 = vpop.f32.mrb[8].mxu1 }
 0x378   : > { %v3400_v27 = vadd.f32 %v4125_v26, %v3368_v25  ;;  %v3263_v44 = vpop.f32.mrb[9].mxu1  ;;  %v3813_v25 = vadd.f32 %v5589_v38, %v5654_v42  ;;  %v3374_v26 = vld [vmem:[%s5868_s2 + $0x80] sm:$0xff] }
 0x379   : > { %v3398_v32 = vadd.f32 %v3366_v30, %v3263_v44  ;;  %v4126_v33 = vpop.f32.mrb[10].mxu1 }
 0x37a   : > { %vm3432_vm8 = vcmp.ge.f32.partialorder %v3400_v27, 0.0  ;;  %v3464_v34 = vmul.f32 0.2, %v3400_v27  ;;  %v3401_v35 = vadd.f32 %v4126_v33, %v3369_v63  ;;  %v3266_v36 = vpop.f32.mrb[11].mxu1  ;;  %v3375_v33 = vld [vmem:[%s5868_s2 + $0x88] sm:$0xff] }
 0x37b   : > { %vm3430_vm6 = vcmp.ge.f32.partialorder %v3398_v32, 0.0  ;;  %v3462_v37 = vmul.f32 0.2, %v3398_v32  ;;  %v3399_v39 = vadd.f32 %v3367_v28, %v3266_v36 }
 0x37c   : > { %v3496_v40 = vsel %vm3432_vm8, %v3400_v27, %v3464_v34  ;;  %vm3433_vm7 = vcmp.ge.f32.partialorder %v3401_v35, 0.0  ;;  %v3465_v43 = vmul.f32 0.2, %v3401_v35  ;;  %v3377_v27 = vld [vmem:[%s5868_s2 + $0x98] sm:$0xff] }
 0x37d   : > { %3528 = vst.msk [vmem:[#allocation6 + $0x50] sm:$0xff] %vm334_vm12, %v3496_v40  ;;  %v3494_v5 = vsel %vm3430_vm6, %v3398_v32, %v3462_v37  ;;  %vm3431_vm0 = vcmp.ge.f32.partialorder %v3399_v39, 0.0  ;;  %v3463_v41 = vmul.f32 0.2, %v3399_v39 }
 0x37e   : > { %3526 = vst.msk [vmem:[#allocation6 + $0x40] sm:$0xff] %vm334_vm12, %v3494_v5  ;;  %v3497_v45 = vsel %vm3433_vm7, %v3401_v35, %v3465_v43 }
 0x37f   : > { %3529 = vst.msk [vmem:[#allocation6 + $0x58] sm:$0xff] %vm334_vm12, %v3497_v45  ;;  %v3495_v46 = vsel %vm3431_vm0, %v3399_v39, %v3463_v41 }
 0x380   : > { %3527 = vst.msk [vmem:[#allocation6 + $0x48] sm:$0xff] %vm334_vm12, %v3495_v46 }
 0x386   : > { %v3560_v49 = vld [vmem:[#allocation6 + $0x50] ss:$2 sm:$0xff]  ;;  %v3592_v51 = vld [vmem:[#allocation6 + $0x51] ss:$2 sm:$0xff] }
 0x387   : > { %v3618_v54 = vadd.f32 %v3592_v51, %v3560_v49  ;;  %v3558_v55 = vld [vmem:[#allocation6 + $0x40] ss:$2 sm:$0xff]  ;;  %v3590_v52 = vld [vmem:[#allocation6 + $0x41] ss:$2 sm:$0xff] }
 0x388   : > { %v3617_v20 = vadd.f32 %v3590_v52, %v3558_v55 }
 0x38a   : > { %v3631_v31 = vadd.f32 %v3618_v54, %v3617_v20 }
 0x38c   : > { %v3639_v59 = vmul.f32 0.25, %v3631_v31 }
 0x38e   : > { %v3834_v53 = vadd.f32 %v3810_v58, %v3639_v59 }
 0x390   : > { %v3842_v62 = vmul.f32 0.70710677, %v3834_v53 }
 0x392   : > { %3850 = vst.msk [vmem:[%s5665_s29 + $0x10] sm:$0xff] %vm334_vm12, %v3842_v62  ;;  %v3818_v62 = vadd.f32 %v5654_v42, %v5658_v50 }
 0x393   : > { %v4129_v47 = vpop.f32.mrb[12].mxu1 }
 0x394   : > { %v3404_v29 = vadd.f32 %v4129_v47, %v3372_v1  ;;  %v3279_v7 = vpop.f32.mrb[13].mxu1 }
 0x395   : > { %v3402_v56 = vadd.f32 %v3370_v2, %v3279_v7  ;;  %v4130_v9 = vpop.f32.mrb[14].mxu1 }
 0x396   : > { %vm3436_vm9 = vcmp.ge.f32.partialorder %v3404_v29, 0.0  ;;  %v3468_v10 = vmul.f32 0.2, %v3404_v29  ;;  %v3405_v11 = vadd.f32 %v4130_v9, %v3373_v4  ;;  %v3282_v12 = vpop.f32.mrb[15].mxu1  ;;  %v3380_v4 = vld [vmem:[%s5868_s2 + $0xb0] sm:$0xff]  ;;  %v3379_v9 = vld [vmem:[%s5868_s2 + $0xa8] sm:$0xff] }
 0x397   : > { %vm3434_vm10 = vcmp.ge.f32.partialorder %v3402_v56, 0.0  ;;  %v3466_v13 = vmul.f32 0.2, %v3402_v56  ;;  %v3403_v14 = vadd.f32 %v3371_v8, %v3282_v12  ;;  %v3381_v8 = vld [vmem:[%s5868_s2 + $0xb8] sm:$0xff] }
 0x398   : > { %v3500_v23 = vsel %vm3436_vm9, %v3404_v29, %v3468_v10  ;;  %vm3437_vm4 = vcmp.ge.f32.partialorder %v3405_v11, 0.0  ;;  %v3469_v15 = vmul.f32 0.2, %v3405_v11  ;;  %v3378_v29 = vld [vmem:[%s5868_s2 + $0xa0] sm:$0xff] }
 0x399   : > { %3532 = vst.msk [vmem:[#allocation6 + $0x70] sm:$0xff] %vm334_vm12, %v3500_v23  ;;  %v3498_v16 = vsel %vm3434_vm10, %v3402_v56, %v3466_v13  ;;  %vm3435_vm14 = vcmp.ge.f32.partialorder %v3403_v14, 0.0  ;;  %v3467_v60 = vmul.f32 0.2, %v3403_v14 }
 0x39a   : > { %3530 = vst.msk [vmem:[#allocation6 + $0x60] sm:$0xff] %vm334_vm12, %v3498_v16  ;;  %v3501_v61 = vsel %vm3437_vm4, %v3405_v11, %v3469_v15 }
 0x39b   : > { %3533 = vst.msk [vmem:[#allocation6 + $0x78] sm:$0xff] %vm334_vm12, %v3501_v61  ;;  %v3499_v6 = vsel %vm3435_vm14, %v3403_v14, %v3467_v60 }
 0x39c   : > { %3531 = vst.msk [vmem:[#allocation6 + $0x68] sm:$0xff] %vm334_vm12, %v3499_v6 }
 0x3a2   : > { %v3564_v17 = vld [vmem:[#allocation6 + $0x70] ss:$2 sm:$0xff]  ;;  %v3596_v18 = vld [vmem:[#allocation6 + $0x71] ss:$2 sm:$0xff] }
 0x3a3   : > { %v3620_v0 = vadd.f32 %v3596_v18, %v3564_v17  ;;  %v3562_v21 = vld [vmem:[#allocation6 + $0x60] ss:$2 sm:$0xff]  ;;  %v3594_v22 = vld [vmem:[#allocation6 + $0x61] ss:$2 sm:$0xff] }
 0x3a4   : > { %v3619_v24 = vadd.f32 %v3594_v22, %v3562_v21 }
 0x3a6   : > { %v3632_v30 = vadd.f32 %v3620_v0, %v3619_v24 }
 0x3a8   : > { %v4133_v63 = vpop.f32.mrb[16].mxu1  ;;  %v3640_v44 = vmul.f32 0.25, %v3632_v30 }
 0x3a9   : > { %v3408_v28 = vadd.f32 %v4133_v63, %v3376_v19  ;;  %v3295_v32 = vpop.f32.mrb[17].mxu1 }
 0x3aa   : > { %v3406_v34 = vadd.f32 %v3374_v26, %v3295_v32  ;;  %v4134_v35 = vpop.f32.mrb[18].mxu1  ;;  %v3835_v38 = vadd.f32 %v3813_v25, %v3640_v44  ;;  %v3821_v26 = vadd.f32 %v5654_v42, %v5684_v3  ;;  %v3382_v32 = vld [vmem:[%s5868_s2 + $0xc0] sm:$0xff] }
 0x3ab   : > { %vm3440_vm5 = vcmp.ge.f32.partialorder %v3408_v28, 0.0  ;;  %v3472_v36 = vmul.f32 0.2, %v3408_v28  ;;  %v3409_v37 = vadd.f32 %v4134_v35, %v3377_v27  ;;  %v3298_v39 = vpop.f32.mrb[19].mxu1 }
 0x3ac   : > { %vm3438_vm11 = vcmp.ge.f32.partialorder %v3406_v34, 0.0  ;;  %v3470_v40 = vmul.f32 0.2, %v3406_v34  ;;  %v3407_v43 = vadd.f32 %v3375_v33, %v3298_v39  ;;  %v3843_v5 = vmul.f32 0.70710677, %v3835_v38  ;;  %v3383_v38 = vld [vmem:[%s5868_s2 + $0xc8] sm:$0xff] }
 0x3ad   : > { %v3504_v41 = vsel %vm3440_vm5, %v3408_v28, %v3472_v36  ;;  %vm3441_vm13 = vcmp.ge.f32.partialorder %v3409_v37, 0.0  ;;  %v3473_v45 = vmul.f32 0.2, %v3409_v37  ;;  %v3384_v28 = vld [vmem:[%s5868_s2 + $0xd0] sm:$0xff] }
 0x3ae   : > { %3536 = vst.msk [vmem:[#allocation6 + $0x90] sm:$0xff] %vm334_vm12, %v3504_v41  ;;  %v3502_v46 = vsel %vm3438_vm11, %v3406_v34, %v3470_v40  ;;  %vm3439_vm15 = vcmp.ge.f32.partialorder %v3407_v43, 0.0  ;;  %v3471_v49 = vmul.f32 0.2, %v3407_v43  ;;  %3851 = vst.msk [vmem:[%s5665_s29 + $0x18] sm:$0xff] %vm334_vm12, %v3843_v5  ;;  %v3385_v34 = vld [vmem:[%s5868_s2 + $0xd8] sm:$0xff] }
 0x3af   : > { %3534 = vst.msk [vmem:[#allocation6 + $0x80] sm:$0xff] %vm334_vm12, %v3502_v46  ;;  %v3505_v51 = vsel %vm3441_vm13, %v3409_v37, %v3473_v45 }
 0x3b0   : > { %3537 = vst.msk [vmem:[#allocation6 + $0x98] sm:$0xff] %vm334_vm12, %v3505_v51  ;;  %v3503_v54 = vsel %vm3439_vm15, %v3407_v43, %v3471_v49 }
 0x3b1   : > { %3535 = vst.msk [vmem:[#allocation6 + $0x88] sm:$0xff] %vm334_vm12, %v3503_v54 }
 0x3b7   : > { %v3568_v55 = vld [vmem:[#allocation6 + $0x90] ss:$2 sm:$0xff]  ;;  %v3600_v52 = vld [vmem:[#allocation6 + $0x91] ss:$2 sm:$0xff] }
 0x3b8   : > { %v3566_v20 = vld [vmem:[#allocation6 + $0x80] ss:$2 sm:$0xff]  ;;  %v3598_v58 = vld [vmem:[#allocation6 + $0x81] ss:$2 sm:$0xff]  ;;  %v3622_v31 = vadd.f32 %v3600_v52, %v3568_v55 }
 0x3b9   : > { %v3621_v59 = vadd.f32 %v3598_v58, %v3566_v20 }
 0x3bb   : > { %v3633_v53 = vadd.f32 %v3622_v31, %v3621_v59 }
 0x3bd   : > { %v3641_v1 = vmul.f32 0.25, %v3633_v53 }
 0x3bf   : > { %v3836_v2 = vadd.f32 %v3818_v62, %v3641_v1  ;;  %v3826_v62 = vadd.f32 %v5656_v48, %v5654_v42 }
 0x3c1   : > { %v3844_v47 = vmul.f32 0.70710677, %v3836_v2 }
 0x3c3   : > { %3852 = vst.msk [vmem:[%s5665_s29 + $0x20] sm:$0xff] %vm334_vm12, %v3844_v47 }
 0x3ca   : > { %v4137_v7 = vpop.f32.mrb[20].mxu1 }
 0x3cb   : > { %v3412_v56 = vadd.f32 %v4137_v7, %v3380_v4  ;;  %v3311_v50 = vpop.f32.mrb[21].mxu1  ;;  %v3386_v7 = vld [vmem:[%s5868_s2 + $0xe0] sm:$0xff] }
 0x3cc   : > { %v3410_v10 = vadd.f32 %v3378_v29, %v3311_v50  ;;  %v4138_v11 = vpop.f32.mrb[22].mxu1  ;;  %v3388_v29 = vld [vmem:[%s5868_s2 + $0xf0] sm:$0xff] }
 0x3cd   : > { %vm3444_vm1 = vcmp.ge.f32.partialorder %v3412_v56, 0.0  ;;  %v3476_v12 = vmul.f32 0.2, %v3412_v56  ;;  %v3413_v13 = vadd.f32 %v4138_v11, %v3381_v8  ;;  %v3314_v14 = vpop.f32.mrb[23].mxu1 }
 0x3ce   : > { %vm3442_vm2 = vcmp.ge.f32.partialorder %v3410_v10, 0.0  ;;  %v3474_v23 = vmul.f32 0.2, %v3410_v10  ;;  %v3411_v15 = vadd.f32 %v3379_v9, %v3314_v14  ;;  %v3387_v9 = vld [vmem:[%s5868_s2 + $0xe8] sm:$0xff] }
 0x3cf   : > { %v3508_v16 = vsel %vm3444_vm1, %v3412_v56, %v3476_v12  ;;  %vm3445_vm3 = vcmp.ge.f32.partialorder %v3413_v13, 0.0  ;;  %v3477_v60 = vmul.f32 0.2, %v3413_v13  ;;  %v3389_v56 = vld [vmem:[%s5868_s2 + $0xf8] sm:$0xff] }
 0x3d0   : > { %3540 = vst.msk [vmem:[#allocation6 + $0xb0] sm:$0xff] %vm334_vm12, %v3508_v16  ;;  %v3506_v61 = vsel %vm3442_vm2, %v3410_v10, %v3474_v23  ;;  %vm3443_vm8 = vcmp.ge.f32.partialorder %v3411_v15, 0.0  ;;  %v3475_v6 = vmul.f32 0.2, %v3411_v15 }
 0x3d1   : > { %3538 = vst.msk [vmem:[#allocation6 + $0xa0] sm:$0xff] %vm334_vm12, %v3506_v61  ;;  %v3509_v17 = vsel %vm3445_vm3, %v3413_v13, %v3477_v60 }
 0x3d2   : > { %3541 = vst.msk [vmem:[#allocation6 + $0xb8] sm:$0xff] %vm334_vm12, %v3509_v17  ;;  %v3507_v18 = vsel %vm3443_vm8, %v3411_v15, %v3475_v6 }
 0x3d3   : > { %3539 = vst.msk [vmem:[#allocation6 + $0xa8] sm:$0xff] %vm334_vm12, %v3507_v18 }
 0x3d9   : > { %v3572_v0 = vld [vmem:[#allocation6 + $0xb0] ss:$2 sm:$0xff]  ;;  %v3604_v21 = vld [vmem:[#allocation6 + $0xb1] ss:$2 sm:$0xff] }
 0x3da   : > { %v3570_v22 = vld [vmem:[#allocation6 + $0xa0] ss:$2 sm:$0xff]  ;;  %v3602_v24 = vld [vmem:[#allocation6 + $0xa1] ss:$2 sm:$0xff]  ;;  %v3624_v19 = vadd.f32 %v3604_v21, %v3572_v0 }
 0x3db   : > { %v3623_v25 = vadd.f32 %v3602_v24, %v3570_v22 }
 0x3dd   : > { %v3634_v30 = vadd.f32 %v3624_v19, %v3623_v25 }
 0x3df   : > { %v3642_v63 = vmul.f32 0.25, %v3634_v30 }
 0x3e1   : > { %v3837_v27 = vadd.f32 %v3821_v26, %v3642_v63  ;;  %v3829_v26 = vadd.f32 %v5669_v57, %v5654_v42 }
 0x3e3   : > { %v3845_v44 = vmul.f32 0.70710677, %v3837_v27 }
 0x3e5   : > { %3853 = vst.msk [vmem:[%s5665_s29 + $0x28] sm:$0xff] %vm334_vm12, %v3845_v44 }
 0x3ea   : > { %v4141_v33 = vpop.f32.mrb[24].mxu1 }
 0x3eb   : > { %v3416_v35 = vadd.f32 %v4141_v33, %v3384_v28  ;;  %v3327_v3 = vpop.f32.mrb[25].mxu1 }
 0x3ec   : > { %v3414_v36 = vadd.f32 %v3382_v32, %v3327_v3  ;;  %v4142_v37 = vpop.f32.mrb[26].mxu1 }
 0x3ed   : > { %vm3448_vm6 = vcmp.ge.f32.partialorder %v3416_v35, 0.0  ;;  %v3480_v39 = vmul.f32 0.2, %v3416_v35  ;;  %v3417_v40 = vadd.f32 %v4142_v37, %v3385_v34  ;;  %v3330_v43 = vpop.f32.mrb[27].mxu1 }
 0x3ee   : > { %vm3446_vm7 = vcmp.ge.f32.partialorder %v3414_v36, 0.0  ;;  %v3478_v5 = vmul.f32 0.2, %v3414_v36  ;;  %v3415_v41 = vadd.f32 %v3383_v38, %v3330_v43 }
 0x3ef   : > { %v3512_v45 = vsel %vm3448_vm6, %v3416_v35, %v3480_v39  ;;  %vm3449_vm0 = vcmp.ge.f32.partialorder %v3417_v40, 0.0  ;;  %v3481_v46 = vmul.f32 0.2, %v3417_v40 }
 0x3f0   : > { %3544 = vst.msk [vmem:[#allocation6 + $0xd0] sm:$0xff] %vm334_vm12, %v3512_v45  ;;  %v3510_v49 = vsel %vm3446_vm7, %v3414_v36, %v3478_v5  ;;  %vm3447_vm9 = vcmp.ge.f32.partialorder %v3415_v41, 0.0  ;;  %v3479_v51 = vmul.f32 0.2, %v3415_v41 }
 0x3f1   : > { %3542 = vst.msk [vmem:[#allocation6 + $0xc0] sm:$0xff] %vm334_vm12, %v3510_v49  ;;  %v3513_v54 = vsel %vm3449_vm0, %v3417_v40, %v3481_v46 }
 0x3f2   : > { %3545 = vst.msk [vmem:[#allocation6 + $0xd8] sm:$0xff] %vm334_vm12, %v3513_v54  ;;  %v3511_v55 = vsel %vm3447_vm9, %v3415_v41, %v3479_v51 }
 0x3f3   : > { %3543 = vst.msk [vmem:[#allocation6 + $0xc8] sm:$0xff] %vm334_vm12, %v3511_v55 }
 0x3f9   : > { %v3576_v52 = vld [vmem:[#allocation6 + $0xd0] ss:$2 sm:$0xff]  ;;  %v3608_v20 = vld [vmem:[#allocation6 + $0xd1] ss:$2 sm:$0xff] }
 0x3fa   : > { %v3626_v58 = vadd.f32 %v3608_v20, %v3576_v52  ;;  %v3574_v31 = vld [vmem:[#allocation6 + $0xc0] ss:$2 sm:$0xff]  ;;  %v3606_v59 = vld [vmem:[#allocation6 + $0xc1] ss:$2 sm:$0xff] }
 0x3fb   : > { %v3625_v53 = vadd.f32 %v3606_v59, %v3574_v31 }
 0x3fd   : > { %v3635_v1 = vadd.f32 %v3626_v58, %v3625_v53 }
 0x3ff   : > { %v3643_v2 = vmul.f32 0.25, %v3635_v1 }
 0x401   : > { %v3838_v47 = vadd.f32 %v3826_v62, %v3643_v2 }
 0x403   : > { %v3846_v4 = vmul.f32 0.70710677, %v3838_v47 }
 0x405   : > { %3854 = vst.msk [vmem:[%s5665_s29 + $0x30] sm:$0xff] %vm334_vm12, %v3846_v4 }
 0x40d   : > { %v4145_v8 = vpop.f32.mrb[28].mxu1 }
 0x40e   : > { %v3420_v48 = vadd.f32 %v4145_v8, %v3388_v29  ;;  %v3343_v50 = vpop.f32.mrb[29].mxu1 }
 0x40f   : > { %v3418_v10 = vadd.f32 %v3386_v7, %v3343_v50  ;;  %v4146_v11 = vpop.f32.mrb[30].mxu1 }
 0x410   : > { %vm3452_vm10 = vcmp.ge.f32.partialorder %v3420_v48, 0.0  ;;  %v3484_v12 = vmul.f32 0.2, %v3420_v48  ;;  %v3421_v13 = vadd.f32 %v4146_v11, %v3389_v56  ;;  %v3346_v14 = vpop.f32.mrb[31].mxu1 }
 0x411   : > { %vm3450_vm4 = vcmp.ge.f32.partialorder %v3418_v10, 0.0  ;;  %v3482_v23 = vmul.f32 0.2, %v3418_v10  ;;  %v3419_v15 = vadd.f32 %v3387_v9, %v3346_v14 }
 0x412   : > { %v3516_v16 = vsel %vm3452_vm10, %v3420_v48, %v3484_v12  ;;  %vm3453_vm14 = vcmp.ge.f32.partialorder %v3421_v13, 0.0  ;;  %v3485_v60 = vmul.f32 0.2, %v3421_v13 }
 0x413   : > { %3548 = vst.msk [vmem:[#allocation6 + $0xf0] sm:$0xff] %vm334_vm12, %v3516_v16  ;;  %v3514_v61 = vsel %vm3450_vm4, %v3418_v10, %v3482_v23  ;;  %vm3451_vm5 = vcmp.ge.f32.partialorder %v3419_v15, 0.0  ;;  %v3483_v6 = vmul.f32 0.2, %v3419_v15 }
 0x414   : > { %3546 = vst.msk [vmem:[#allocation6 + $0xe0] sm:$0xff] %vm334_vm12, %v3514_v61  ;;  %v3517_v17 = vsel %vm3453_vm14, %v3421_v13, %v3485_v60 }
 0x415   : > { %3549 = vst.msk [vmem:[#allocation6 + $0xf8] sm:$0xff] %vm334_vm12, %v3517_v17  ;;  %v3515_v18 = vsel %vm3451_vm5, %v3419_v15, %v3483_v6 }
 0x416   : > { %3547 = vst.msk [vmem:[#allocation6 + $0xe8] sm:$0xff] %vm334_vm12, %v3515_v18 }
 0x41c   : > { %v3580_v0 = vld [vmem:[#allocation6 + $0xf0] ss:$2 sm:$0xff]  ;;  %v3612_v21 = vld [vmem:[#allocation6 + $0xf1] ss:$2 sm:$0xff] }
 0x41d   : > { %v3628_v22 = vadd.f32 %v3612_v21, %v3580_v0  ;;  %v3578_v24 = vld [vmem:[#allocation6 + $0xe0] ss:$2 sm:$0xff]  ;;  %v3610_v19 = vld [vmem:[#allocation6 + $0xe1] ss:$2 sm:$0xff] }
 0x41e   : > { %v3627_v25 = vadd.f32 %v3610_v19, %v3578_v24 }
 0x420   : > { %v3636_v30 = vadd.f32 %v3628_v22, %v3627_v25 }
 0x422   : > { %v3644_v63 = vmul.f32 0.25, %v3636_v30 }
 0x424   : > { %v3839_v27 = vadd.f32 %v3829_v26, %v3644_v63 }
 0x426   : > { %v3847_v44 = vmul.f32 0.70710677, %v3839_v27 }
 0x428   : > { %3855 = vst.msk [vmem:[%s5665_s29 + $0x38] sm:$0xff] %vm334_vm12, %v3847_v44 }
 0x429   : > { %4234 = shalt.err (!%p4231_p3)
}
 0x42a   : > { %s4235_s3 = scalar_lea.hbm %s5816_s15, 1024  ;;  %s4239_s18 = scalar_lea.hbm %s5873_s7, 2048 }
 0x42b   : > { %p4236_p4 = scmp.ne.s32.totalorder %s5816_s15, %s4235_s3  ;;  %p4240_p9 = scmp.lt.u32.totalorder %s5816_s15, %s5873_s7 }
 0x42c   : > { %p4241_p10 = scmp.lt.u32.totalorder %s4239_s18, %s4235_s3  ;;  %p4243_p12 = scmp.lt.u32.totalorder %s4235_s3, %s5816_s15 }
 0x42d   : > { %p4237_p7 = pnand %p4236_p4, %p4378_p5 }
 0x42e   : > { %p4242_p11 = por %p4241_p10, %p4240_p9 }
 0x42f   : > { %p4238_p8 = pneg %p4237_p7 }
 0x430   : > { %p4244_p13 = por %p4243_p12, %p4242_p11 }
 0x432   : > { %p4245_p0 = pnand %p4244_p13, %p4238_p8 }
 0x434   : > { %4248 = shalt.err (!%p4245_p0)
}
 0x435   : > { %s4299_s4 = smov 128  }
 0x436   : > { %4160 = dma.vmem_to_hbm [thread:$0]  (%p4378_p5), %s5818_s14, 1024, %s5816_s15, %s5824_s20, %s4299_s4, %s4299_s4, %s5905_s8  }
 0x437 PF: > { %p4166_p1 = scmp.ge.s32.totalorder %s4283_s27, 2  ;;  %s3885_s13 = sand.u32 1, %s4271_s24  }
 0x438   : > { %s3886_s16 = scalar_lea.sflag [#allocation8], %s3885_s13 }
 0x439   : > { %p4163_p2 = pnand %p4166_p1, %p4382_p6 }
 0x43b   : > { %4266 = dma.done.wait (!%p4163_p2), %s3886_s16, 1024  }
 0x43c   : > { %4268 = vsyncadd (!%p4163_p2), %s3886_s16, 4294966272  ;;  %p17_p3 = scmp.ge.s32.totalorder %s4365_s30, 4   ;;  %s5906_s24 = smov %s4275_s25 }
 0x43d   : > { %s5907_s25 = smov %s4279_s26  ;;  %s5908_s26 = smov %s4376_s10 }
 0x43e   : > { %s5909_s27 = smov %s4365_s30  ;;  %19 = sbr.rel (!%p17_p3) target bundleno = 7 (0x7), region = 149 }
 0x445   :  { %3891 = vsyncpa [#allocation8], 1 }
 0x446   :  { %3893 = vsyncpa [#allocation8 + $0x1], 1 }

</bundles_post_ra>
